<compile_context>
chip_gen: v7x
topology: tpu7x:2x2x1
jax: 0.10.0
libtpu: 0.0.40
codegen_flags: <defaults>
</compile_context>

<pallas_src>
import functools

import jax
import jax.numpy as jnp
from jax.experimental import pallas as pl
from jax.experimental.pallas import tpu as pltpu

NEG_SLOPE = 0.01
TR_MAX = 8      # max conv output rows per grid step
TB_MAX = 256    # max pooled output rows per grid step


def _lrelu(x):
    return jnp.where(x >= 0, x, NEG_SLOPE * x)


def _largest_divisor(n, cap):
    cap = int(max(1, min(n, cap)))
    for d in range(cap, 0, -1):
        if n % d == 0:
            return d
    return 1


def _vmem_limit(nbytes):
    return int(min(max(2 * nbytes, 16 * 1024 * 1024), 32 * 1024 * 1024))


# ----------------------------------------------------------------------------
# Fused 3x3 conv + bias + LeakyReLU kernel (im2col done in-kernel)
# ----------------------------------------------------------------------------
def _conv3x3_bias_lrelu_kernel(x_ref, w_ref, b_ref, o_ref, *, stride, tr, wo, cin):
    """One (batch, row-tile) grid step.

    x_ref: (1, tr*stride + 2, Wc, Ce) bf16  halo'd padded rows
           stride == 1: Wc = W+2,        Ce = Cin
           stride == 2: Wc = (W_pad)//2, Ce = 2*Cin  (W phase folded into lanes)
    w_ref: (9, Cin, Cout) bf16   taps ordered kh*3 + kw
    b_ref: (1, Cout)      f32
    o_ref: (1, tr*wo, Cout) f32
    """
    x = x_ref[0]                                   # (rows_in, Wc, Ce)
    wc = x.shape[1]
    ce = x.shape[2]
    cout = o_ref.shape[2]
    m = tr * wo

    acc = jnp.zeros((m, cout), jnp.float32)
    for kh in range(3):
        if stride == 1:
            rows = x[kh:kh + tr]                                  # (tr, Wc, Cin)
        else:
            rows = x[kh:kh + stride * tr]                         # (s*tr, Wc, Ce)
            rows = rows.reshape(tr, stride, wc, ce)[:, 0]         # (tr, Wc, Ce)
        for kw in range(3):
            if stride == 1:
                cols = rows[:, kw:kw + wo, :]                     # (tr, wo, Cin)
            else:
                p, q = kw % stride, kw // stride
                cols = rows[:, q:q + wo, p * cin:(p + 1) * cin]   # (tr, wo, Cin)
            patch = cols.reshape(m, cin)
            acc = acc + jnp.dot(patch, w_ref[kh * 3 + kw],
                                preferred_element_type=jnp.float32)
    acc = acc + b_ref[...]                          # f32 epilogue
    o_ref[0] = _lrelu(acc).astype(o_ref.dtype)


def conv2d_lrelu(x, w, b, *, stride):
    """LeakyReLU(Conv2d(x; 3x3, pad=1, stride)).  x: (B,H,W,Cin) f32 NHWC,
    w: (3,3,Cin,Cout) HWIO, b: (Cout,)."""
    B, H, W, Cin = x.shape
    Cout = w.shape[-1]
    s = int(stride)
    Ho = (H - 1) // s + 1
    Wo = (W - 1) // s + 1

    # output rows per tile (divides Ho; >=2 tiles whenever Ho >= 2)
    tr = _largest_divisor(Ho, min(TR_MAX, max(1, Ho // 2)) if Ho > 1 else 1)
    n_t = Ho // tr
    rows_in = tr * s + 2

    # zero-pad (pad=1); right-pad W so every in-kernel tap slice is in bounds
    # and (for s>1) the padded width is a multiple of s.
    Wp = max(W + 2, Wo * s + 2)
    Wp = ((Wp + s - 1) // s) * s
    xp = jnp.pad(x.astype(jnp.bfloat16),
                 ((0, 0), (1, 1), (1, Wp - W - 1), (0, 0)))
    if s > 1:
        # free row-major reshape: fold the W phase into the lane (channel) axis
        xp = xp.reshape(B, H + 2, Wp // s, s * Cin)
    Wc, Ce = xp.shape[2], xp.shape[3]

    # halo'd row-tile gather: tile r holds padded rows [r*tr*s, r*tr*s + rows_in)
    row_idx = (jnp.arange(n_t)[:, None] * (tr * s)
               + jnp.arange(rows_in)[None, :]).reshape(-1)
    xh = jnp.take(xp, row_idx, axis=1, mode="clip").reshape(
        B * n_t, rows_in, Wc, Ce)

    w9 = w.astype(jnp.bfloat16).reshape(9, Cin, Cout)
    b2 = b.astype(jnp.float32).reshape(1, Cout)

    m = tr * Wo
    grid = (B * n_t,)

    flops = 2 * B * n_t * m * 9 * Cin * Cout
    bytes_accessed = (xh.size * 2 + w9.size * 2 + b2.size * 4
                      + B * n_t * m * Cout * 4)
    vmem_need = (2 * (rows_in * Wc * Ce * 2 + m * Cout * 4)
                 + 2 * 9 * Cin * Cout * 2 + (1 << 20))

    out = pl.pallas_call(
        functools.partial(_conv3x3_bias_lrelu_kernel,
                          stride=s, tr=tr, wo=Wo, cin=Cin),
        out_shape=jax.ShapeDtypeStruct((B * n_t, m, Cout), jnp.float32),
        grid=grid,
        in_specs=[
            pl.BlockSpec((1, rows_in, Wc, Ce), lambda i: (i, 0, 0, 0)),
            pl.BlockSpec((9, Cin, Cout), lambda i: (0, 0, 0)),
            pl.BlockSpec((1, Cout), lambda i: (0, 0)),
        ],
        out_specs=pl.BlockSpec((1, m, Cout), lambda i: (i, 0, 0)),
        compiler_params=pltpu.CompilerParams(
            dimension_semantics=("parallel",),
            vmem_limit_bytes=_vmem_limit(vmem_need)),
        cost_estimate=pl.CostEstimate(
            flops=flops, transcendentals=0, bytes_accessed=bytes_accessed),
    )(xh, w9, b2)

    return out.reshape(B, n_t, tr, Wo, Cout).reshape(B, Ho, Wo, Cout)


# ----------------------------------------------------------------------------
# Fused 2x2 max-pool + LeakyReLU kernel
# ----------------------------------------------------------------------------
def _maxpool2x2_lrelu_kernel(x_ref, o_ref, *, c):
    v = x_ref[...]                                   # (tb, 2, Wo, 2*C) f32
    v0 = v[:, 0]                                     # even input rows
    v1 = v[:, 1]                                     # odd  input rows
    m = jnp.maximum(jnp.maximum(v0[..., :c], v0[..., c:]),
                    jnp.maximum(v1[..., :c], v1[..., c:]))
    o_ref[...] = _lrelu(m).astype(o_ref.dtype)


def maxpool2x2_lrelu(x):
    """LeakyReLU(MaxPool2d(2,2)(x)).  x: (B,H,W,C) f32 NHWC, H and W even."""
    B, H, W, C = x.shape
    assert H % 2 == 0 and W % 2 == 0
    Ho, Wo = H // 2, W // 2
    N = B * Ho
    # free row-major reshape: (B,H,W,C) -> (B*Ho, 2, Wo, 2*C)
    xr = x.reshape(N, 2, Wo, 2 * C)

    tb = _largest_divisor(N, min(TB_MAX, max(1, N // 2)) if N > 1 else 1)
    grid = (N // tb,)

    bytes_accessed = xr.size * 4 + N * Wo * C * 4
    vmem_need = 2 * (tb * 2 * Wo * 2 * C * 4 + tb * Wo * C * 4) + (1 << 20)

    out = pl.pallas_call(
        functools.partial(_maxpool2x2_lrelu_kernel, c=C),
        out_shape=jax.ShapeDtypeStruct((N, Wo, C), jnp.float32),
        grid=grid,
        in_specs=[pl.BlockSpec((tb, 2, Wo, 2 * C), lambda i: (i, 0, 0, 0))],
        out_specs=pl.BlockSpec((tb, Wo, C), lambda i: (i, 0, 0)),
        compiler_params=pltpu.CompilerParams(
            dimension_semantics=("parallel",),
            vmem_limit_bytes=_vmem_limit(vmem_need)),
        cost_estimate=pl.CostEstimate(
            flops=4 * N * Wo * C, transcendentals=0,
            bytes_accessed=bytes_accessed),
    )(xr)
    return out.reshape(B, Ho, Wo, C)


# ----------------------------------------------------------------------------
# Parameters (deterministic synthetic init; shapes from Ex_Net.__init__)
# ----------------------------------------------------------------------------
def init_params(channl, key):
    def conv_init(key, cin, cout, k=3):
        kw_, kb_ = jax.random.split(key)
        fan_in = cin * k * k
        scale = 1.0 / jnp.sqrt(fan_in)
        w = jax.random.uniform(kw_, (k, k, cin, cout), jnp.float32,
                               minval=-scale, maxval=scale)
        b = jax.random.uniform(kb_, (cout,), jnp.float32,
                               minval=-scale, maxval=scale)
        return w, b

    ks = jax.random.split(key, 5)
    params = {}
    params["w1"], params["b1"] = conv_init(ks[0], channl, 64)
    params["w2"], params["b2"] = conv_init(ks[1], 64, 64)
    params["w3"], params["b3"] = conv_init(ks[2], 64, 128)
    params["w4"], params["b4"] = conv_init(ks[3], 128, 128)
    params["w5"], params["b5"] = conv_init(ks[4], 128, 128)
    return params


# ----------------------------------------------------------------------------
# Forward pass (matches Ex_Net.forward exactly)
# ----------------------------------------------------------------------------
@jax.jit
def ex_net_forward(x_nchw, params):
    x = jnp.transpose(x_nchw, (0, 2, 3, 1))                    # NCHW -> NHWC
    x = conv2d_lrelu(x, params["w1"], params["b1"], stride=1)  # relu(conv1)
    x = conv2d_lrelu(x, params["w2"], params["b2"], stride=1)  # relu(conv2)
    x = maxpool2x2_lrelu(x)                                    # relu(maxpool1)
    x = conv2d_lrelu(x, params["w3"], params["b3"], stride=1)  # relu(conv3)
    x = conv2d_lrelu(x, params["w4"], params["b4"], stride=2)  # relu(conv4)
    x = maxpool2x2_lrelu(x)                                    # relu(maxpool2)
    x = conv2d_lrelu(x, params["w5"], params["b5"], stride=2)  # relu(conv5)
    # TODO(synk): fuse conv4 -> maxpool2 -> conv5 (tiny spatial tail) into a
    # single pallas_call to amortize per-call launch/DMA overhead.
    return jnp.transpose(x, (0, 3, 1, 2))                      # NHWC -> NCHW


# ----------------------------------------------------------------------------
# Pure-JAX reference (for correctness check only)
# ----------------------------------------------------------------------------
def _conv_ref(x, w, b, stride):
    y = jax.lax.conv_general_dilated(
        x, w, window_strides=(stride, stride), padding=((1, 1), (1, 1)),
        dimension_numbers=("NHWC", "HWIO", "NHWC"))
    return _lrelu(y + b)


def _pool_ref(x):
    B, H, W, C = x.shape
    m = x.reshape(B, H // 2, 2, W // 2, 2, C).max(axis=(2, 4))
    return _lrelu(m)


def ex_net_reference(x_nchw, params):
    x = jnp.transpose(x_nchw, (0, 2, 3, 1))
    x = _conv_ref(x, params["w1"], params["b1"], 1)
    x = _conv_ref(x, params["w2"], params["b2"], 1)
    x = _pool_ref(x)
    x = _conv_ref(x, params["w3"], params["b3"], 1)
    x = _conv_ref(x, params["w4"], params["b4"], 2)
    x = _pool_ref(x)
    x = _conv_ref(x, params["w5"], params["b5"], 2)
    return jnp.transpose(x, (0, 3, 1, 2))


if __name__ == "__main__":
    B, C_IN, HW = 2, 4, 16
    key = jax.random.PRNGKey(0)
    k_x, k_p = jax.random.split(key)

    x = jax.random.normal(k_x, (B, C_IN, HW, HW), dtype=jnp.float32)
    params = init_params(C_IN, k_p)

    out = jax.block_until_ready(ex_net_forward(x, params))

    # Shape: 16 -> conv1/2 (16) -> pool (8) -> conv3 (8) -> conv4 s2 (4)
    #        -> pool (2) -> conv5 s2 (1)   =>  (B, 128, 1, 1)
    assert out.shape == (B, 128, 1, 1), out.shape
    assert bool(jnp.all(jnp.isfinite(out)))

    # Correctness vs. pure-JAX f32 reference (bf16 MXU operands -> loose tol).
    ref = jax.block_until_ready(jax.jit(ex_net_reference)(x, params))
    scale = float(jnp.max(jnp.abs(ref))) + 1e-6
    err = float(jnp.max(jnp.abs(out - ref)))
    assert err <= 0.08 * scale, (err, scale)

    print("KERNEL_OK")
</pallas_src>

<mosaic_0001>
module attributes {stable_mosaic.version = 11 : i64} {
  func.func @_conv3x3_bias_lrelu_kernel(%arg0: i32, %arg1: memref<1x10x18x4xbf16, #tpu.memory_space<vmem>>, %arg2: memref<9x4x64xbf16, #tpu.memory_space<vmem>>, %arg3: memref<1x64xf32, #tpu.memory_space<vmem>>, %arg4: memref<1x128x64xf32, #tpu.memory_space<vmem>>) attributes {dimension_semantics = [#tpu.dimension_semantics<parallel>], iteration_bounds = array<i64: 4>, scalar_prefetch = 0 : i64, scratch_operands = 0 : i64, tpu.core_type = #tpu.core_type<tc>, window_params = [{transform_indices = @transform_0, window_bounds = array<i64: 1, 10, 18, 4>}, {pipeline_mode = #tpu.pipeline_mode<synchronous>, transform_indices = @transform_1, window_bounds = array<i64: 9, 4, 64>}, {pipeline_mode = #tpu.pipeline_mode<synchronous>, transform_indices = @transform_2, window_bounds = array<i64: 1, 64>}, {transform_indices = @transform_3, window_bounds = array<i64: 1, 128, 64>}]} {
    %c0 = arith.constant 0 : index
    %c0_0 = arith.constant 0 : index
    %c0_1 = arith.constant 0 : index
    %c0_2 = arith.constant 0 : index
    %0 = vector.load %arg1[%c0, %c0_0, %c0_1, %c0_2] : memref<1x10x18x4xbf16, #tpu.memory_space<vmem>>, vector<1x10x18x4xbf16>
    %1 = vector.shape_cast %0 : vector<1x10x18x4xbf16> to vector<10x18x4xbf16>
    %cst = arith.constant 0.000000e+00 : f32
    %2 = vector.broadcast %cst : f32 to vector<128x64xf32>
    %3 = vector.extract_strided_slice %1 {offsets = [0, 0, 0], sizes = [8, 18, 4], strides = [1, 1, 1]} : vector<10x18x4xbf16> to vector<8x18x4xbf16>
    %4 = vector.extract_strided_slice %3 {offsets = [0, 0, 0], sizes = [8, 16, 4], strides = [1, 1, 1]} : vector<8x18x4xbf16> to vector<8x16x4xbf16>
    %5 = vector.shape_cast %4 : vector<8x16x4xbf16> to vector<128x4xbf16>
    %c0_3 = arith.constant 0 : index
    %c0_4 = arith.constant 0 : index
    %c0_5 = arith.constant 0 : index
    %6 = vector.load %arg2[%c0_3, %c0_4, %c0_5] : memref<9x4x64xbf16, #tpu.memory_space<vmem>>, vector<1x4x64xbf16>
    %7 = vector.shape_cast %6 : vector<1x4x64xbf16> to vector<4x64xbf16>
    %cst_6 = arith.constant dense<0.000000e+00> : vector<128x64xf32>
    %8 = tpu.matmul %5, %7, %cst_6 {dimension_numbers = #tpu.dot_dimension_numbers<[1], [0], [0], [1], [0, 0, 1, 1], [], []>} : vector<128x4xbf16>, vector<4x64xbf16>, vector<128x64xf32> -> vector<128x64xf32>
    %9 = arith.addf %2, %8 : vector<128x64xf32>
    %10 = vector.extract_strided_slice %3 {offsets = [0, 1, 0], sizes = [8, 16, 4], strides = [1, 1, 1]} : vector<8x18x4xbf16> to vector<8x16x4xbf16>
    %11 = vector.shape_cast %10 : vector<8x16x4xbf16> to vector<128x4xbf16>
    %c1 = arith.constant 1 : index
    %c0_7 = arith.constant 0 : index
    %c0_8 = arith.constant 0 : index
    %12 = vector.load %arg2[%c1, %c0_7, %c0_8] : memref<9x4x64xbf16, #tpu.memory_space<vmem>>, vector<1x4x64xbf16>
    %13 = vector.shape_cast %12 : vector<1x4x64xbf16> to vector<4x64xbf16>
    %cst_9 = arith.constant dense<0.000000e+00> : vector<128x64xf32>
    %14 = tpu.matmul %11, %13, %cst_9 {dimension_numbers = #tpu.dot_dimension_numbers<[1], [0], [0], [1], [0, 0, 1, 1], [], []>} : vector<128x4xbf16>, vector<4x64xbf16>, vector<128x64xf32> -> vector<128x64xf32>
    %15 = arith.addf %9, %14 : vector<128x64xf32>
    %16 = vector.extract_strided_slice %3 {offsets = [0, 2, 0], sizes = [8, 16, 4], strides = [1, 1, 1]} : vector<8x18x4xbf16> to vector<8x16x4xbf16>
    %17 = vector.shape_cast %16 : vector<8x16x4xbf16> to vector<128x4xbf16>
    %c2 = arith.constant 2 : index
    %c0_10 = arith.constant 0 : index
    %c0_11 = arith.constant 0 : index
    %18 = vector.load %arg2[%c2, %c0_10, %c0_11] : memref<9x4x64xbf16, #tpu.memory_space<vmem>>, vector<1x4x64xbf16>
    %19 = vector.shape_cast %18 : vector<1x4x64xbf16> to vector<4x64xbf16>
    %cst_12 = arith.constant dense<0.000000e+00> : vector<128x64xf32>
    %20 = tpu.matmul %17, %19, %cst_12 {dimension_numbers = #tpu.dot_dimension_numbers<[1], [0], [0], [1], [0, 0, 1, 1], [], []>} : vector<128x4xbf16>, vector<4x64xbf16>, vector<128x64xf32> -> vector<128x64xf32>
    %21 = arith.addf %15, %20 : vector<128x64xf32>
    %22 = vector.extract_strided_slice %1 {offsets = [1, 0, 0], sizes = [8, 18, 4], strides = [1, 1, 1]} : vector<10x18x4xbf16> to vector<8x18x4xbf16>
    %23 = vector.extract_strided_slice %22 {offsets = [0, 0, 0], sizes = [8, 16, 4], strides = [1, 1, 1]} : vector<8x18x4xbf16> to vector<8x16x4xbf16>
    %24 = vector.shape_cast %23 : vector<8x16x4xbf16> to vector<128x4xbf16>
    %c3 = arith.constant 3 : index
    %c0_13 = arith.constant 0 : index
    %c0_14 = arith.constant 0 : index
    %25 = vector.load %arg2[%c3, %c0_13, %c0_14] : memref<9x4x64xbf16, #tpu.memory_space<vmem>>, vector<1x4x64xbf16>
    %26 = vector.shape_cast %25 : vector<1x4x64xbf16> to vector<4x64xbf16>
    %cst_15 = arith.constant dense<0.000000e+00> : vector<128x64xf32>
    %27 = tpu.matmul %24, %26, %cst_15 {dimension_numbers = #tpu.dot_dimension_numbers<[1], [0], [0], [1], [0, 0, 1, 1], [], []>} : vector<128x4xbf16>, vector<4x64xbf16>, vector<128x64xf32> -> vector<128x64xf32>
    %28 = arith.addf %21, %27 : vector<128x64xf32>
    %29 = vector.extract_strided_slice %22 {offsets = [0, 1, 0], sizes = [8, 16, 4], strides = [1, 1, 1]} : vector<8x18x4xbf16> to vector<8x16x4xbf16>
    %30 = vector.shape_cast %29 : vector<8x16x4xbf16> to vector<128x4xbf16>
    %c4 = arith.constant 4 : index
    %c0_16 = arith.constant 0 : index
    %c0_17 = arith.constant 0 : index
    %31 = vector.load %arg2[%c4, %c0_16, %c0_17] : memref<9x4x64xbf16, #tpu.memory_space<vmem>>, vector<1x4x64xbf16>
    %32 = vector.shape_cast %31 : vector<1x4x64xbf16> to vector<4x64xbf16>
    %cst_18 = arith.constant dense<0.000000e+00> : vector<128x64xf32>
    %33 = tpu.matmul %30, %32, %cst_18 {dimension_numbers = #tpu.dot_dimension_numbers<[1], [0], [0], [1], [0, 0, 1, 1], [], []>} : vector<128x4xbf16>, vector<4x64xbf16>, vector<128x64xf32> -> vector<128x64xf32>
    %34 = arith.addf %28, %33 : vector<128x64xf32>
    %35 = vector.extract_strided_slice %22 {offsets = [0, 2, 0], sizes = [8, 16, 4], strides = [1, 1, 1]} : vector<8x18x4xbf16> to vector<8x16x4xbf16>
    %36 = vector.shape_cast %35 : vector<8x16x4xbf16> to vector<128x4xbf16>
    %c5 = arith.constant 5 : index
    %c0_19 = arith.constant 0 : index
    %c0_20 = arith.constant 0 : index
    %37 = vector.load %arg2[%c5, %c0_19, %c0_20] : memref<9x4x64xbf16, #tpu.memory_space<vmem>>, vector<1x4x64xbf16>
    %38 = vector.shape_cast %37 : vector<1x4x64xbf16> to vector<4x64xbf16>
    %cst_21 = arith.constant dense<0.000000e+00> : vector<128x64xf32>
    %39 = tpu.matmul %36, %38, %cst_21 {dimension_numbers = #tpu.dot_dimension_numbers<[1], [0], [0], [1], [0, 0, 1, 1], [], []>} : vector<128x4xbf16>, vector<4x64xbf16>, vector<128x64xf32> -> vector<128x64xf32>
    %40 = arith.addf %34, %39 : vector<128x64xf32>
    %41 = vector.extract_strided_slice %1 {offsets = [2, 0, 0], sizes = [8, 18, 4], strides = [1, 1, 1]} : vector<10x18x4xbf16> to vector<8x18x4xbf16>
    %42 = vector.extract_strided_slice %41 {offsets = [0, 0, 0], sizes = [8, 16, 4], strides = [1, 1, 1]} : vector<8x18x4xbf16> to vector<8x16x4xbf16>
    %43 = vector.shape_cast %42 : vector<8x16x4xbf16> to vector<128x4xbf16>
    %c6 = arith.constant 6 : index
    %c0_22 = arith.constant 0 : index
    %c0_23 = arith.constant 0 : index
    %44 = vector.load %arg2[%c6, %c0_22, %c0_23] : memref<9x4x64xbf16, #tpu.memory_space<vmem>>, vector<1x4x64xbf16>
    %45 = vector.shape_cast %44 : vector<1x4x64xbf16> to vector<4x64xbf16>
    %cst_24 = arith.constant dense<0.000000e+00> : vector<128x64xf32>
    %46 = tpu.matmul %43, %45, %cst_24 {dimension_numbers = #tpu.dot_dimension_numbers<[1], [0], [0], [1], [0, 0, 1, 1], [], []>} : vector<128x4xbf16>, vector<4x64xbf16>, vector<128x64xf32> -> vector<128x64xf32>
    %47 = arith.addf %40, %46 : vector<128x64xf32>
    %48 = vector.extract_strided_slice %41 {offsets = [0, 1, 0], sizes = [8, 16, 4], strides = [1, 1, 1]} : vector<8x18x4xbf16> to vector<8x16x4xbf16>
    %49 = vector.shape_cast %48 : vector<8x16x4xbf16> to vector<128x4xbf16>
    %c7 = arith.constant 7 : index
    %c0_25 = arith.constant 0 : index
    %c0_26 = arith.constant 0 : index
    %50 = vector.load %arg2[%c7, %c0_25, %c0_26] : memref<9x4x64xbf16, #tpu.memory_space<vmem>>, vector<1x4x64xbf16>
    %51 = vector.shape_cast %50 : vector<1x4x64xbf16> to vector<4x64xbf16>
    %cst_27 = arith.constant dense<0.000000e+00> : vector<128x64xf32>
    %52 = tpu.matmul %49, %51, %cst_27 {dimension_numbers = #tpu.dot_dimension_numbers<[1], [0], [0], [1], [0, 0, 1, 1], [], []>} : vector<128x4xbf16>, vector<4x64xbf16>, vector<128x64xf32> -> vector<128x64xf32>
    %53 = arith.addf %47, %52 : vector<128x64xf32>
    %54 = vector.extract_strided_slice %41 {offsets = [0, 2, 0], sizes = [8, 16, 4], strides = [1, 1, 1]} : vector<8x18x4xbf16> to vector<8x16x4xbf16>
    %55 = vector.shape_cast %54 : vector<8x16x4xbf16> to vector<128x4xbf16>
    %c8 = arith.constant 8 : index
    %c0_28 = arith.constant 0 : index
    %c0_29 = arith.constant 0 : index
    %56 = vector.load %arg2[%c8, %c0_28, %c0_29] : memref<9x4x64xbf16, #tpu.memory_space<vmem>>, vector<1x4x64xbf16>
    %57 = vector.shape_cast %56 : vector<1x4x64xbf16> to vector<4x64xbf16>
    %cst_30 = arith.constant dense<0.000000e+00> : vector<128x64xf32>
    %58 = tpu.matmul %55, %57, %cst_30 {dimension_numbers = #tpu.dot_dimension_numbers<[1], [0], [0], [1], [0, 0, 1, 1], [], []>} : vector<128x4xbf16>, vector<4x64xbf16>, vector<128x64xf32> -> vector<128x64xf32>
    %59 = arith.addf %53, %58 : vector<128x64xf32>
    %c0_31 = arith.constant 0 : index
    %c0_32 = arith.constant 0 : index
    %60 = vector.load %arg3[%c0_31, %c0_32] : memref<1x64xf32, #tpu.memory_space<vmem>>, vector<1x64xf32>
    %61 = vector.broadcast %60 : vector<1x64xf32> to vector<128x64xf32>
    %62 = arith.addf %59, %61 : vector<128x64xf32>
    %cst_33 = arith.constant 0.000000e+00 : f32
    %63 = vector.broadcast %cst_33 : f32 to vector<128x64xf32>
    %64 = arith.cmpf oge, %62, %63 : vector<128x64xf32>
    %cst_34 = arith.constant 0.00999999977 : f32
    %65 = vector.broadcast %cst_34 : f32 to vector<128x64xf32>
    %66 = arith.mulf %65, %62 : vector<128x64xf32>
    %67 = arith.select %64, %62, %66 : vector<128x64xi1>, vector<128x64xf32>
    %c0_35 = arith.constant 0 : index
    %c0_36 = arith.constant 0 : index
    %c0_37 = arith.constant 0 : index
    %68 = vector.load %arg4[%c0_35, %c0_36, %c0_37] : memref<1x128x64xf32, #tpu.memory_space<vmem>>, vector<1x128x64xf32>
    %69 = vector.shape_cast %68 : vector<1x128x64xf32> to vector<128x64xf32>
    %70 = vector.shape_cast %67 : vector<128x64xf32> to vector<1x128x64xf32>
    tpu.vector_store %arg4[%c0_35, %c0_36, %c0_37], %70 {strides = array<i32>} : memref<1x128x64xf32, #tpu.memory_space<vmem>>, vector<1x128x64xf32>,
    return
  }
  func.func @transform_0(%arg0: i32) -> (i32, i32, i32, i32) {
    %c0_i32 = arith.constant 0 : i32
    %c0_i32_0 = arith.constant 0 : i32
    %c0_i32_1 = arith.constant 0 : i32
    %c0_i32_2 = arith.constant 0 : i32
    return %arg0, %c0_i32, %c0_i32_0, %c0_i32_1 : i32, i32, i32, i32
  }
  func.func @transform_1(%arg0: i32) -> (i32, i32, i32) {
    %c0_i32 = arith.constant 0 : i32
    %c0_i32_0 = arith.constant 0 : i32
    %c0_i32_1 = arith.constant 0 : i32
    %c0_i32_2 = arith.constant 0 : i32
    return %c0_i32, %c0_i32_0, %c0_i32_1 : i32, i32, i32
  }
  func.func @transform_2(%arg0: i32) -> (i32, i32) {
    %c0_i32 = arith.constant 0 : i32
    %c0_i32_0 = arith.constant 0 : i32
    %c0_i32_1 = arith.constant 0 : i32
    return %c0_i32, %c0_i32_0 : i32, i32
  }
  func.func @transform_3(%arg0: i32) -> (i32, i32, i32) {
    %c0_i32 = arith.constant 0 : i32
    %c0_i32_0 = arith.constant 0 : i32
    %c0_i32_1 = arith.constant 0 : i32
    return %arg0, %c0_i32, %c0_i32_0 : i32, i32, i32
  }
}

module attributes {stable_mosaic.version = 11 : i64} {
  func.func @_maxpool2x2_lrelu_kernel(%arg0: i32, %arg1: memref<8x2x8x128xf32, #tpu.memory_space<vmem>>, %arg2: memref<8x8x64xf32, #tpu.memory_space<vmem>>) attributes {dimension_semantics = [#tpu.dimension_semantics<parallel>], iteration_bounds = array<i64: 2>, scalar_prefetch = 0 : i64, scratch_operands = 0 : i64, tpu.core_type = #tpu.core_type<tc>, window_params = [{transform_indices = @transform_0, window_bounds = array<i64: 8, 2, 8, 128>}, {transform_indices = @transform_1, window_bounds = array<i64: 8, 8, 64>}]} {
    %c0 = arith.constant 0 : index
    %c0_0 = arith.constant 0 : index
    %c0_1 = arith.constant 0 : index
    %c0_2 = arith.constant 0 : index
    %0 = vector.load %arg1[%c0, %c0_0, %c0_1, %c0_2] : memref<8x2x8x128xf32, #tpu.memory_space<vmem>>, vector<8x2x8x128xf32>
    %1 = vector.extract_strided_slice %0 {offsets = [0, 0, 0, 0], sizes = [8, 1, 8, 128], strides = [1, 1, 1, 1]} : vector<8x2x8x128xf32> to vector<8x1x8x128xf32>
    %2 = vector.shape_cast %1 : vector<8x1x8x128xf32> to vector<8x8x128xf32>
    %3 = vector.extract_strided_slice %0 {offsets = [0, 1, 0, 0], sizes = [8, 1, 8, 128], strides = [1, 1, 1, 1]} : vector<8x2x8x128xf32> to vector<8x1x8x128xf32>
    %4 = vector.shape_cast %3 : vector<8x1x8x128xf32> to vector<8x8x128xf32>
    %5 = vector.extract_strided_slice %2 {offsets = [0, 0, 0], sizes = [8, 8, 64], strides = [1, 1, 1]} : vector<8x8x128xf32> to vector<8x8x64xf32>
    %6 = vector.extract_strided_slice %2 {offsets = [0, 0, 64], sizes = [8, 8, 64], strides = [1, 1, 1]} : vector<8x8x128xf32> to vector<8x8x64xf32>
    %7 = arith.maximumf %5, %6 : vector<8x8x64xf32>
    %8 = vector.extract_strided_slice %4 {offsets = [0, 0, 0], sizes = [8, 8, 64], strides = [1, 1, 1]} : vector<8x8x128xf32> to vector<8x8x64xf32>
    %9 = vector.extract_strided_slice %4 {offsets = [0, 0, 64], sizes = [8, 8, 64], strides = [1, 1, 1]} : vector<8x8x128xf32> to vector<8x8x64xf32>
    %10 = arith.maximumf %8, %9 : vector<8x8x64xf32>
    %11 = arith.maximumf %7, %10 : vector<8x8x64xf32>
    %cst = arith.constant 0.000000e+00 : f32
    %12 = vector.broadcast %cst : f32 to vector<8x8x64xf32>
    %13 = arith.cmpf oge, %11, %12 : vector<8x8x64xf32>
    %cst_3 = arith.constant 0.00999999977 : f32
    %14 = vector.broadcast %cst_3 : f32 to vector<8x8x64xf32>
    %15 = arith.mulf %14, %11 : vector<8x8x64xf32>
    %16 = arith.select %13, %11, %15 : vector<8x8x64xi1>, vector<8x8x64xf32>
    %c0_4 = arith.constant 0 : index
    %c0_5 = arith.constant 0 : index
    %c0_6 = arith.constant 0 : index
    %17 = vector.load %arg2[%c0_4, %c0_5, %c0_6] : memref<8x8x64xf32, #tpu.memory_space<vmem>>, vector<8x8x64xf32>
    tpu.vector_store %arg2[%c0_4, %c0_5, %c0_6], %16 {strides = array<i32>} : memref<8x8x64xf32, #tpu.memory_space<vmem>>, vector<8x8x64xf32>,
    return
  }
  func.func @transform_0(%arg0: i32) -> (i32, i32, i32, i32) {
    %c0_i32 = arith.constant 0 : i32
    %c0_i32_0 = arith.constant 0 : i32
    %c0_i32_1 = arith.constant 0 : i32
    %c0_i32_2 = arith.constant 0 : i32
    return %arg0, %c0_i32, %c0_i32_0, %c0_i32_1 : i32, i32, i32, i32
  }
  func.func @transform_1(%arg0: i32) -> (i32, i32, i32) {
    %c0_i32 = arith.constant 0 : i32
    %c0_i32_0 = arith.constant 0 : i32
    %c0_i32_1 = arith.constant 0 : i32
    return %arg0, %c0_i32, %c0_i32_0 : i32, i32, i32
  }
}

module attributes {stable_mosaic.version = 11 : i64} {
  func.func @_conv3x3_bias_lrelu_kernel(%arg0: i32, %arg1: memref<1x10x18x64xbf16, #tpu.memory_space<vmem>>, %arg2: memref<9x64x64xbf16, #tpu.memory_space<vmem>>, %arg3: memref<1x64xf32, #tpu.memory_space<vmem>>, %arg4: memref<1x128x64xf32, #tpu.memory_space<vmem>>) attributes {dimension_semantics = [#tpu.dimension_semantics<parallel>], iteration_bounds = array<i64: 4>, scalar_prefetch = 0 : i64, scratch_operands = 0 : i64, tpu.core_type = #tpu.core_type<tc>, window_params = [{transform_indices = @transform_0, window_bounds = array<i64: 1, 10, 18, 64>}, {pipeline_mode = #tpu.pipeline_mode<synchronous>, transform_indices = @transform_1, window_bounds = array<i64: 9, 64, 64>}, {pipeline_mode = #tpu.pipeline_mode<synchronous>, transform_indices = @transform_2, window_bounds = array<i64: 1, 64>}, {transform_indices = @transform_3, window_bounds = array<i64: 1, 128, 64>}]} {
    %c0 = arith.constant 0 : index
    %c0_0 = arith.constant 0 : index
    %c0_1 = arith.constant 0 : index
    %c0_2 = arith.constant 0 : index
    %0 = vector.load %arg1[%c0, %c0_0, %c0_1, %c0_2] : memref<1x10x18x64xbf16, #tpu.memory_space<vmem>>, vector<1x10x18x64xbf16>
    %1 = vector.shape_cast %0 : vector<1x10x18x64xbf16> to vector<10x18x64xbf16>
    %cst = arith.constant 0.000000e+00 : f32
    %2 = vector.broadcast %cst : f32 to vector<128x64xf32>
    %3 = vector.extract_strided_slice %1 {offsets = [0, 0, 0], sizes = [8, 18, 64], strides = [1, 1, 1]} : vector<10x18x64xbf16> to vector<8x18x64xbf16>
    %4 = vector.extract_strided_slice %3 {offsets = [0, 0, 0], sizes = [8, 16, 64], strides = [1, 1, 1]} : vector<8x18x64xbf16> to vector<8x16x64xbf16>
    %5 = vector.shape_cast %4 : vector<8x16x64xbf16> to vector<128x64xbf16>
    %c0_3 = arith.constant 0 : index
    %c0_4 = arith.constant 0 : index
    %c0_5 = arith.constant 0 : index
    %6 = vector.load %arg2[%c0_3, %c0_4, %c0_5] : memref<9x64x64xbf16, #tpu.memory_space<vmem>>, vector<1x64x64xbf16>
    %7 = vector.shape_cast %6 : vector<1x64x64xbf16> to vector<64x64xbf16>
    %cst_6 = arith.constant dense<0.000000e+00> : vector<128x64xf32>
    %8 = tpu.matmul %5, %7, %cst_6 {dimension_numbers = #tpu.dot_dimension_numbers<[1], [0], [0], [1], [0, 0, 1, 1], [], []>} : vector<128x64xbf16>, vector<64x64xbf16>, vector<128x64xf32> -> vector<128x64xf32>
    %9 = arith.addf %2, %8 : vector<128x64xf32>
    %10 = vector.extract_strided_slice %3 {offsets = [0, 1, 0], sizes = [8, 16, 64], strides = [1, 1, 1]} : vector<8x18x64xbf16> to vector<8x16x64xbf16>
    %11 = vector.shape_cast %10 : vector<8x16x64xbf16> to vector<128x64xbf16>
    %c1 = arith.constant 1 : index
    %c0_7 = arith.constant 0 : index
    %c0_8 = arith.constant 0 : index
    %12 = vector.load %arg2[%c1, %c0_7, %c0_8] : memref<9x64x64xbf16, #tpu.memory_space<vmem>>, vector<1x64x64xbf16>
    %13 = vector.shape_cast %12 : vector<1x64x64xbf16> to vector<64x64xbf16>
    %cst_9 = arith.constant dense<0.000000e+00> : vector<128x64xf32>
    %14 = tpu.matmul %11, %13, %cst_9 {dimension_numbers = #tpu.dot_dimension_numbers<[1], [0], [0], [1], [0, 0, 1, 1], [], []>} : vector<128x64xbf16>, vector<64x64xbf16>, vector<128x64xf32> -> vector<128x64xf32>
    %15 = arith.addf %9, %14 : vector<128x64xf32>
    %16 = vector.extract_strided_slice %3 {offsets = [0, 2, 0], sizes = [8, 16, 64], strides = [1, 1, 1]} : vector<8x18x64xbf16> to vector<8x16x64xbf16>
    %17 = vector.shape_cast %16 : vector<8x16x64xbf16> to vector<128x64xbf16>
    %c2 = arith.constant 2 : index
    %c0_10 = arith.constant 0 : index
    %c0_11 = arith.constant 0 : index
    %18 = vector.load %arg2[%c2, %c0_10, %c0_11] : memref<9x64x64xbf16, #tpu.memory_space<vmem>>, vector<1x64x64xbf16>
    %19 = vector.shape_cast %18 : vector<1x64x64xbf16> to vector<64x64xbf16>
    %cst_12 = arith.constant dense<0.000000e+00> : vector<128x64xf32>
    %20 = tpu.matmul %17, %19, %cst_12 {dimension_numbers = #tpu.dot_dimension_numbers<[1], [0], [0], [1], [0, 0, 1, 1], [], []>} : vector<128x64xbf16>, vector<64x64xbf16>, vector<128x64xf32> -> vector<128x64xf32>
    %21 = arith.addf %15, %20 : vector<128x64xf32>
    %22 = vector.extract_strided_slice %1 {offsets = [1, 0, 0], sizes = [8, 18, 64], strides = [1, 1, 1]} : vector<10x18x64xbf16> to vector<8x18x64xbf16>
    %23 = vector.extract_strided_slice %22 {offsets = [0, 0, 0], sizes = [8, 16, 64], strides = [1, 1, 1]} : vector<8x18x64xbf16> to vector<8x16x64xbf16>
    %24 = vector.shape_cast %23 : vector<8x16x64xbf16> to vector<128x64xbf16>
    %c3 = arith.constant 3 : index
    %c0_13 = arith.constant 0 : index
    %c0_14 = arith.constant 0 : index
    %25 = vector.load %arg2[%c3, %c0_13, %c0_14] : memref<9x64x64xbf16, #tpu.memory_space<vmem>>, vector<1x64x64xbf16>
    %26 = vector.shape_cast %25 : vector<1x64x64xbf16> to vector<64x64xbf16>
    %cst_15 = arith.constant dense<0.000000e+00> : vector<128x64xf32>
    %27 = tpu.matmul %24, %26, %cst_15 {dimension_numbers = #tpu.dot_dimension_numbers<[1], [0], [0], [1], [0, 0, 1, 1], [], []>} : vector<128x64xbf16>, vector<64x64xbf16>, vector<128x64xf32> -> vector<128x64xf32>
    %28 = arith.addf %21, %27 : vector<128x64xf32>
    %29 = vector.extract_strided_slice %22 {offsets = [0, 1, 0], sizes = [8, 16, 64], strides = [1, 1, 1]} : vector<8x18x64xbf16> to vector<8x16x64xbf16>
    %30 = vector.shape_cast %29 : vector<8x16x64xbf16> to vector<128x64xbf16>
    %c4 = arith.constant 4 : index
    %c0_16 = arith.constant 0 : index
    %c0_17 = arith.constant 0 : index
    %31 = vector.load %arg2[%c4, %c0_16, %c0_17] : memref<9x64x64xbf16, #tpu.memory_space<vmem>>, vector<1x64x64xbf16>
    %32 = vector.shape_cast %31 : vector<1x64x64xbf16> to vector<64x64xbf16>
    %cst_18 = arith.constant dense<0.000000e+00> : vector<128x64xf32>
    %33 = tpu.matmul %30, %32, %cst_18 {dimension_numbers = #tpu.dot_dimension_numbers<[1], [0], [0], [1], [0, 0, 1, 1], [], []>} : vector<128x64xbf16>, vector<64x64xbf16>, vector<128x64xf32> -> vector<128x64xf32>
    %34 = arith.addf %28, %33 : vector<128x64xf32>
    %35 = vector.extract_strided_slice %22 {offsets = [0, 2, 0], sizes = [8, 16, 64], strides = [1, 1, 1]} : vector<8x18x64xbf16> to vector<8x16x64xbf16>
    %36 = vector.shape_cast %35 : vector<8x16x64xbf16> to vector<128x64xbf16>
    %c5 = arith.constant 5 : index
    %c0_19 = arith.constant 0 : index
    %c0_20 = arith.constant 0 : index
    %37 = vector.load %arg2[%c5, %c0_19, %c0_20] : memref<9x64x64xbf16, #tpu.memory_space<vmem>>, vector<1x64x64xbf16>
    %38 = vector.shape_cast %37 : vector<1x64x64xbf16> to vector<64x64xbf16>
    %cst_21 = arith.constant dense<0.000000e+00> : vector<128x64xf32>
    %39 = tpu.matmul %36, %38, %cst_21 {dimension_numbers = #tpu.dot_dimension_numbers<[1], [0], [0], [1], [0, 0, 1, 1], [], []>} : vector<128x64xbf16>, vector<64x64xbf16>, vector<128x64xf32> -> vector<128x64xf32>
    %40 = arith.addf %34, %39 : vector<128x64xf32>
    %41 = vector.extract_strided_slice %1 {offsets = [2, 0, 0], sizes = [8, 18, 64], strides = [1, 1, 1]} : vector<10x18x64xbf16> to vector<8x18x64xbf16>
    %42 = vector.extract_strided_slice %41 {offsets = [0, 0, 0], sizes = [8, 16, 64], strides = [1, 1, 1]} : vector<8x18x64xbf16> to vector<8x16x64xbf16>
    %43 = vector.shape_cast %42 : vector<8x16x64xbf16> to vector<128x64xbf16>
    %c6 = arith.constant 6 : index
    %c0_22 = arith.constant 0 : index
    %c0_23 = arith.constant 0 : index
    %44 = vector.load %arg2[%c6, %c0_22, %c0_23] : memref<9x64x64xbf16, #tpu.memory_space<vmem>>, vector<1x64x64xbf16>
    %45 = vector.shape_cast %44 : vector<1x64x64xbf16> to vector<64x64xbf16>
    %cst_24 = arith.constant dense<0.000000e+00> : vector<128x64xf32>
    %46 = tpu.matmul %43, %45, %cst_24 {dimension_numbers = #tpu.dot_dimension_numbers<[1], [0], [0], [1], [0, 0, 1, 1], [], []>} : vector<128x64xbf16>, vector<64x64xbf16>, vector<128x64xf32> -> vector<128x64xf32>
    %47 = arith.addf %40, %46 : vector<128x64xf32>
    %48 = vector.extract_strided_slice %41 {offsets = [0, 1, 0], sizes = [8, 16, 64], strides = [1, 1, 1]} : vector<8x18x64xbf16> to vector<8x16x64xbf16>
    %49 = vector.shape_cast %48 : vector<8x16x64xbf16> to vector<128x64xbf16>
    %c7 = arith.constant 7 : index
    %c0_25 = arith.constant 0 : index
    %c0_26 = arith.constant 0 : index
    %50 = vector.load %arg2[%c7, %c0_25, %c0_26] : memref<9x64x64xbf16, #tpu.memory_space<vmem>>, vector<1x64x64xbf16>
    %51 = vector.shape_cast %50 : vector<1x64x64xbf16> to vector<64x64xbf16>
    %cst_27 = arith.constant dense<0.000000e+00> : vector<128x64xf32>
    %52 = tpu.matmul %49, %51, %cst_27 {dimension_numbers = #tpu.dot_dimension_numbers<[1], [0], [0], [1], [0, 0, 1, 1], [], []>} : vector<128x64xbf16>, vector<64x64xbf16>, vector<128x64xf32> -> vector<128x64xf32>
    %53 = arith.addf %47, %52 : vector<128x64xf32>
    %54 = vector.extract_strided_slice %41 {offsets = [0, 2, 0], sizes = [8, 16, 64], strides = [1, 1, 1]} : vector<8x18x64xbf16> to vector<8x16x64xbf16>
    %55 = vector.shape_cast %54 : vector<8x16x64xbf16> to vector<128x64xbf16>
    %c8 = arith.constant 8 : index
    %c0_28 = arith.constant 0 : index
    %c0_29 = arith.constant 0 : index
    %56 = vector.load %arg2[%c8, %c0_28, %c0_29] : memref<9x64x64xbf16, #tpu.memory_space<vmem>>, vector<1x64x64xbf16>
    %57 = vector.shape_cast %56 : vector<1x64x64xbf16> to vector<64x64xbf16>
    %cst_30 = arith.constant dense<0.000000e+00> : vector<128x64xf32>
    %58 = tpu.matmul %55, %57, %cst_30 {dimension_numbers = #tpu.dot_dimension_numbers<[1], [0], [0], [1], [0, 0, 1, 1], [], []>} : vector<128x64xbf16>, vector<64x64xbf16>, vector<128x64xf32> -> vector<128x64xf32>
    %59 = arith.addf %53, %58 : vector<128x64xf32>
    %c0_31 = arith.constant 0 : index
    %c0_32 = arith.constant 0 : index
    %60 = vector.load %arg3[%c0_31, %c0_32] : memref<1x64xf32, #tpu.memory_space<vmem>>, vector<1x64xf32>
    %61 = vector.broadcast %60 : vector<1x64xf32> to vector<128x64xf32>
    %62 = arith.addf %59, %61 : vector<128x64xf32>
    %cst_33 = arith.constant 0.000000e+00 : f32
    %63 = vector.broadcast %cst_33 : f32 to vector<128x64xf32>
    %64 = arith.cmpf oge, %62, %63 : vector<128x64xf32>
    %cst_34 = arith.constant 0.00999999977 : f32
    %65 = vector.broadcast %cst_34 : f32 to vector<128x64xf32>
    %66 = arith.mulf %65, %62 : vector<128x64xf32>
    %67 = arith.select %64, %62, %66 : vector<128x64xi1>, vector<128x64xf32>
    %c0_35 = arith.constant 0 : index
    %c0_36 = arith.constant 0 : index
    %c0_37 = arith.constant 0 : index
    %68 = vector.load %arg4[%c0_35, %c0_36, %c0_37] : memref<1x128x64xf32, #tpu.memory_space<vmem>>, vector<1x128x64xf32>
    %69 = vector.shape_cast %68 : vector<1x128x64xf32> to vector<128x64xf32>
    %70 = vector.shape_cast %67 : vector<128x64xf32> to vector<1x128x64xf32>
    tpu.vector_store %arg4[%c0_35, %c0_36, %c0_37], %70 {strides = array<i32>} : memref<1x128x64xf32, #tpu.memory_space<vmem>>, vector<1x128x64xf32>,
    return
  }
  func.func @transform_0(%arg0: i32) -> (i32, i32, i32, i32) {
    %c0_i32 = arith.constant 0 : i32
    %c0_i32_0 = arith.constant 0 : i32
    %c0_i32_1 = arith.constant 0 : i32
    %c0_i32_2 = arith.constant 0 : i32
    return %arg0, %c0_i32, %c0_i32_0, %c0_i32_1 : i32, i32, i32, i32
  }
  func.func @transform_1(%arg0: i32) -> (i32, i32, i32) {
    %c0_i32 = arith.constant 0 : i32
    %c0_i32_0 = arith.constant 0 : i32
    %c0_i32_1 = arith.constant 0 : i32
    %c0_i32_2 = arith.constant 0 : i32
    return %c0_i32, %c0_i32_0, %c0_i32_1 : i32, i32, i32
  }
  func.func @transform_2(%arg0: i32) -> (i32, i32) {
    %c0_i32 = arith.constant 0 : i32
    %c0_i32_0 = arith.constant 0 : i32
    %c0_i32_1 = arith.constant 0 : i32
    return %c0_i32, %c0_i32_0 : i32, i32
  }
  func.func @transform_3(%arg0: i32) -> (i32, i32, i32) {
    %c0_i32 = arith.constant 0 : i32
    %c0_i32_0 = arith.constant 0 : i32
    %c0_i32_1 = arith.constant 0 : i32
    return %arg0, %c0_i32, %c0_i32_0 : i32, i32, i32
  }
}

module attributes {stable_mosaic.version = 11 : i64} {
  func.func @_conv3x3_bias_lrelu_kernel(%arg0: i32, %arg1: memref<1x6x10x64xbf16, #tpu.memory_space<vmem>>, %arg2: memref<9x64x128xbf16, #tpu.memory_space<vmem>>, %arg3: memref<1x128xf32, #tpu.memory_space<vmem>>, %arg4: memref<1x32x128xf32, #tpu.memory_space<vmem>>) attributes {dimension_semantics = [#tpu.dimension_semantics<parallel>], iteration_bounds = array<i64: 4>, scalar_prefetch = 0 : i64, scratch_operands = 0 : i64, tpu.core_type = #tpu.core_type<tc>, window_params = [{transform_indices = @transform_0, window_bounds = array<i64: 1, 6, 10, 64>}, {pipeline_mode = #tpu.pipeline_mode<synchronous>, transform_indices = @transform_1, window_bounds = array<i64: 9, 64, 128>}, {pipeline_mode = #tpu.pipeline_mode<synchronous>, transform_indices = @transform_2, window_bounds = array<i64: 1, 128>}, {transform_indices = @transform_3, window_bounds = array<i64: 1, 32, 128>}]} {
    %c0 = arith.constant 0 : index
    %c0_0 = arith.constant 0 : index
    %c0_1 = arith.constant 0 : index
    %c0_2 = arith.constant 0 : index
    %0 = vector.load %arg1[%c0, %c0_0, %c0_1, %c0_2] : memref<1x6x10x64xbf16, #tpu.memory_space<vmem>>, vector<1x6x10x64xbf16>
    %1 = vector.shape_cast %0 : vector<1x6x10x64xbf16> to vector<6x10x64xbf16>
    %cst = arith.constant 0.000000e+00 : f32
    %2 = vector.broadcast %cst : f32 to vector<32x128xf32>
    %3 = vector.extract_strided_slice %1 {offsets = [0, 0, 0], sizes = [4, 10, 64], strides = [1, 1, 1]} : vector<6x10x64xbf16> to vector<4x10x64xbf16>
    %4 = vector.extract_strided_slice %3 {offsets = [0, 0, 0], sizes = [4, 8, 64], strides = [1, 1, 1]} : vector<4x10x64xbf16> to vector<4x8x64xbf16>
    %5 = vector.shape_cast %4 : vector<4x8x64xbf16> to vector<32x64xbf16>
    %c0_3 = arith.constant 0 : index
    %c0_4 = arith.constant 0 : index
    %c0_5 = arith.constant 0 : index
    %6 = vector.load %arg2[%c0_3, %c0_4, %c0_5] : memref<9x64x128xbf16, #tpu.memory_space<vmem>>, vector<1x64x128xbf16>
    %7 = vector.shape_cast %6 : vector<1x64x128xbf16> to vector<64x128xbf16>
    %cst_6 = arith.constant dense<0.000000e+00> : vector<32x128xf32>
    %8 = tpu.matmul %5, %7, %cst_6 {dimension_numbers = #tpu.dot_dimension_numbers<[1], [0], [0], [1], [0, 0, 1, 1], [], []>} : vector<32x64xbf16>, vector<64x128xbf16>, vector<32x128xf32> -> vector<32x128xf32>
    %9 = arith.addf %2, %8 : vector<32x128xf32>
    %10 = vector.extract_strided_slice %3 {offsets = [0, 1, 0], sizes = [4, 8, 64], strides = [1, 1, 1]} : vector<4x10x64xbf16> to vector<4x8x64xbf16>
    %11 = vector.shape_cast %10 : vector<4x8x64xbf16> to vector<32x64xbf16>
    %c1 = arith.constant 1 : index
    %c0_7 = arith.constant 0 : index
    %c0_8 = arith.constant 0 : index
    %12 = vector.load %arg2[%c1, %c0_7, %c0_8] : memref<9x64x128xbf16, #tpu.memory_space<vmem>>, vector<1x64x128xbf16>
    %13 = vector.shape_cast %12 : vector<1x64x128xbf16> to vector<64x128xbf16>
    %cst_9 = arith.constant dense<0.000000e+00> : vector<32x128xf32>
    %14 = tpu.matmul %11, %13, %cst_9 {dimension_numbers = #tpu.dot_dimension_numbers<[1], [0], [0], [1], [0, 0, 1, 1], [], []>} : vector<32x64xbf16>, vector<64x128xbf16>, vector<32x128xf32> -> vector<32x128xf32>
    %15 = arith.addf %9, %14 : vector<32x128xf32>
    %16 = vector.extract_strided_slice %3 {offsets = [0, 2, 0], sizes = [4, 8, 64], strides = [1, 1, 1]} : vector<4x10x64xbf16> to vector<4x8x64xbf16>
    %17 = vector.shape_cast %16 : vector<4x8x64xbf16> to vector<32x64xbf16>
    %c2 = arith.constant 2 : index
    %c0_10 = arith.constant 0 : index
    %c0_11 = arith.constant 0 : index
    %18 = vector.load %arg2[%c2, %c0_10, %c0_11] : memref<9x64x128xbf16, #tpu.memory_space<vmem>>, vector<1x64x128xbf16>
    %19 = vector.shape_cast %18 : vector<1x64x128xbf16> to vector<64x128xbf16>
    %cst_12 = arith.constant dense<0.000000e+00> : vector<32x128xf32>
    %20 = tpu.matmul %17, %19, %cst_12 {dimension_numbers = #tpu.dot_dimension_numbers<[1], [0], [0], [1], [0, 0, 1, 1], [], []>} : vector<32x64xbf16>, vector<64x128xbf16>, vector<32x128xf32> -> vector<32x128xf32>
    %21 = arith.addf %15, %20 : vector<32x128xf32>
    %22 = vector.extract_strided_slice %1 {offsets = [1, 0, 0], sizes = [4, 10, 64], strides = [1, 1, 1]} : vector<6x10x64xbf16> to vector<4x10x64xbf16>
    %23 = vector.extract_strided_slice %22 {offsets = [0, 0, 0], sizes = [4, 8, 64], strides = [1, 1, 1]} : vector<4x10x64xbf16> to vector<4x8x64xbf16>
    %24 = vector.shape_cast %23 : vector<4x8x64xbf16> to vector<32x64xbf16>
    %c3 = arith.constant 3 : index
    %c0_13 = arith.constant 0 : index
    %c0_14 = arith.constant 0 : index
    %25 = vector.load %arg2[%c3, %c0_13, %c0_14] : memref<9x64x128xbf16, #tpu.memory_space<vmem>>, vector<1x64x128xbf16>
    %26 = vector.shape_cast %25 : vector<1x64x128xbf16> to vector<64x128xbf16>
    %cst_15 = arith.constant dense<0.000000e+00> : vector<32x128xf32>
    %27 = tpu.matmul %24, %26, %cst_15 {dimension_numbers = #tpu.dot_dimension_numbers<[1], [0], [0], [1], [0, 0, 1, 1], [], []>} : vector<32x64xbf16>, vector<64x128xbf16>, vector<32x128xf32> -> vector<32x128xf32>
    %28 = arith.addf %21, %27 : vector<32x128xf32>
    %29 = vector.extract_strided_slice %22 {offsets = [0, 1, 0], sizes = [4, 8, 64], strides = [1, 1, 1]} : vector<4x10x64xbf16> to vector<4x8x64xbf16>
    %30 = vector.shape_cast %29 : vector<4x8x64xbf16> to vector<32x64xbf16>
    %c4 = arith.constant 4 : index
    %c0_16 = arith.constant 0 : index
    %c0_17 = arith.constant 0 : index
    %31 = vector.load %arg2[%c4, %c0_16, %c0_17] : memref<9x64x128xbf16, #tpu.memory_space<vmem>>, vector<1x64x128xbf16>
    %32 = vector.shape_cast %31 : vector<1x64x128xbf16> to vector<64x128xbf16>
    %cst_18 = arith.constant dense<0.000000e+00> : vector<32x128xf32>
    %33 = tpu.matmul %30, %32, %cst_18 {dimension_numbers = #tpu.dot_dimension_numbers<[1], [0], [0], [1], [0, 0, 1, 1], [], []>} : vector<32x64xbf16>, vector<64x128xbf16>, vector<32x128xf32> -> vector<32x128xf32>
    %34 = arith.addf %28, %33 : vector<32x128xf32>
    %35 = vector.extract_strided_slice %22 {offsets = [0, 2, 0], sizes = [4, 8, 64], strides = [1, 1, 1]} : vector<4x10x64xbf16> to vector<4x8x64xbf16>
    %36 = vector.shape_cast %35 : vector<4x8x64xbf16> to vector<32x64xbf16>
    %c5 = arith.constant 5 : index
    %c0_19 = arith.constant 0 : index
    %c0_20 = arith.constant 0 : index
    %37 = vector.load %arg2[%c5, %c0_19, %c0_20] : memref<9x64x128xbf16, #tpu.memory_space<vmem>>, vector<1x64x128xbf16>
    %38 = vector.shape_cast %37 : vector<1x64x128xbf16> to vector<64x128xbf16>
    %cst_21 = arith.constant dense<0.000000e+00> : vector<32x128xf32>
    %39 = tpu.matmul %36, %38, %cst_21 {dimension_numbers = #tpu.dot_dimension_numbers<[1], [0], [0], [1], [0, 0, 1, 1], [], []>} : vector<32x64xbf16>, vector<64x128xbf16>, vector<32x128xf32> -> vector<32x128xf32>
    %40 = arith.addf %34, %39 : vector<32x128xf32>
    %41 = vector.extract_strided_slice %1 {offsets = [2, 0, 0], sizes = [4, 10, 64], strides = [1, 1, 1]} : vector<6x10x64xbf16> to vector<4x10x64xbf16>
    %42 = vector.extract_strided_slice %41 {offsets = [0, 0, 0], sizes = [4, 8, 64], strides = [1, 1, 1]} : vector<4x10x64xbf16> to vector<4x8x64xbf16>
    %43 = vector.shape_cast %42 : vector<4x8x64xbf16> to vector<32x64xbf16>
    %c6 = arith.constant 6 : index
    %c0_22 = arith.constant 0 : index
    %c0_23 = arith.constant 0 : index
    %44 = vector.load %arg2[%c6, %c0_22, %c0_23] : memref<9x64x128xbf16, #tpu.memory_space<vmem>>, vector<1x64x128xbf16>
    %45 = vector.shape_cast %44 : vector<1x64x128xbf16> to vector<64x128xbf16>
    %cst_24 = arith.constant dense<0.000000e+00> : vector<32x128xf32>
    %46 = tpu.matmul %43, %45, %cst_24 {dimension_numbers = #tpu.dot_dimension_numbers<[1], [0], [0], [1], [0, 0, 1, 1], [], []>} : vector<32x64xbf16>, vector<64x128xbf16>, vector<32x128xf32> -> vector<32x128xf32>
    %47 = arith.addf %40, %46 : vector<32x128xf32>
    %48 = vector.extract_strided_slice %41 {offsets = [0, 1, 0], sizes = [4, 8, 64], strides = [1, 1, 1]} : vector<4x10x64xbf16> to vector<4x8x64xbf16>
    %49 = vector.shape_cast %48 : vector<4x8x64xbf16> to vector<32x64xbf16>
    %c7 = arith.constant 7 : index
    %c0_25 = arith.constant 0 : index
    %c0_26 = arith.constant 0 : index
    %50 = vector.load %arg2[%c7, %c0_25, %c0_26] : memref<9x64x128xbf16, #tpu.memory_space<vmem>>, vector<1x64x128xbf16>
    %51 = vector.shape_cast %50 : vector<1x64x128xbf16> to vector<64x128xbf16>
    %cst_27 = arith.constant dense<0.000000e+00> : vector<32x128xf32>
    %52 = tpu.matmul %49, %51, %cst_27 {dimension_numbers = #tpu.dot_dimension_numbers<[1], [0], [0], [1], [0, 0, 1, 1], [], []>} : vector<32x64xbf16>, vector<64x128xbf16>, vector<32x128xf32> -> vector<32x128xf32>
    %53 = arith.addf %47, %52 : vector<32x128xf32>
    %54 = vector.extract_strided_slice %41 {offsets = [0, 2, 0], sizes = [4, 8, 64], strides = [1, 1, 1]} : vector<4x10x64xbf16> to vector<4x8x64xbf16>
    %55 = vector.shape_cast %54 : vector<4x8x64xbf16> to vector<32x64xbf16>
    %c8 = arith.constant 8 : index
    %c0_28 = arith.constant 0 : index
    %c0_29 = arith.constant 0 : index
    %56 = vector.load %arg2[%c8, %c0_28, %c0_29] : memref<9x64x128xbf16, #tpu.memory_space<vmem>>, vector<1x64x128xbf16>
    %57 = vector.shape_cast %56 : vector<1x64x128xbf16> to vector<64x128xbf16>
    %cst_30 = arith.constant dense<0.000000e+00> : vector<32x128xf32>
    %58 = tpu.matmul %55, %57, %cst_30 {dimension_numbers = #tpu.dot_dimension_numbers<[1], [0], [0], [1], [0, 0, 1, 1], [], []>} : vector<32x64xbf16>, vector<64x128xbf16>, vector<32x128xf32> -> vector<32x128xf32>
    %59 = arith.addf %53, %58 : vector<32x128xf32>
    %c0_31 = arith.constant 0 : index
    %c0_32 = arith.constant 0 : index
    %60 = vector.load %arg3[%c0_31, %c0_32] : memref<1x128xf32, #tpu.memory_space<vmem>>, vector<1x128xf32>
    %61 = vector.broadcast %60 : vector<1x128xf32> to vector<32x128xf32>
    %62 = arith.addf %59, %61 : vector<32x128xf32>
    %cst_33 = arith.constant 0.000000e+00 : f32
    %63 = vector.broadcast %cst_33 : f32 to vector<32x128xf32>
    %64 = arith.cmpf oge, %62, %63 : vector<32x128xf32>
    %cst_34 = arith.constant 0.00999999977 : f32
    %65 = vector.broadcast %cst_34 : f32 to vector<32x128xf32>
    %66 = arith.mulf %65, %62 : vector<32x128xf32>
    %67 = arith.select %64, %62, %66 : vector<32x128xi1>, vector<32x128xf32>
    %c0_35 = arith.constant 0 : index
    %c0_36 = arith.constant 0 : index
    %c0_37 = arith.constant 0 : index
    %68 = vector.load %arg4[%c0_35, %c0_36, %c0_37] : memref<1x32x128xf32, #tpu.memory_space<vmem>>, vector<1x32x128xf32>
    %69 = vector.shape_cast %68 : vector<1x32x128xf32> to vector<32x128xf32>
    %70 = vector.shape_cast %67 : vector<32x128xf32> to vector<1x32x128xf32>
    tpu.vector_store %arg4[%c0_35, %c0_36, %c0_37], %70 {strides = array<i32>} : memref<1x32x128xf32, #tpu.memory_space<vmem>>, vector<1x32x128xf32>,
    return
  }
  func.func @transform_0(%arg0: i32) -> (i32, i32, i32, i32) {
    %c0_i32 = arith.constant 0 : i32
    %c0_i32_0 = arith.constant 0 : i32
    %c0_i32_1 = arith.constant 0 : i32
    %c0_i32_2 = arith.constant 0 : i32
    return %arg0, %c0_i32, %c0_i32_0, %c0_i32_1 : i32, i32, i32, i32
  }
  func.func @transform_1(%arg0: i32) -> (i32, i32, i32) {
    %c0_i32 = arith.constant 0 : i32
    %c0_i32_0 = arith.constant 0 : i32
    %c0_i32_1 = arith.constant 0 : i32
    %c0_i32_2 = arith.constant 0 : i32
    return %c0_i32, %c0_i32_0, %c0_i32_1 : i32, i32, i32
  }
  func.func @transform_2(%arg0: i32) -> (i32, i32) {
    %c0_i32 = arith.constant 0 : i32
    %c0_i32_0 = arith.constant 0 : i32
    %c0_i32_1 = arith.constant 0 : i32
    return %c0_i32, %c0_i32_0 : i32, i32
  }
  func.func @transform_3(%arg0: i32) -> (i32, i32, i32) {
    %c0_i32 = arith.constant 0 : i32
    %c0_i32_0 = arith.constant 0 : i32
    %c0_i32_1 = arith.constant 0 : i32
    return %arg0, %c0_i32, %c0_i32_0 : i32, i32, i32
  }
}

module attributes {stable_mosaic.version = 11 : i64} {
  func.func @_maxpool2x2_lrelu_kernel(%arg0: i32, %arg1: memref<2x2x2x256xf32, #tpu.memory_space<vmem>>, %arg2: memref<2x2x128xf32, #tpu.memory_space<vmem>>) attributes {dimension_semantics = [#tpu.dimension_semantics<parallel>], iteration_bounds = array<i64: 2>, scalar_prefetch = 0 : i64, scratch_operands = 0 : i64, tpu.core_type = #tpu.core_type<tc>, window_params = [{transform_indices = @transform_0, window_bounds = array<i64: 2, 2, 2, 256>}, {transform_indices = @transform_1, window_bounds = array<i64: 2, 2, 128>}]} {
    %c0 = arith.constant 0 : index
    %c0_0 = arith.constant 0 : index
    %c0_1 = arith.constant 0 : index
    %c0_2 = arith.constant 0 : index
    %0 = vector.load %arg1[%c0, %c0_0, %c0_1, %c0_2] : memref<2x2x2x256xf32, #tpu.memory_space<vmem>>, vector<2x2x2x256xf32>
    %1 = vector.extract_strided_slice %0 {offsets = [0, 0, 0, 0], sizes = [2, 1, 2, 256], strides = [1, 1, 1, 1]} : vector<2x2x2x256xf32> to vector<2x1x2x256xf32>
    %2 = vector.shape_cast %1 : vector<2x1x2x256xf32> to vector<2x2x256xf32>
    %3 = vector.extract_strided_slice %0 {offsets = [0, 1, 0, 0], sizes = [2, 1, 2, 256], strides = [1, 1, 1, 1]} : vector<2x2x2x256xf32> to vector<2x1x2x256xf32>
    %4 = vector.shape_cast %3 : vector<2x1x2x256xf32> to vector<2x2x256xf32>
    %5 = vector.extract_strided_slice %2 {offsets = [0, 0, 0], sizes = [2, 2, 128], strides = [1, 1, 1]} : vector<2x2x256xf32> to vector<2x2x128xf32>
    %6 = vector.extract_strided_slice %2 {offsets = [0, 0, 128], sizes = [2, 2, 128], strides = [1, 1, 1]} : vector<2x2x256xf32> to vector<2x2x128xf32>
    %7 = arith.maximumf %5, %6 : vector<2x2x128xf32>
    %8 = vector.extract_strided_slice %4 {offsets = [0, 0, 0], sizes = [2, 2, 128], strides = [1, 1, 1]} : vector<2x2x256xf32> to vector<2x2x128xf32>
    %9 = vector.extract_strided_slice %4 {offsets = [0, 0, 128], sizes = [2, 2, 128], strides = [1, 1, 1]} : vector<2x2x256xf32> to vector<2x2x128xf32>
    %10 = arith.maximumf %8, %9 : vector<2x2x128xf32>
    %11 = arith.maximumf %7, %10 : vector<2x2x128xf32>
    %cst = arith.constant 0.000000e+00 : f32
    %12 = vector.broadcast %cst : f32 to vector<2x2x128xf32>
    %13 = arith.cmpf oge, %11, %12 : vector<2x2x128xf32>
    %cst_3 = arith.constant 0.00999999977 : f32
    %14 = vector.broadcast %cst_3 : f32 to vector<2x2x128xf32>
    %15 = arith.mulf %14, %11 : vector<2x2x128xf32>
    %16 = arith.select %13, %11, %15 : vector<2x2x128xi1>, vector<2x2x128xf32>
    %c0_4 = arith.constant 0 : index
    %c0_5 = arith.constant 0 : index
    %c0_6 = arith.constant 0 : index
    %17 = vector.load %arg2[%c0_4, %c0_5, %c0_6] : memref<2x2x128xf32, #tpu.memory_space<vmem>>, vector<2x2x128xf32>
    tpu.vector_store %arg2[%c0_4, %c0_5, %c0_6], %16 {strides = array<i32>} : memref<2x2x128xf32, #tpu.memory_space<vmem>>, vector<2x2x128xf32>,
    return
  }
  func.func @transform_0(%arg0: i32) -> (i32, i32, i32, i32) {
    %c0_i32 = arith.constant 0 : i32
    %c0_i32_0 = arith.constant 0 : i32
    %c0_i32_1 = arith.constant 0 : i32
    %c0_i32_2 = arith.constant 0 : i32
    return %arg0, %c0_i32, %c0_i32_0, %c0_i32_1 : i32, i32, i32, i32
  }
  func.func @transform_1(%arg0: i32) -> (i32, i32, i32) {
    %c0_i32 = arith.constant 0 : i32
    %c0_i32_0 = arith.constant 0 : i32
    %c0_i32_1 = arith.constant 0 : i32
    return %arg0, %c0_i32, %c0_i32_0 : i32, i32, i32
  }
}

module attributes {stable_mosaic.version = 11 : i64} {
  func.func @_conv3x3_bias_lrelu_kernel(%arg0: i32, %arg1: memref<1x6x5x256xbf16, #tpu.memory_space<vmem>>, %arg2: memref<9x128x128xbf16, #tpu.memory_space<vmem>>, %arg3: memref<1x128xf32, #tpu.memory_space<vmem>>, %arg4: memref<1x8x128xf32, #tpu.memory_space<vmem>>) attributes {dimension_semantics = [#tpu.dimension_semantics<parallel>], iteration_bounds = array<i64: 4>, scalar_prefetch = 0 : i64, scratch_operands = 0 : i64, tpu.core_type = #tpu.core_type<tc>, window_params = [{transform_indices = @transform_0, window_bounds = array<i64: 1, 6, 5, 256>}, {pipeline_mode = #tpu.pipeline_mode<synchronous>, transform_indices = @transform_1, window_bounds = array<i64: 9, 128, 128>}, {pipeline_mode = #tpu.pipeline_mode<synchronous>, transform_indices = @transform_2, window_bounds = array<i64: 1, 128>}, {transform_indices = @transform_3, window_bounds = array<i64: 1, 8, 128>}]} {
    %c0 = arith.constant 0 : index
    %c0_0 = arith.constant 0 : index
    %c0_1 = arith.constant 0 : index
    %c0_2 = arith.constant 0 : index
    %0 = vector.load %arg1[%c0, %c0_0, %c0_1, %c0_2] : memref<1x6x5x256xbf16, #tpu.memory_space<vmem>>, vector<1x6x5x256xbf16>
    %1 = vector.shape_cast %0 : vector<1x6x5x256xbf16> to vector<6x5x256xbf16>
    %cst = arith.constant 0.000000e+00 : f32
    %2 = vector.broadcast %cst : f32 to vector<8x128xf32>
    %3 = vector.extract_strided_slice %1 {offsets = [0, 0, 0], sizes = [4, 5, 256], strides = [1, 1, 1]} : vector<6x5x256xbf16> to vector<4x5x256xbf16>
    %4 = vector.shape_cast %3 : vector<4x5x256xbf16> to vector<2x2x5x256xbf16>
    %5 = vector.extract_strided_slice %4 {offsets = [0, 0, 0, 0], sizes = [2, 1, 5, 256], strides = [1, 1, 1, 1]} : vector<2x2x5x256xbf16> to vector<2x1x5x256xbf16>
    %6 = vector.shape_cast %5 : vector<2x1x5x256xbf16> to vector<2x5x256xbf16>
    %7 = vector.extract_strided_slice %6 {offsets = [0, 0, 0], sizes = [2, 4, 128], strides = [1, 1, 1]} : vector<2x5x256xbf16> to vector<2x4x128xbf16>
    %8 = vector.shape_cast %7 : vector<2x4x128xbf16> to vector<8x128xbf16>
    %c0_3 = arith.constant 0 : index
    %c0_4 = arith.constant 0 : index
    %c0_5 = arith.constant 0 : index
    %9 = vector.load %arg2[%c0_3, %c0_4, %c0_5] : memref<9x128x128xbf16, #tpu.memory_space<vmem>>, vector<1x128x128xbf16>
    %10 = vector.shape_cast %9 : vector<1x128x128xbf16> to vector<128x128xbf16>
    %cst_6 = arith.constant dense<0.000000e+00> : vector<8x128xf32>
    %11 = tpu.matmul %8, %10, %cst_6 {dimension_numbers = #tpu.dot_dimension_numbers<[1], [0], [0], [1], [0, 0, 1, 1], [], []>} : vector<8x128xbf16>, vector<128x128xbf16>, vector<8x128xf32> -> vector<8x128xf32>
    %12 = arith.addf %2, %11 : vector<8x128xf32>
    %13 = vector.extract_strided_slice %6 {offsets = [0, 0, 128], sizes = [2, 4, 128], strides = [1, 1, 1]} : vector<2x5x256xbf16> to vector<2x4x128xbf16>
    %14 = vector.shape_cast %13 : vector<2x4x128xbf16> to vector<8x128xbf16>
    %c1 = arith.constant 1 : index
    %c0_7 = arith.constant 0 : index
    %c0_8 = arith.constant 0 : index
    %15 = vector.load %arg2[%c1, %c0_7, %c0_8] : memref<9x128x128xbf16, #tpu.memory_space<vmem>>, vector<1x128x128xbf16>
    %16 = vector.shape_cast %15 : vector<1x128x128xbf16> to vector<128x128xbf16>
    %cst_9 = arith.constant dense<0.000000e+00> : vector<8x128xf32>
    %17 = tpu.matmul %14, %16, %cst_9 {dimension_numbers = #tpu.dot_dimension_numbers<[1], [0], [0], [1], [0, 0, 1, 1], [], []>} : vector<8x128xbf16>, vector<128x128xbf16>, vector<8x128xf32> -> vector<8x128xf32>
    %18 = arith.addf %12, %17 : vector<8x128xf32>
    %19 = vector.extract_strided_slice %6 {offsets = [0, 1, 0], sizes = [2, 4, 128], strides = [1, 1, 1]} : vector<2x5x256xbf16> to vector<2x4x128xbf16>
    %20 = vector.shape_cast %19 : vector<2x4x128xbf16> to vector<8x128xbf16>
    %c2 = arith.constant 2 : index
    %c0_10 = arith.constant 0 : index
    %c0_11 = arith.constant 0 : index
    %21 = vector.load %arg2[%c2, %c0_10, %c0_11] : memref<9x128x128xbf16, #tpu.memory_space<vmem>>, vector<1x128x128xbf16>
    %22 = vector.shape_cast %21 : vector<1x128x128xbf16> to vector<128x128xbf16>
    %cst_12 = arith.constant dense<0.000000e+00> : vector<8x128xf32>
    %23 = tpu.matmul %20, %22, %cst_12 {dimension_numbers = #tpu.dot_dimension_numbers<[1], [0], [0], [1], [0, 0, 1, 1], [], []>} : vector<8x128xbf16>, vector<128x128xbf16>, vector<8x128xf32> -> vector<8x128xf32>
    %24 = arith.addf %18, %23 : vector<8x128xf32>
    %25 = vector.extract_strided_slice %1 {offsets = [1, 0, 0], sizes = [4, 5, 256], strides = [1, 1, 1]} : vector<6x5x256xbf16> to vector<4x5x256xbf16>
    %26 = vector.shape_cast %25 : vector<4x5x256xbf16> to vector<2x2x5x256xbf16>
    %27 = vector.extract_strided_slice %26 {offsets = [0, 0, 0, 0], sizes = [2, 1, 5, 256], strides = [1, 1, 1, 1]} : vector<2x2x5x256xbf16> to vector<2x1x5x256xbf16>
    %28 = vector.shape_cast %27 : vector<2x1x5x256xbf16> to vector<2x5x256xbf16>
    %29 = vector.extract_strided_slice %28 {offsets = [0, 0, 0], sizes = [2, 4, 128], strides = [1, 1, 1]} : vector<2x5x256xbf16> to vector<2x4x128xbf16>
    %30 = vector.shape_cast %29 : vector<2x4x128xbf16> to vector<8x128xbf16>
    %c3 = arith.constant 3 : index
    %c0_13 = arith.constant 0 : index
    %c0_14 = arith.constant 0 : index
    %31 = vector.load %arg2[%c3, %c0_13, %c0_14] : memref<9x128x128xbf16, #tpu.memory_space<vmem>>, vector<1x128x128xbf16>
    %32 = vector.shape_cast %31 : vector<1x128x128xbf16> to vector<128x128xbf16>
    %cst_15 = arith.constant dense<0.000000e+00> : vector<8x128xf32>
    %33 = tpu.matmul %30, %32, %cst_15 {dimension_numbers = #tpu.dot_dimension_numbers<[1], [0], [0], [1], [0, 0, 1, 1], [], []>} : vector<8x128xbf16>, vector<128x128xbf16>, vector<8x128xf32> -> vector<8x128xf32>
    %34 = arith.addf %24, %33 : vector<8x128xf32>
    %35 = vector.extract_strided_slice %28 {offsets = [0, 0, 128], sizes = [2, 4, 128], strides = [1, 1, 1]} : vector<2x5x256xbf16> to vector<2x4x128xbf16>
    %36 = vector.shape_cast %35 : vector<2x4x128xbf16> to vector<8x128xbf16>
    %c4 = arith.constant 4 : index
    %c0_16 = arith.constant 0 : index
    %c0_17 = arith.constant 0 : index
    %37 = vector.load %arg2[%c4, %c0_16, %c0_17] : memref<9x128x128xbf16, #tpu.memory_space<vmem>>, vector<1x128x128xbf16>
    %38 = vector.shape_cast %37 : vector<1x128x128xbf16> to vector<128x128xbf16>
    %cst_18 = arith.constant dense<0.000000e+00> : vector<8x128xf32>
    %39 = tpu.matmul %36, %38, %cst_18 {dimension_numbers = #tpu.dot_dimension_numbers<[1], [0], [0], [1], [0, 0, 1, 1], [], []>} : vector<8x128xbf16>, vector<128x128xbf16>, vector<8x128xf32> -> vector<8x128xf32>
    %40 = arith.addf %34, %39 : vector<8x128xf32>
    %41 = vector.extract_strided_slice %28 {offsets = [0, 1, 0], sizes = [2, 4, 128], strides = [1, 1, 1]} : vector<2x5x256xbf16> to vector<2x4x128xbf16>
    %42 = vector.shape_cast %41 : vector<2x4x128xbf16> to vector<8x128xbf16>
    %c5 = arith.constant 5 : index
    %c0_19 = arith.constant 0 : index
    %c0_20 = arith.constant 0 : index
    %43 = vector.load %arg2[%c5, %c0_19, %c0_20] : memref<9x128x128xbf16, #tpu.memory_space<vmem>>, vector<1x128x128xbf16>
    %44 = vector.shape_cast %43 : vector<1x128x128xbf16> to vector<128x128xbf16>
    %cst_21 = arith.constant dense<0.000000e+00> : vector<8x128xf32>
    %45 = tpu.matmul %42, %44, %cst_21 {dimension_numbers = #tpu.dot_dimension_numbers<[1], [0], [0], [1], [0, 0, 1, 1], [], []>} : vector<8x128xbf16>, vector<128x128xbf16>, vector<8x128xf32> -> vector<8x128xf32>
    %46 = arith.addf %40, %45 : vector<8x128xf32>
    %47 = vector.extract_strided_slice %1 {offsets = [2, 0, 0], sizes = [4, 5, 256], strides = [1, 1, 1]} : vector<6x5x256xbf16> to vector<4x5x256xbf16>
    %48 = vector.shape_cast %47 : vector<4x5x256xbf16> to vector<2x2x5x256xbf16>
    %49 = vector.extract_strided_slice %48 {offsets = [0, 0, 0, 0], sizes = [2, 1, 5, 256], strides = [1, 1, 1, 1]} : vector<2x2x5x256xbf16> to vector<2x1x5x256xbf16>
    %50 = vector.shape_cast %49 : vector<2x1x5x256xbf16> to vector<2x5x256xbf16>
    %51 = vector.extract_strided_slice %50 {offsets = [0, 0, 0], sizes = [2, 4, 128], strides = [1, 1, 1]} : vector<2x5x256xbf16> to vector<2x4x128xbf16>
    %52 = vector.shape_cast %51 : vector<2x4x128xbf16> to vector<8x128xbf16>
    %c6 = arith.constant 6 : index
    %c0_22 = arith.constant 0 : index
    %c0_23 = arith.constant 0 : index
    %53 = vector.load %arg2[%c6, %c0_22, %c0_23] : memref<9x128x128xbf16, #tpu.memory_space<vmem>>, vector<1x128x128xbf16>
    %54 = vector.shape_cast %53 : vector<1x128x128xbf16> to vector<128x128xbf16>
    %cst_24 = arith.constant dense<0.000000e+00> : vector<8x128xf32>
    %55 = tpu.matmul %52, %54, %cst_24 {dimension_numbers = #tpu.dot_dimension_numbers<[1], [0], [0], [1], [0, 0, 1, 1], [], []>} : vector<8x128xbf16>, vector<128x128xbf16>, vector<8x128xf32> -> vector<8x128xf32>
    %56 = arith.addf %46, %55 : vector<8x128xf32>
    %57 = vector.extract_strided_slice %50 {offsets = [0, 0, 128], sizes = [2, 4, 128], strides = [1, 1, 1]} : vector<2x5x256xbf16> to vector<2x4x128xbf16>
    %58 = vector.shape_cast %57 : vector<2x4x128xbf16> to vector<8x128xbf16>
    %c7 = arith.constant 7 : index
    %c0_25 = arith.constant 0 : index
    %c0_26 = arith.constant 0 : index
    %59 = vector.load %arg2[%c7, %c0_25, %c0_26] : memref<9x128x128xbf16, #tpu.memory_space<vmem>>, vector<1x128x128xbf16>
    %60 = vector.shape_cast %59 : vector<1x128x128xbf16> to vector<128x128xbf16>
    %cst_27 = arith.constant dense<0.000000e+00> : vector<8x128xf32>
    %61 = tpu.matmul %58, %60, %cst_27 {dimension_numbers = #tpu.dot_dimension_numbers<[1], [0], [0], [1], [0, 0, 1, 1], [], []>} : vector<8x128xbf16>, vector<128x128xbf16>, vector<8x128xf32> -> vector<8x128xf32>
    %62 = arith.addf %56, %61 : vector<8x128xf32>
    %63 = vector.extract_strided_slice %50 {offsets = [0, 1, 0], sizes = [2, 4, 128], strides = [1, 1, 1]} : vector<2x5x256xbf16> to vector<2x4x128xbf16>
    %64 = vector.shape_cast %63 : vector<2x4x128xbf16> to vector<8x128xbf16>
    %c8 = arith.constant 8 : index
    %c0_28 = arith.constant 0 : index
    %c0_29 = arith.constant 0 : index
    %65 = vector.load %arg2[%c8, %c0_28, %c0_29] : memref<9x128x128xbf16, #tpu.memory_space<vmem>>, vector<1x128x128xbf16>
    %66 = vector.shape_cast %65 : vector<1x128x128xbf16> to vector<128x128xbf16>
    %cst_30 = arith.constant dense<0.000000e+00> : vector<8x128xf32>
    %67 = tpu.matmul %64, %66, %cst_30 {dimension_numbers = #tpu.dot_dimension_numbers<[1], [0], [0], [1], [0, 0, 1, 1], [], []>} : vector<8x128xbf16>, vector<128x128xbf16>, vector<8x128xf32> -> vector<8x128xf32>
    %68 = arith.addf %62, %67 : vector<8x128xf32>
    %c0_31 = arith.constant 0 : index
    %c0_32 = arith.constant 0 : index
    %69 = vector.load %arg3[%c0_31, %c0_32] : memref<1x128xf32, #tpu.memory_space<vmem>>, vector<1x128xf32>
    %70 = vector.broadcast %69 : vector<1x128xf32> to vector<8x128xf32>
    %71 = arith.addf %68, %70 : vector<8x128xf32>
    %cst_33 = arith.constant 0.000000e+00 : f32
    %72 = vector.broadcast %cst_33 : f32 to vector<8x128xf32>
    %73 = arith.cmpf oge, %71, %72 : vector<8x128xf32>
    %cst_34 = arith.constant 0.00999999977 : f32
    %74 = vector.broadcast %cst_34 : f32 to vector<8x128xf32>
    %75 = arith.mulf %74, %71 : vector<8x128xf32>
    %76 = arith.select %73, %71, %75 : vector<8x128xi1>, vector<8x128xf32>
    %c0_35 = arith.constant 0 : index
    %c0_36 = arith.constant 0 : index
    %c0_37 = arith.constant 0 : index
    %77 = vector.load %arg4[%c0_35, %c0_36, %c0_37] : memref<1x8x128xf32, #tpu.memory_space<vmem>>, vector<1x8x128xf32>
    %78 = vector.shape_cast %77 : vector<1x8x128xf32> to vector<8x128xf32>
    %79 = vector.shape_cast %76 : vector<8x128xf32> to vector<1x8x128xf32>
    tpu.vector_store %arg4[%c0_35, %c0_36, %c0_37], %79 {strides = array<i32>} : memref<1x8x128xf32, #tpu.memory_space<vmem>>, vector<1x8x128xf32>,
    return
  }
  func.func @transform_0(%arg0: i32) -> (i32, i32, i32, i32) {
    %c0_i32 = arith.constant 0 : i32
    %c0_i32_0 = arith.constant 0 : i32
    %c0_i32_1 = arith.constant 0 : i32
    %c0_i32_2 = arith.constant 0 : i32
    return %arg0, %c0_i32, %c0_i32_0, %c0_i32_1 : i32, i32, i32, i32
  }
  func.func @transform_1(%arg0: i32) -> (i32, i32, i32) {
    %c0_i32 = arith.constant 0 : i32
    %c0_i32_0 = arith.constant 0 : i32
    %c0_i32_1 = arith.constant 0 : i32
    %c0_i32_2 = arith.constant 0 : i32
    return %c0_i32, %c0_i32_0, %c0_i32_1 : i32, i32, i32
  }
  func.func @transform_2(%arg0: i32) -> (i32, i32) {
    %c0_i32 = arith.constant 0 : i32
    %c0_i32_0 = arith.constant 0 : i32
    %c0_i32_1 = arith.constant 0 : i32
    return %c0_i32, %c0_i32_0 : i32, i32
  }
  func.func @transform_3(%arg0: i32) -> (i32, i32, i32) {
    %c0_i32 = arith.constant 0 : i32
    %c0_i32_0 = arith.constant 0 : i32
    %c0_i32_1 = arith.constant 0 : i32
    return %arg0, %c0_i32, %c0_i32_0 : i32, i32, i32
  }
}

module attributes {stable_mosaic.version = 11 : i64} {
  func.func @_conv3x3_bias_lrelu_kernel(%arg0: i32, %arg1: memref<1x4x2x256xbf16, #tpu.memory_space<vmem>>, %arg2: memref<9x128x128xbf16, #tpu.memory_space<vmem>>, %arg3: memref<1x128xf32, #tpu.memory_space<vmem>>, %arg4: memref<1x1x128xf32, #tpu.memory_space<vmem>>) attributes {dimension_semantics = [#tpu.dimension_semantics<parallel>], iteration_bounds = array<i64: 2>, scalar_prefetch = 0 : i64, scratch_operands = 0 : i64, tpu.core_type = #tpu.core_type<tc>, window_params = [{transform_indices = @transform_0, window_bounds = array<i64: 1, 4, 2, 256>}, {pipeline_mode = #tpu.pipeline_mode<synchronous>, transform_indices = @transform_1, window_bounds = array<i64: 9, 128, 128>}, {pipeline_mode = #tpu.pipeline_mode<synchronous>, transform_indices = @transform_2, window_bounds = array<i64: 1, 128>}, {transform_indices = @transform_3, window_bounds = array<i64: 1, 1, 128>}]} {
    %c0 = arith.constant 0 : index
    %c0_0 = arith.constant 0 : index
    %c0_1 = arith.constant 0 : index
    %c0_2 = arith.constant 0 : index
    %0 = vector.load %arg1[%c0, %c0_0, %c0_1, %c0_2] : memref<1x4x2x256xbf16, #tpu.memory_space<vmem>>, vector<1x4x2x256xbf16>
    %1 = vector.shape_cast %0 : vector<1x4x2x256xbf16> to vector<4x2x256xbf16>
    %cst = arith.constant 0.000000e+00 : f32
    %2 = vector.broadcast %cst : f32 to vector<1x128xf32>
    %3 = vector.extract_strided_slice %1 {offsets = [0, 0, 0], sizes = [2, 2, 256], strides = [1, 1, 1]} : vector<4x2x256xbf16> to vector<2x2x256xbf16>
    %4 = vector.shape_cast %3 : vector<2x2x256xbf16> to vector<1x2x2x256xbf16>
    %5 = vector.extract_strided_slice %4 {offsets = [0, 0, 0, 0], sizes = [1, 1, 2, 256], strides = [1, 1, 1, 1]} : vector<1x2x2x256xbf16> to vector<1x1x2x256xbf16>
    %6 = vector.shape_cast %5 : vector<1x1x2x256xbf16> to vector<1x2x256xbf16>
    %7 = vector.extract_strided_slice %6 {offsets = [0, 0, 0], sizes = [1, 1, 128], strides = [1, 1, 1]} : vector<1x2x256xbf16> to vector<1x1x128xbf16>
    %8 = vector.shape_cast %7 : vector<1x1x128xbf16> to vector<1x128xbf16>
    %c0_3 = arith.constant 0 : index
    %c0_4 = arith.constant 0 : index
    %c0_5 = arith.constant 0 : index
    %9 = vector.load %arg2[%c0_3, %c0_4, %c0_5] : memref<9x128x128xbf16, #tpu.memory_space<vmem>>, vector<1x128x128xbf16>
    %10 = vector.shape_cast %9 : vector<1x128x128xbf16> to vector<128x128xbf16>
    %cst_6 = arith.constant dense<0.000000e+00> : vector<1x128xf32>
    %11 = tpu.matmul %8, %10, %cst_6 {dimension_numbers = #tpu.dot_dimension_numbers<[1], [0], [0], [1], [0, 0, 1, 1], [], []>} : vector<1x128xbf16>, vector<128x128xbf16>, vector<1x128xf32> -> vector<1x128xf32>
    %12 = arith.addf %2, %11 : vector<1x128xf32>
    %13 = vector.extract_strided_slice %6 {offsets = [0, 0, 128], sizes = [1, 1, 128], strides = [1, 1, 1]} : vector<1x2x256xbf16> to vector<1x1x128xbf16>
    %14 = vector.shape_cast %13 : vector<1x1x128xbf16> to vector<1x128xbf16>
    %c1 = arith.constant 1 : index
    %c0_7 = arith.constant 0 : index
    %c0_8 = arith.constant 0 : index
    %15 = vector.load %arg2[%c1, %c0_7, %c0_8] : memref<9x128x128xbf16, #tpu.memory_space<vmem>>, vector<1x128x128xbf16>
    %16 = vector.shape_cast %15 : vector<1x128x128xbf16> to vector<128x128xbf16>
    %cst_9 = arith.constant dense<0.000000e+00> : vector<1x128xf32>
    %17 = tpu.matmul %14, %16, %cst_9 {dimension_numbers = #tpu.dot_dimension_numbers<[1], [0], [0], [1], [0, 0, 1, 1], [], []>} : vector<1x128xbf16>, vector<128x128xbf16>, vector<1x128xf32> -> vector<1x128xf32>
    %18 = arith.addf %12, %17 : vector<1x128xf32>
    %19 = vector.extract_strided_slice %6 {offsets = [0, 1, 0], sizes = [1, 1, 128], strides = [1, 1, 1]} : vector<1x2x256xbf16> to vector<1x1x128xbf16>
    %20 = vector.shape_cast %19 : vector<1x1x128xbf16> to vector<1x128xbf16>
    %c2 = arith.constant 2 : index
    %c0_10 = arith.constant 0 : index
    %c0_11 = arith.constant 0 : index
    %21 = vector.load %arg2[%c2, %c0_10, %c0_11] : memref<9x128x128xbf16, #tpu.memory_space<vmem>>, vector<1x128x128xbf16>
    %22 = vector.shape_cast %21 : vector<1x128x128xbf16> to vector<128x128xbf16>
    %cst_12 = arith.constant dense<0.000000e+00> : vector<1x128xf32>
    %23 = tpu.matmul %20, %22, %cst_12 {dimension_numbers = #tpu.dot_dimension_numbers<[1], [0], [0], [1], [0, 0, 1, 1], [], []>} : vector<1x128xbf16>, vector<128x128xbf16>, vector<1x128xf32> -> vector<1x128xf32>
    %24 = arith.addf %18, %23 : vector<1x128xf32>
    %25 = vector.extract_strided_slice %1 {offsets = [1, 0, 0], sizes = [2, 2, 256], strides = [1, 1, 1]} : vector<4x2x256xbf16> to vector<2x2x256xbf16>
    %26 = vector.shape_cast %25 : vector<2x2x256xbf16> to vector<1x2x2x256xbf16>
    %27 = vector.extract_strided_slice %26 {offsets = [0, 0, 0, 0], sizes = [1, 1, 2, 256], strides = [1, 1, 1, 1]} : vector<1x2x2x256xbf16> to vector<1x1x2x256xbf16>
    %28 = vector.shape_cast %27 : vector<1x1x2x256xbf16> to vector<1x2x256xbf16>
    %29 = vector.extract_strided_slice %28 {offsets = [0, 0, 0], sizes = [1, 1, 128], strides = [1, 1, 1]} : vector<1x2x256xbf16> to vector<1x1x128xbf16>
    %30 = vector.shape_cast %29 : vector<1x1x128xbf16> to vector<1x128xbf16>
    %c3 = arith.constant 3 : index
    %c0_13 = arith.constant 0 : index
    %c0_14 = arith.constant 0 : index
    %31 = vector.load %arg2[%c3, %c0_13, %c0_14] : memref<9x128x128xbf16, #tpu.memory_space<vmem>>, vector<1x128x128xbf16>
    %32 = vector.shape_cast %31 : vector<1x128x128xbf16> to vector<128x128xbf16>
    %cst_15 = arith.constant dense<0.000000e+00> : vector<1x128xf32>
    %33 = tpu.matmul %30, %32, %cst_15 {dimension_numbers = #tpu.dot_dimension_numbers<[1], [0], [0], [1], [0, 0, 1, 1], [], []>} : vector<1x128xbf16>, vector<128x128xbf16>, vector<1x128xf32> -> vector<1x128xf32>
    %34 = arith.addf %24, %33 : vector<1x128xf32>
    %35 = vector.extract_strided_slice %28 {offsets = [0, 0, 128], sizes = [1, 1, 128], strides = [1, 1, 1]} : vector<1x2x256xbf16> to vector<1x1x128xbf16>
    %36 = vector.shape_cast %35 : vector<1x1x128xbf16> to vector<1x128xbf16>
    %c4 = arith.constant 4 : index
    %c0_16 = arith.constant 0 : index
    %c0_17 = arith.constant 0 : index
    %37 = vector.load %arg2[%c4, %c0_16, %c0_17] : memref<9x128x128xbf16, #tpu.memory_space<vmem>>, vector<1x128x128xbf16>
    %38 = vector.shape_cast %37 : vector<1x128x128xbf16> to vector<128x128xbf16>
    %cst_18 = arith.constant dense<0.000000e+00> : vector<1x128xf32>
    %39 = tpu.matmul %36, %38, %cst_18 {dimension_numbers = #tpu.dot_dimension_numbers<[1], [0], [0], [1], [0, 0, 1, 1], [], []>} : vector<1x128xbf16>, vector<128x128xbf16>, vector<1x128xf32> -> vector<1x128xf32>
    %40 = arith.addf %34, %39 : vector<1x128xf32>
    %41 = vector.extract_strided_slice %28 {offsets = [0, 1, 0], sizes = [1, 1, 128], strides = [1, 1, 1]} : vector<1x2x256xbf16> to vector<1x1x128xbf16>
    %42 = vector.shape_cast %41 : vector<1x1x128xbf16> to vector<1x128xbf16>
    %c5 = arith.constant 5 : index
    %c0_19 = arith.constant 0 : index
    %c0_20 = arith.constant 0 : index
    %43 = vector.load %arg2[%c5, %c0_19, %c0_20] : memref<9x128x128xbf16, #tpu.memory_space<vmem>>, vector<1x128x128xbf16>
    %44 = vector.shape_cast %43 : vector<1x128x128xbf16> to vector<128x128xbf16>
    %cst_21 = arith.constant dense<0.000000e+00> : vector<1x128xf32>
    %45 = tpu.matmul %42, %44, %cst_21 {dimension_numbers = #tpu.dot_dimension_numbers<[1], [0], [0], [1], [0, 0, 1, 1], [], []>} : vector<1x128xbf16>, vector<128x128xbf16>, vector<1x128xf32> -> vector<1x128xf32>
    %46 = arith.addf %40, %45 : vector<1x128xf32>
    %47 = vector.extract_strided_slice %1 {offsets = [2, 0, 0], sizes = [2, 2, 256], strides = [1, 1, 1]} : vector<4x2x256xbf16> to vector<2x2x256xbf16>
    %48 = vector.shape_cast %47 : vector<2x2x256xbf16> to vector<1x2x2x256xbf16>
    %49 = vector.extract_strided_slice %48 {offsets = [0, 0, 0, 0], sizes = [1, 1, 2, 256], strides = [1, 1, 1, 1]} : vector<1x2x2x256xbf16> to vector<1x1x2x256xbf16>
    %50 = vector.shape_cast %49 : vector<1x1x2x256xbf16> to vector<1x2x256xbf16>
    %51 = vector.extract_strided_slice %50 {offsets = [0, 0, 0], sizes = [1, 1, 128], strides = [1, 1, 1]} : vector<1x2x256xbf16> to vector<1x1x128xbf16>
    %52 = vector.shape_cast %51 : vector<1x1x128xbf16> to vector<1x128xbf16>
    %c6 = arith.constant 6 : index
    %c0_22 = arith.constant 0 : index
    %c0_23 = arith.constant 0 : index
    %53 = vector.load %arg2[%c6, %c0_22, %c0_23] : memref<9x128x128xbf16, #tpu.memory_space<vmem>>, vector<1x128x128xbf16>
    %54 = vector.shape_cast %53 : vector<1x128x128xbf16> to vector<128x128xbf16>
    %cst_24 = arith.constant dense<0.000000e+00> : vector<1x128xf32>
    %55 = tpu.matmul %52, %54, %cst_24 {dimension_numbers = #tpu.dot_dimension_numbers<[1], [0], [0], [1], [0, 0, 1, 1], [], []>} : vector<1x128xbf16>, vector<128x128xbf16>, vector<1x128xf32> -> vector<1x128xf32>
    %56 = arith.addf %46, %55 : vector<1x128xf32>
    %57 = vector.extract_strided_slice %50 {offsets = [0, 0, 128], sizes = [1, 1, 128], strides = [1, 1, 1]} : vector<1x2x256xbf16> to vector<1x1x128xbf16>
    %58 = vector.shape_cast %57 : vector<1x1x128xbf16> to vector<1x128xbf16>
    %c7 = arith.constant 7 : index
    %c0_25 = arith.constant 0 : index
    %c0_26 = arith.constant 0 : index
    %59 = vector.load %arg2[%c7, %c0_25, %c0_26] : memref<9x128x128xbf16, #tpu.memory_space<vmem>>, vector<1x128x128xbf16>
    %60 = vector.shape_cast %59 : vector<1x128x128xbf16> to vector<128x128xbf16>
    %cst_27 = arith.constant dense<0.000000e+00> : vector<1x128xf32>
    %61 = tpu.matmul %58, %60, %cst_27 {dimension_numbers = #tpu.dot_dimension_numbers<[1], [0], [0], [1], [0, 0, 1, 1], [], []>} : vector<1x128xbf16>, vector<128x128xbf16>, vector<1x128xf32> -> vector<1x128xf32>
    %62 = arith.addf %56, %61 : vector<1x128xf32>
    %63 = vector.extract_strided_slice %50 {offsets = [0, 1, 0], sizes = [1, 1, 128], strides = [1, 1, 1]} : vector<1x2x256xbf16> to vector<1x1x128xbf16>
    %64 = vector.shape_cast %63 : vector<1x1x128xbf16> to vector<1x128xbf16>
    %c8 = arith.constant 8 : index
    %c0_28 = arith.constant 0 : index
    %c0_29 = arith.constant 0 : index
    %65 = vector.load %arg2[%c8, %c0_28, %c0_29] : memref<9x128x128xbf16, #tpu.memory_space<vmem>>, vector<1x128x128xbf16>
    %66 = vector.shape_cast %65 : vector<1x128x128xbf16> to vector<128x128xbf16>
    %cst_30 = arith.constant dense<0.000000e+00> : vector<1x128xf32>
    %67 = tpu.matmul %64, %66, %cst_30 {dimension_numbers = #tpu.dot_dimension_numbers<[1], [0], [0], [1], [0, 0, 1, 1], [], []>} : vector<1x128xbf16>, vector<128x128xbf16>, vector<1x128xf32> -> vector<1x128xf32>
    %68 = arith.addf %62, %67 : vector<1x128xf32>
    %c0_31 = arith.constant 0 : index
    %c0_32 = arith.constant 0 : index
    %69 = vector.load %arg3[%c0_31, %c0_32] : memref<1x128xf32, #tpu.memory_space<vmem>>, vector<1x128xf32>
    %70 = arith.addf %68, %69 : vector<1x128xf32>
    %cst_33 = arith.constant 0.000000e+00 : f32
    %71 = vector.broadcast %cst_33 : f32 to vector<1x128xf32>
    %72 = arith.cmpf oge, %70, %71 : vector<1x128xf32>
    %cst_34 = arith.constant 0.00999999977 : f32
    %73 = vector.broadcast %cst_34 : f32 to vector<1x128xf32>
    %74 = arith.mulf %73, %70 : vector<1x128xf32>
    %75 = arith.select %72, %70, %74 : vector<1x128xi1>, vector<1x128xf32>
    %c0_35 = arith.constant 0 : index
    %c0_36 = arith.constant 0 : index
    %c0_37 = arith.constant 0 : index
    %76 = vector.load %arg4[%c0_35, %c0_36, %c0_37] : memref<1x1x128xf32, #tpu.memory_space<vmem>>, vector<1x1x128xf32>
    %77 = vector.shape_cast %76 : vector<1x1x128xf32> to vector<1x128xf32>
    %78 = vector.shape_cast %75 : vector<1x128xf32> to vector<1x1x128xf32>
    tpu.vector_store %arg4[%c0_35, %c0_36, %c0_37], %78 {strides = array<i32>} : memref<1x1x128xf32, #tpu.memory_space<vmem>>, vector<1x1x128xf32>,
    return
  }
  func.func @transform_0(%arg0: i32) -> (i32, i32, i32, i32) {
    %c0_i32 = arith.constant 0 : i32
    %c0_i32_0 = arith.constant 0 : i32
    %c0_i32_1 = arith.constant 0 : i32
    %c0_i32_2 = arith.constant 0 : i32
    return %arg0, %c0_i32, %c0_i32_0, %c0_i32_1 : i32, i32, i32, i32
  }
  func.func @transform_1(%arg0: i32) -> (i32, i32, i32) {
    %c0_i32 = arith.constant 0 : i32
    %c0_i32_0 = arith.constant 0 : i32
    %c0_i32_1 = arith.constant 0 : i32
    %c0_i32_2 = arith.constant 0 : i32
    return %c0_i32, %c0_i32_0, %c0_i32_1 : i32, i32, i32
  }
  func.func @transform_2(%arg0: i32) -> (i32, i32) {
    %c0_i32 = arith.constant 0 : i32
    %c0_i32_0 = arith.constant 0 : i32
    %c0_i32_1 = arith.constant 0 : i32
    return %c0_i32, %c0_i32_0 : i32, i32
  }
  func.func @transform_3(%arg0: i32) -> (i32, i32, i32) {
    %c0_i32 = arith.constant 0 : i32
    %c0_i32_0 = arith.constant 0 : i32
    %c0_i32_1 = arith.constant 0 : i32
    return %arg0, %c0_i32, %c0_i32_0 : i32, i32, i32
  }
}

</mosaic_0001>

<bundles_post_ra>
// kernel: ex_net_forward.7
= control target key start
LH: loop header
LB: loop body
LE: loop exit
PB: predicated region body
PF: predicated region fallthrough
CT: control target
= control target key end

     0   :  { %s2464_s12 = smov 0   ;;  %s3082_s0 = inlined_call_operand.vmem [shape: bf16[4,10,18,4], index: 0, kind: input, shape index: {}]   ;;  %s3083_s1 = inlined_call_operand.vmem [shape: bf16[9,4,64], index: 1, kind: input, shape index: {}]   ;;  %s3084_s2 = inlined_call_operand.vmem [shape: f32[1,64], index: 2, kind: input, shape index: {}]   ;;  %s3085_s3 = inlined_call_operand.vmem [shape: f32[4,128,64], index: 3, kind: output, shape index: {}]  }
   0x1 LB: > { %s1902_s13 = sadd.s32 4294967295, %s2442_s12   ;;  %p1906_p0 = scmp.ge.s32.totalorder %s2442_s12, 1  ;;  %s2442_s12 = sphi %s2464_s12, %s13_s12  }
   0x2   : > { %p137_p1 = scmp.lt.s32.totalorder %s2442_s12, 5 }
   0x4   : > { %p138_p2 = pnand %p1906_p0, %p137_p1 }
   0x5   : > { %v1910_v0 = vld [vmem:[%s3083_s1 + $0x2] sm:$0x3] (!%p138_p2)  ;;  %vm449_vm0 = vcmask (!%p138_p2), 1041408   ;;  %v2478_v1 = vld [vmem:[%s3083_s1 + $0x8] sm:$0x3] (!%p138_p2)  ;;  %p161_p3 = scmp.lt.s32.totalorder (!%p138_p2), %s1902_s13, 3 }
   0x6   : > { %141 = sbr.rel (%p138_p2) target bundleno = 399 (0x18f), region = 32  ;;  %2407 = vmatprep.subr.msk.bf16.mxu1 (!%p138_p2), %vm449_vm0, %v1910_v0  ;;  %2411 = vmatprep.subr.msk.bf16.mxu0 (!%p138_p2), %vm449_vm0, %v2478_v1  ;;  %v451_v2 = vsel (!%p138_p2), %vm449_vm0, %v1910_v0, 0  ;;  %v2486_v3 = vsel (!%p138_p2), %vm449_vm0, %v2478_v1, 0  ;;  %v202_v4 = vld [vmem:[%s3083_s1] sm:$0x3] (!%p138_p2)  ;;  %vm424_vm3 = vcmask (!%p138_p2), 31744  }
   0x7   : > { %2116 = vmatpush3.bf16.msra.mxu1 (!%p138_p2), %v451_v2  ;;  %2188 = vmatpush3.bf16.msra.mxu0 (!%p138_p2), %v2486_v3  ;;  %v1989_v5 = vld [vmem:[%s3083_s1 + $0xa] sm:$0x3] (!%p138_p2)  ;;  %vm203_vm1 = vsmask.f32 (!%p138_p2), 3328  ;;  %vm204_vm2 = vsmask.f32 (!%p138_p2), 7440 }
   0x8   : > { %2408 = vmatprep.subr.msk.bf16.mxu1 (!%p138_p2), %vm449_vm0, %v202_v4  ;;  %2413 = vmatprep.subr.msk.bf16.mxu0 (!%p138_p2), %vm449_vm0, %v1989_v5  ;;  %v2506_v6 = vsel (!%p138_p2), %vm449_vm0, %v202_v4, 0  ;;  %v2532_v18 = vsel (!%p138_p2), %vm449_vm0, %v1989_v5, 0  ;;  %v2537_v23 = vld [vmem:[%s3083_s1 + $0xc] sm:$0x3] (!%p138_p2)  ;;  %vm2549_vm4 = vmor (!%p138_p2), %vm203_vm1, %vm204_vm2  ;;  %vm722_vm5 = vcmask (!%p138_p2), 1042432   ;;  %vm723_vm6 = vcmask (!%p138_p2), 1046532  }
   0x9   : > { %v2558_v38 = vsel (!%p138_p2), %vm449_vm0, %v2537_v23, 0  ;;  %vm2632_vm7 = vmor (!%p138_p2), %vm722_vm5, %vm723_vm6  ;;  %vm1830_vm9 = vcmask (!%p138_p2), 523264  }
   0xd   : > { %s3091_s13 = smov (!%p161_p3, %s1902_s13), 3 }
   0xe   : > { %s2417_s22 = smul.u32 120, %s3091_s13  ;;  %s2033_s11 = sshll.u32 %s3091_s13, 7 }
   0xf   : > { %s3031_s16 = scalar_lea.vmem %s3085_s3, %s2033_s11 }
  0x10   : > { %s2503_s25 = scalar_lea.vmem %s3082_s0, %s2417_s22 }
  0x11   : > { %v2509_v7 = vld [vmem:[%s2503_s25] sm:$0xf]  ;;  %v2512_v8 = vld [vmem:[%s2503_s25 + $0x4] sm:$0xf]  ;;  %v2515_v9 = vld [vmem:[%s2503_s25 + $0x8] sm:$0x1] }
  0x12   : > { %v207_v10 = vshrl.u32 %v2509_v7, 16  ;;  %v210_v11 = vshll.u32 %v2509_v7, 16  ;;  %v216_v12 = vshll.u32 %v2512_v8, 16  ;;  %v220_v13 = vshrl.u32 %v2512_v8, 16  ;;  %v2522_v14 = vld [vmem:[%s2503_s25 + $0xc] sm:$0xf] }
  0x13   : > { %v226_v15 = vshll.u32 %v2515_v9, 16  ;;  %v2526_v16 = vld [vmem:[%s2503_s25 + $0x10] sm:$0xf]  ;;  %v2529_v17 = vld [vmem:[%s2503_s25 + $0x14] sm:$0x1]  ;;  %v231_v25 = vshrl.u32 %v2522_v14, 16 }
  0x14   : > { %v209_v19 = vrot.slane %v207_v10, 4  ;;  %v212_v20 = vrot.slane %v210_v11, 5  ;;  %v218_v21 = vrot.slane %v216_v12, 5  ;;  %v222_v22 = vrot.slane %v220_v13, 4  ;;  %v2545_v32 = vld [vmem:[%s2503_s25 + $0x18] sm:$0xf] }
  0x15   : > { %v228_v24 = vrot.slane %v226_v15, 5  ;;  %v234_v26 = vshll.u32 %v2522_v14, 16  ;;  %v240_v27 = vshll.u32 %v2526_v16, 16  ;;  %v244_v30 = vshrl.u32 %v2526_v16, 16  ;;  %v2554_v37 = vld [vmem:[%s2503_s25 + $0x1c] sm:$0xf] }
  0x16   : > { %v213_v28 = vor.u32 %v212_v20, %v209_v19  ;;  %v223_v29 = vor.u32 %v222_v22, %v218_v21  ;;  %v250_v31 = vshll.u32 %v2529_v17, 16  ;;  %v233_v34 = vrot.slane %v231_v25, 4  ;;  %v2562_v45 = vld [vmem:[%s2503_s25 + $0x20] sm:$0x1]  ;;  %v2572_v56 = vld [vmem:[%s2503_s25 + $0x24] sm:$0xf] }
  0x17   : > { %v236_v35 = vrot.slane %v234_v26, 5  ;;  %v242_v36 = vrot.slane %v240_v27, 5  ;;  %v246_v41 = vrot.slane %v244_v30, 4  ;;  %v737_v44 = vrot.slane %v2529_v17, 5  ;;  %v2577_v61 = vld [vmem:[%s2503_s25 + $0x28] sm:$0xf] }
  0x18   : > { %v214_v39 = vrot.slane %v213_v28, 4  ;;  %v224_v40 = vrot.slane %v223_v29, 4  ;;  %v252_v42 = vrot.slane %v250_v31, 5  ;;  %v255_v46 = vshrl.u32 %v2545_v32, 16  ;;  %v2585_v4 = vld [vmem:[%s2503_s25 + $0x2c] sm:$0x1] }
  0x19   : > { %v237_v43 = vor.u32 %v236_v35, %v233_v34  ;;  %v258_v47 = vshll.u32 %v2545_v32, 16  ;;  %v247_v50 = vor.u32 %v246_v41, %v242_v36  ;;  %v264_v51 = vshll.u32 %v2554_v37, 16  ;;  %v2591_v13 = vld [vmem:[%s2503_s25 + $0x30] sm:$0xf]  ;;  %v2598_v22 = vld [vmem:[%s3083_s1 + $0x4] sm:$0x3] }
  0x1a   : > { %v219_v48 = vsel %vm2549_vm4, %v214_v39, %v218_v21  ;;  %v229_v49 = vsel %vm2549_vm4, %v224_v40, %v228_v24  ;;  %v257_v54 = vrot.slane %v255_v46, 4  ;;  %v268_v59 = vshrl.u32 %v2554_v37, 16  ;;  %v2603_v28 = vld [vmem:[%s2503_s25 + $0x34] sm:$0xf]  ;;  %v2610_v34 = vld [vmem:[%s2503_s25 + $0x38] sm:$0x1] }
  0x1b   : > { %v1911_v52 = vcombine.low %v219_v48, %v229_v49  ;;  %v238_v53 = vrot.slane %v237_v43, 4  ;;  %v260_v55 = vrot.slane %v258_v47, 5  ;;  %v248_v57 = vrot.slane %v247_v50, 4 }
  0x1c   : > { %v266_v58 = vrot.slane %v264_v51, 5  ;;  %v274_v60 = vshll.u32 %v2562_v45, 16  ;;  %v741_v0 = vrot.slane %v2554_v37, 5  ;;  %v744_v2 = vrot.slane %v2562_v45, 5  ;;  %v2623_v51 = vld [vmem:[%s2503_s25 + $0x3c] sm:$0xf] }
  0x1d   : > { %2117 = vmatprep.mubr.msk.bf16.mxu1 %vm424_vm3, %v1911_v52  ;;  %v243_v62 = vsel %vm2549_vm4, %v238_v53, %v242_v36  ;;  %v261_v63 = vor.u32 %v260_v55, %v257_v54  ;;  %v253_v5 = vsel %vm2549_vm4, %v248_v57, %v252_v42  ;;  %v270_v10 = vrot.slane %v268_v59, 4  ;;  %v2628_v57 = vld [vmem:[%s2503_s25 + $0x40] sm:$0xf] }
  0x1e   : > { %v276_v11 = vrot.slane %v274_v60, 5  ;;  %v279_v12 = vshrl.u32 %v2572_v56, 16  ;;  %v1912_v15 = vcombine.low %v243_v62, %v253_v5  ;;  %v282_v20 = vshll.u32 %v2572_v56, 16 }
  0x1f   : > { %v262_v19 = vrot.slane %v261_v63, 4  ;;  %v288_v21 = vshll.u32 %v2577_v61, 16  ;;  %v271_v24 = vor.u32 %v270_v10, %v266_v58  ;;  %v292_v26 = vshrl.u32 %v2577_v61, 16 }
  0x20   : > { %v281_v25 = vrot.slane %v279_v12, 4  ;;  %v298_v27 = vshll.u32 %v2585_v4, 16  ;;  %2189 = vmatprep.mubr.msk.bf16.mxu0 %vm424_vm3, %v1912_v15  ;;  %2118 = vmatmul.mubr.msk.bf16.vlgmr.msra.gmra.mrb[0].mxu1 %vm424_vm3, %v1912_v15  ;;  %v284_v30 = vrot.slane %v282_v20, 5  ;;  %v303_v35 = vshrl.u32 %v2591_v13, 16  ;;  %v2649_v20 = vld [vmem:[%s2503_s25 + $0x44] sm:$0x1] }
  0x21   : > { %v267_v29 = vsel %vm2549_vm4, %v262_v19, %v266_v58  ;;  %v290_v31 = vrot.slane %v288_v21, 5  ;;  %2134 = vmatpush3.bf16.msra.mxu1 %v2506_v6  ;;  %v272_v36 = vrot.slane %v271_v24, 4  ;;  %v294_v39 = vrot.slane %v292_v26, 4 }
  0x22   : > { %v300_v40 = vrot.slane %v298_v27, 5  ;;  %v306_v41 = vshll.u32 %v2591_v13, 16  ;;  %v285_v42 = vor.u32 %v284_v30, %v281_v25  ;;  %v305_v43 = vrot.slane %v303_v35, 4  ;;  %2409 = vmatprep.subr.msk.bf16.mxu1 %vm449_vm0, %v2598_v22 }
  0x23   : > { %v312_v46 = vshll.u32 %v2603_v28, 16  ;;  %v316_v47 = vshrl.u32 %v2603_v28, 16  ;;  %v277_v48 = vsel %vm2549_vm4, %v272_v36, %v276_v11  ;;  %v295_v49 = vor.u32 %v294_v39, %v290_v31  ;;  %v2662_v36 = vld [vmem:[%s2503_s25 + $0x48] sm:$0xf] }
  0x24   : > { %v308_v6 = vrot.slane %v306_v41, 5  ;;  %v322_v50 = vshll.u32 %v2610_v34, 16  ;;  %v2625_v52 = vcombine.low %v267_v29, %v277_v48  ;;  %v286_v53 = vrot.slane %v285_v42, 4  ;;  %v2677_v42 = vld [vmem:[%s2503_s25 + $0x4c] sm:$0xf] }
  0x25   : > { %v314_v54 = vrot.slane %v312_v46, 5  ;;  %v318_v55 = vrot.slane %v316_v47, 4  ;;  %v296_v58 = vrot.slane %v295_v49, 4  ;;  %v1944_v63 = vrot.slane %v2522_v14, 9 }
  0x26   : > { %v309_v59 = vor.u32 %v308_v6, %v305_v43  ;;  %v324_v60 = vrot.slane %v322_v50, 5  ;;  %2190 = vmatmul.mubr.msk.bf16.vlgmr.msra.gmra.mrb[0].mxu0 %vm424_vm3, %v2625_v52  ;;  %2121 = vmatprep.mubr.msk.bf16.mxu1 %vm424_vm3, %v2625_v52  ;;  %v291_v5 = vsel %vm2549_vm4, %v286_v53, %v290_v31  ;;  %v734_v11 = vrot.slane %v2526_v16, 5 }
  0x27   : > { %v319_v10 = vor.u32 %v318_v55, %v314_v54  ;;  %v327_v12 = vshrl.u32 %v2623_v51, 16  ;;  %2206 = vmatpush3.bf16.msra.mxu0 %v2532_v18  ;;  %v301_v15 = vsel %vm2549_vm4, %v296_v58, %v300_v40  ;;  %v330_v21 = vshll.u32 %v2623_v51, 16 }
  0x28   : > { %v310_v19 = vrot.slane %v309_v59, 4  ;;  %v336_v24 = vshll.u32 %v2628_v57, 16  ;;  %v2653_v25 = vcombine.low %v291_v5, %v301_v15  ;;  %v735_v27 = vsel %vm2632_vm7, %v1944_v63, %v734_v11  ;;  %2414 = vmatprep.subr.msk.bf16.mxu0 %vm449_vm0, %v2537_v23 }
  0x29   : > { %v320_v26 = vrot.slane %v319_v10, 4  ;;  %v736_v29 = vrot.slane %v734_v11, 4  ;;  %v329_v30 = vrot.slane %v327_v12, 4  ;;  %v332_v31 = vrot.slane %v330_v21, 5 }
  0x2a   : > { %v315_v18 = vsel %vm2549_vm4, %v310_v19, %v314_v54  ;;  %v338_v35 = vrot.slane %v336_v24, 5  ;;  %2193 = vmatprep.mubr.msk.bf16.mxu0 %vm424_vm3, %v2653_v25  ;;  %2122 = vmatmul.mubr.msk.bf16.gmra.mrb[4].mxu1 %vm424_vm3, %v2653_v25  ;;  %v340_v40 = vshrl.u32 %v2628_v57, 16  ;;  %v346_v41 = vshll.u32 %v2649_v20, 16  ;;  %v2694_v54 = vld [vmem:[%s2503_s25 + $0x50] sm:$0x1] }
  0x2b   : > { %v325_v39 = vsel %vm2549_vm4, %v320_v26, %v324_v60  ;;  %v738_v23 = vsel %vm2632_vm7, %v736_v29, %v737_v44  ;;  %v333_v47 = vor.u32 %v332_v31, %v329_v30  ;;  %v1945_v48 = vrot.slane %v2545_v32, 9  ;;  %v2719_v29 = vld [vmem:[%s2503_s25 + $0x58] sm:$0xf] }
  0x2c   : > { %v2679_v43 = vcombine.low %v315_v18, %v325_v39  ;;  %v2681_v46 = vcombine.low %v735_v27, %v738_v23  ;;  %v342_v49 = vrot.slane %v340_v40, 4  ;;  %v348_v17 = vrot.slane %v346_v41, 5  ;;  %v2725_v39 = vld [vmem:[%s2503_s25 + $0x5c] sm:$0x1] }
  0x2d   : > { %v743_v6 = vrot.slane %v741_v0, 4  ;;  %v351_v44 = vshrl.u32 %v2662_v36, 16  ;;  %v334_v50 = vrot.slane %v333_v47, 4  ;;  %v742_v53 = vsel %vm2632_vm7, %v1945_v48, %v741_v0  ;;  %v2706_v0 = vld [vmem:[%s2503_s25 + $0x54] sm:$0xf] }
  0x2e   : > { %2125 = vmatprep.mubr.msk.bf16.mxu1 %vm424_vm3, %v2679_v43  ;;  %v354_v55 = vshll.u32 %v2662_v36, 16  ;;  %v360_v58 = vshll.u32 %v2677_v42, 16  ;;  %2194 = vmatmul.mubr.msk.bf16.gmra.mrb[4].mxu0 %vm424_vm3, %v2679_v43  ;;  %v343_v59 = vor.u32 %v342_v49, %v338_v35  ;;  %v364_v5 = vshrl.u32 %v2677_v42, 16 }
  0x2f   : > { %v745_v60 = vsel %vm2632_vm7, %v743_v6, %v744_v2  ;;  %v353_v63 = vrot.slane %v351_v44, 4  ;;  %2207 = vmatprep.mubr.msk.bf16.mxu0 %vm424_vm3, %v2681_v46  ;;  %v339_v10 = vsel %vm2549_vm4, %v334_v50, %v338_v35  ;;  %v370_v2 = vshll.u32 %v2694_v54, 16 }
  0x30   : > { %v2712_v11 = vcombine.low %v742_v53, %v745_v60  ;;  %v356_v12 = vrot.slane %v354_v55, 5  ;;  %v362_v45 = vrot.slane %v360_v58, 5  ;;  %v344_v15 = vrot.slane %v343_v59, 4  ;;  %v2744_v58 = vld [vmem:[%s3083_s1 + $0xe] sm:$0x3] }
  0x31   : > { %v366_v19 = vrot.slane %v364_v5, 4  ;;  %v1946_v21 = vrot.slane %v2572_v56, 9  ;;  %v748_v26 = vrot.slane %v2577_v61, 5  ;;  %v751_v27 = vrot.slane %v2585_v4, 5 }
  0x32   : > { %v357_v24 = vor.u32 %v356_v12, %v353_v63  ;;  %v375_v18 = vshrl.u32 %v2706_v0, 16  ;;  %v349_v30 = vsel %vm2549_vm4, %v344_v15, %v348_v17  ;;  %v372_v35 = vrot.slane %v370_v2, 5 }
  0x33   : > { %v367_v31 = vor.u32 %v366_v19, %v362_v45  ;;  %v378_v23 = vshll.u32 %v2706_v0, 16  ;;  %v2728_v40 = vcombine.low %v339_v10, %v349_v30  ;;  %v749_v47 = vsel %vm2632_vm7, %v1946_v21, %v748_v26 }
  0x34   : > { %v358_v41 = vrot.slane %v357_v24, 4  ;;  %v750_v4 = vrot.slane %v748_v26, 4  ;;  %v377_v49 = vrot.slane %v375_v18, 4  ;;  %v384_v44 = vshll.u32 %v2719_v29, 16 }
  0x35   : > { %v368_v48 = vrot.slane %v367_v31, 4  ;;  %v380_v6 = vrot.slane %v378_v23, 5  ;;  %2126 = vmatmul.mubr.msk.bf16.gmra.mrb[8].mxu1 %vm424_vm3, %v2728_v40  ;;  %v388_v53 = vshrl.u32 %v2719_v29, 16  ;;  %v394_v55 = vshll.u32 %v2725_v39, 16 }
  0x36   : > { %v363_v17 = vsel %vm2549_vm4, %v358_v41, %v362_v45  ;;  %v752_v50 = vsel %vm2632_vm7, %v750_v4, %v751_v27  ;;  %2208 = vmatmul.mubr.msk.bf16.vlgmr.msra.gmra.mrb[0].mxu0 %vm424_vm3, %v2712_v11  ;;  %v386_v5 = vrot.slane %v384_v44, 5  ;;  %v1947_v45 = vrot.slane %v2591_v13, 9 }
  0x37   : > { %v373_v59 = vsel %vm2549_vm4, %v368_v48, %v372_v35  ;;  %v2750_v60 = vcombine.low %v749_v47, %v752_v50  ;;  %v381_v63 = vor.u32 %v380_v6, %v377_v49  ;;  %2224 = vmatpush3.bf16.msra.mxu0 %v2558_v38  ;;  %v390_v12 = vrot.slane %v388_v53, 4  ;;  %v2788_v53 = vld [vmem:[%s2503_s25 + $0x64] sm:$0xf] }
  0x38   : > { %v2753_v10 = vcombine.low %v363_v17, %v373_v59  ;;  %v755_v19 = vrot.slane %v2603_v28, 5  ;;  %v758_v2 = vrot.slane %v2610_v34, 5  ;;  %v1948_v21 = vrot.slane %v2623_v51, 9  ;;  %2415 = vmatprep.subr.msk.bf16.mxu0 %vm449_vm0, %v2744_v58 }
  0x39   : > { %2211 = vmatprep.mubr.msk.bf16.mxu0 %vm424_vm3, %v2750_v60  ;;  %v382_v15 = vrot.slane %v381_v63, 4  ;;  %v391_v38 = vor.u32 %v390_v12, %v386_v5  ;;  %v396_v24 = vrot.slane %v394_v55, 5  ;;  %v762_v26 = vrot.slane %v2628_v57, 5 }
  0x3a   : > { %2129 = vmatprep.mubr.msk.bf16.mxu1 %vm424_vm3, %v2753_v10  ;;  %v765_v27 = vrot.slane %v2649_v20, 5  ;;  %v756_v18 = vsel %vm2632_vm7, %v1947_v45, %v755_v19  ;;  %v757_v30 = vrot.slane %v755_v19, 4  ;;  %v1927_v34 = vcombine.low %v2509_v7, %v2512_v8  ;;  %v2810_v19 = vld [vmem:[%s2503_s25 + $0x68] sm:$0x1] }
  0x3b   : > { %v769_v31 = vrot.slane %v2677_v42, 5  ;;  %v387_v35 = vsel %vm2549_vm4, %v382_v15, %v386_v5  ;;  %v392_v23 = vrot.slane %v391_v38, 4  ;;  %v763_v41 = vsel %vm2632_vm7, %v1948_v21, %v762_v26  ;;  %v2799_v5 = vld [vmem:[%s2503_s25 + $0x60] sm:$0xf] }
  0x3c   : > { %v764_v47 = vrot.slane %v762_v26, 4  ;;  %v759_v20 = vsel %vm2632_vm7, %v757_v30, %v758_v2  ;;  %v1949_v4 = vrot.slane %v2662_v36, 9  ;;  %v772_v49 = vrot.slane %v2694_v54, 5 }
  0x3d   : > { %v771_v48 = vrot.slane %v769_v31, 4  ;;  %v397_v6 = vsel %vm2549_vm4, %v392_v23, %v396_v24  ;;  %v2782_v44 = vcombine.low %v756_v18, %v759_v20  ;;  %v1950_v50 = vrot.slane %v2706_v0, 9  ;;  %v2835_v23 = vld [vmem:[%s2503_s25 + $0x70] sm:$0xf] }
  0x3e   : > { %v766_v17 = vsel %vm2632_vm7, %v764_v47, %v765_v27  ;;  %v2790_v55 = vcombine.low %v387_v35, %v397_v6  ;;  %v776_v63 = vrot.slane %v2719_v29, 5  ;;  %v779_v54 = vrot.slane %v2725_v39, 5 }
  0x3f   : > { %v2792_v59 = vcombine.low %v763_v41, %v766_v17  ;;  %2212 = vmatmul.mubr.msk.bf16.gmra.mrb[4].mxu0 %vm424_vm3, %v2782_v44  ;;  %v770_v12 = vsel %vm2632_vm7, %v1949_v4, %v769_v31  ;;  %v773_v45 = vsel %vm2632_vm7, %v771_v48, %v772_v49  ;;  %v1224_v39 = vrot.slane %v2788_v53, 5  ;;  %v201_v49 = vld [vmem:[%s2503_s25 + $0x74] sm:$0x1] }
  0x40   : > { %2130 = vmatmul.mubr.msk.bf16.gmra.mrb[12].mxu1 %vm424_vm3, %v2790_v55  ;;  %v778_v15 = vrot.slane %v776_v63, 4  ;;  %v777_v2 = vsel %vm2632_vm7, %v1950_v50, %v776_v63  ;;  %v730_v21 = vrot.slane %v2515_v9, 5  ;;  %v1988_v24 = vrot.slane %v2799_v5, 9 }
  0x41   : > { %2215 = vmatprep.mubr.msk.bf16.mxu0 %vm424_vm3, %v2792_v59  ;;  %2135 = vmatprep.mubr.msk.bf16.mxu1 %vm424_vm3, %v1927_v34  ;;  %v1943_v26 = vrot.slane %v2509_v7, 9  ;;  %v2821_v27 = vcombine.low %v770_v12, %v773_v45  ;;  %v1226_v18 = vrot.slane %v1224_v39, 4  ;;  %v1227_v30 = vrot.slane %v2810_v19, 5  ;;  %v2826_v34 = vld [vmem:[%s2503_s25 + $0x6c] sm:$0xf] }
  0x42   : > { %v780_v38 = vsel %vm2632_vm7, %v778_v15, %v779_v54  ;;  %v727_v31 = vrot.slane %v2512_v8, 5  ;;  %v2830_v9 = vcombine.low %v2522_v14, %v2526_v16  ;;  %v1480_v7 = vshrl.u32 %v2826_v34, 16 }
  0x43   : > { %v2832_v35 = vcombine.low %v777_v2, %v780_v38  ;;  %v1483_v41 = vshll.u32 %v2826_v34, 16  ;;  %v2841_v47 = vcombine.low %v2545_v32, %v2554_v37  ;;  %v1493_v4 = vshrl.u32 %v2835_v23, 16  ;;  %v1968_v37 = vld [vmem:[%s3083_s1 + $0x6] sm:$0x3] }
  0x44   : > { %v728_v8 = vsel %vm2632_vm7, %v1943_v26, %v727_v31  ;;  %v729_v20 = vrot.slane %v727_v31, 4  ;;  %v832_v14 = vsel %vm449_vm0, %v2598_v22, 0  ;;  %v1225_v16 = vsel %vm2632_vm7, %v1988_v24, %v1224_v39 }
  0x45   : > { %v1228_v48 = vsel %vm2632_vm7, %v1226_v18, %v1227_v30  ;;  %v1482_v6 = vrot.slane %v1480_v7, 4  ;;  %v1485_v17 = vrot.slane %v1483_v41, 5  ;;  %v1489_v63 = vshll.u32 %v2835_v23, 16 }
  0x46   : > { %v731_v32 = vsel %vm2632_vm7, %v729_v20, %v730_v21  ;;  %v1495_v54 = vrot.slane %v1493_v4, 4  ;;  %v2867_v12 = vcombine.low %v1225_v16, %v1228_v48  ;;  %v1499_v45 = vshll.u32 %v201_v49, 16 }
  0x47   : > { %2216 = vmatmul.mubr.msk.bf16.gmra.mrb[8].mxu0 %vm424_vm3, %v2821_v27  ;;  %v1952_v22 = vcombine.low %v728_v8, %v731_v32  ;;  %v1486_v50 = vor.u32 %v1485_v17, %v1482_v6  ;;  %v2019_v15 = vrot.slane %v2826_v34, 9  ;;  %v1491_v2 = vrot.slane %v1489_v63, 5 }
  0x48   : > { %2136 = vmatmul.mubr.msk.bf16.vlgmr.msra.gmra.mrb[0].mxu1 %vm424_vm3, %v2830_v9  ;;  %2219 = vmatprep.mubr.msk.bf16.mxu0 %vm424_vm3, %v2832_v35  ;;  %v1630_v21 = vrot.slane %v2835_v23, 5  ;;  %v1633_v38 = vrot.slane %v201_v49, 5  ;;  %v2874_v24 = vcombine.low %v2572_v56, %v2577_v61  ;;  %v2878_v26 = vcombine.low %v2591_v13, %v2603_v28 }
  0x49   : > { %2152 = vmatpush3.bf16.msra.mxu1 %v832_v14  ;;  %2139 = vmatprep.mubr.msk.bf16.mxu1 %vm424_vm3, %v2841_v47  ;;  %v1487_v39 = vrot.slane %v1486_v50, 4  ;;  %v1501_v18 = vrot.slane %v1499_v45, 5  ;;  %v1496_v31 = vor.u32 %v1495_v54, %v1491_v2  ;;  %v2904_v62 = vcombine.low %v2623_v51, %v2628_v57  ;;  %v2020_v14 = vld [vmem:[%s3083_s1 + $0x10] sm:$0x3] }
  0x4a   : > { %2410 = vmatprep.subr.msk.bf16.mxu1 %vm449_vm0, %v1968_v37  ;;  %v2884_v7 = vsel %vm2632_vm7, %v2019_v15, %v1630_v21  ;;  %v1632_v41 = vrot.slane %v1630_v21, 4  ;;  %v1512_v20 = vsel %vm449_vm0, %v2744_v58, 0  ;;  %v2910_v4 = vcombine.low %v2662_v36, %v2677_v42 }
  0x4b   : > { %v1492_v30 = vsel %vm2549_vm4, %v1487_v39, %v1491_v2  ;;  %v1497_v8 = vrot.slane %v1496_v31, 4  ;;  %v1934_v51 = vcombine.low %v2706_v0, %v2719_v29  ;;  %v1969_v57 = vcombine.low %v2799_v5, %v2788_v53 }
  0x4c   : > { %v2890_v56 = vsel %vm2632_vm7, %v1632_v41, %v1633_v38  ;;  %v958_v36 = vsel %vm449_vm0, %v1968_v37, 0  ;;  %v2000_v42 = vcombine.low %v2826_v34, %v2835_v23  ;;  %v1077_v0 = vshll.u32 %v2799_v5, 16 }
  0x4d   : > { %v2021_v61 = vcombine.low %v2884_v7, %v2890_v56  ;;  %v1502_v13 = vsel %vm2549_vm4, %v1497_v8, %v1501_v18  ;;  %v1087_v29 = vshrl.u32 %v2788_v53, 16  ;;  %v1644_v58 = vsel %vm449_vm0, %v2020_v14, 0 }
  0x4e   : > { %v2010_v28 = vcombine.low %v1492_v30, %v1502_v13  ;;  %v1079_v23 = vrot.slane %v1077_v0, 5 }
  0x4f   : > { %2220 = vmatmul.mubr.msk.bf16.gmra.mrb[12].mxu0 %vm424_vm3, %v2867_v12  ;;  %v1089_v48 = vrot.slane %v1087_v29, 4 }
  0x50   : > { %2140 = vmatmul.mubr.msk.bf16.gmra.mrb[4].mxu1 %vm424_vm3, %v2874_v24  ;;  %2225 = vmatprep.mubr.msk.bf16.mxu0 %vm424_vm3, %v2841_v47 }
  0x51   : > { %2143 = vmatprep.mubr.msk.bf16.mxu1 %vm424_vm3, %v2878_v26 }
  0x57   : > { %2226 = vmatmul.mubr.msk.bf16.vlgmr.msra.gmra.mrb[0].mxu0 %vm424_vm3, %v2874_v24 }
  0x58   : > { %2144 = vmatmul.mubr.msk.bf16.gmra.mrb[8].mxu1 %vm424_vm3, %v2904_v62  ;;  %2242 = vmatpush3.bf16.msra.mxu0 %v1512_v20 }
  0x59   : > { %2147 = vmatprep.mubr.msk.bf16.mxu1 %vm424_vm3, %v2910_v4  ;;  %2229 = vmatprep.mubr.msk.bf16.mxu0 %vm424_vm3, %v2878_v26 }
  0x5a   : > { %2416 = vmatprep.subr.msk.bf16.mxu0 %vm449_vm0, %v2020_v14 }
  0x5f   : > { %2230 = vmatmul.mubr.msk.bf16.gmra.mrb[4].mxu0 %vm424_vm3, %v2904_v62 }
  0x60   : > { %2148 = vmatmul.mubr.msk.bf16.gmra.mrb[12].mxu1 %vm424_vm3, %v1934_v51  ;;  %2233 = vmatprep.mubr.msk.bf16.mxu0 %vm424_vm3, %v2910_v4 }
  0x61   : > { %2153 = vmatprep.mubr.msk.bf16.mxu1 %vm424_vm3, %v1952_v22 }
  0x67   : > { %2234 = vmatmul.mubr.msk.bf16.gmra.mrb[8].mxu0 %vm424_vm3, %v1934_v51 }
  0x68   : > { %2154 = vmatmul.mubr.msk.bf16.vlgmr.msra.gmra.mrb[0].mxu1 %vm424_vm3, %v2681_v46  ;;  %2237 = vmatprep.mubr.msk.bf16.mxu0 %vm424_vm3, %v1969_v57  ;;  %v1074_v46 = vshrl.u32 %v2799_v5, 16  ;;  %v1093_v5 = vshll.u32 %v2810_v19, 16 }
  0x69   : > { %2170 = vmatpush3.bf16.msra.mxu1 %v958_v36  ;;  %2157 = vmatprep.mubr.msk.bf16.mxu1 %vm424_vm3, %v2712_v11 }
  0x6a   : > { %2412 = vmatprep.subr.msk.bf16.mxu1 %vm449_vm0, %v2478_v1  ;;  %v1083_v1 = vshll.u32 %v2788_v53, 16  ;;  %v1076_v34 = vrot.slane %v1074_v46, 4  ;;  %v1095_v49 = vrot.slane %v1093_v5, 5 }
  0x6c   : > { %v1085_v16 = vrot.slane %v1083_v1, 5 }
  0x6e   : > { %v1090_v53 = vor.u32 %v1089_v48, %v1085_v16 }
  0x6f   : > { %2238 = vmatmul.mubr.msk.bf16.gmra.mrb[12].mxu0 %vm424_vm3, %v2000_v42 }
  0x70   : > { %2158 = vmatmul.mubr.msk.bf16.gmra.mrb[4].mxu1 %vm424_vm3, %v2750_v60  ;;  %2243 = vmatprep.mubr.msk.bf16.mxu0 %vm424_vm3, %v2625_v52  ;;  %v1080_v52 = vor.u32 %v1079_v23, %v1076_v34  ;;  %v1091_v37 = vrot.slane %v1090_v53, 4 }
  0x71   : > { %2161 = vmatprep.mubr.msk.bf16.mxu1 %vm424_vm3, %v2782_v44 }
  0x72   : > { %v1081_v32 = vrot.slane %v1080_v52, 4 }
  0x77   : > { %2244 = vmatmul.mubr.msk.bf16.vlgmr.msra.gmra.mrb[0].mxu0 %vm424_vm3, %v2653_v25  ;;  %v1086_v25 = vsel %vm2549_vm4, %v1081_v32, %v1085_v16 }
  0x78   : > { %2162 = vmatmul.mubr.msk.bf16.gmra.mrb[8].mxu1 %vm424_vm3, %v2792_v59  ;;  %2260 = vmatpush3.bf16.msra.mxu0 %v1644_v58 }
  0x79   : > { %2165 = vmatprep.mubr.msk.bf16.mxu1 %vm424_vm3, %v2821_v27  ;;  %2247 = vmatprep.mubr.msk.bf16.mxu0 %vm424_vm3, %v2679_v43  ;;  %v1096_v43 = vsel %vm2549_vm4, %v1091_v37, %v1095_v49 }
  0x7a   : > { %v1979_v19 = vcombine.low %v1086_v25, %v1096_v43 }
  0x7f   : > { %2248 = vmatmul.mubr.msk.bf16.gmra.mrb[4].mxu0 %vm424_vm3, %v2728_v40 }
  0x80   : > { %2166 = vmatmul.mubr.msk.bf16.gmra.mrb[12].mxu1 %vm424_vm3, %v2832_v35  ;;  %2251 = vmatprep.mubr.msk.bf16.mxu0 %vm424_vm3, %v2753_v10 }
  0x81   : > { %2171 = vmatprep.mubr.msk.bf16.mxu1 %vm424_vm3, %v2830_v9 }
  0x87   : > { %2252 = vmatmul.mubr.msk.bf16.gmra.mrb[8].mxu0 %vm424_vm3, %v2790_v55 }
  0x88   : > { %2172 = vmatmul.mubr.msk.bf16.vlgmr.msra.gmra.mrb[0].mxu1 %vm424_vm3, %v2841_v47  ;;  %2255 = vmatprep.mubr.msk.bf16.mxu0 %vm424_vm3, %v1979_v19 }
  0x89   : > { %2278 = vmatpush3.bf16.msra.mxu1 %v2486_v3  ;;  %2175 = vmatprep.mubr.msk.bf16.mxu1 %vm424_vm3, %v2874_v24 }
  0x8f   : > { %2256 = vmatmul.mubr.msk.bf16.gmra.mrb[12].mxu0 %vm424_vm3, %v2010_v28 }
  0x90   : > { %2176 = vmatmul.mubr.msk.bf16.gmra.mrb[4].mxu1 %vm424_vm3, %v2878_v26  ;;  %2261 = vmatprep.mubr.msk.bf16.mxu0 %vm424_vm3, %v2712_v11 }
  0x91   : > { %2179 = vmatprep.mubr.msk.bf16.mxu1 %vm424_vm3, %v2904_v62 }
  0x97   : > { %2262 = vmatmul.mubr.msk.bf16.vlgmr.msra.gmra.mrb[0].mxu0 %vm424_vm3, %v2750_v60 }
  0x98   : > { %2180 = vmatmul.mubr.msk.bf16.gmra.mrb[8].mxu1 %vm424_vm3, %v2910_v4  ;;  %2265 = vmatprep.mubr.msk.bf16.mxu0 %vm424_vm3, %v2782_v44 }
  0x99   : > { %2183 = vmatprep.mubr.msk.bf16.mxu1 %vm424_vm3, %v1934_v51 }
  0x9f   : > { %2266 = vmatmul.mubr.msk.bf16.gmra.mrb[4].mxu0 %vm424_vm3, %v2792_v59 }
  0xa0   : > { %2184 = vmatmul.mubr.msk.bf16.gmra.mrb[12].mxu1 %vm424_vm3, %v1969_v57  ;;  %2269 = vmatprep.mubr.msk.bf16.mxu0 %vm424_vm3, %v2821_v27 }
  0xa1   : > { %2197 = vmatprep.mubr.msk.bf16.mxu1 %vm424_vm3, %v2728_v40 }
  0xa7   : > { %2270 = vmatmul.mubr.msk.bf16.gmra.mrb[8].mxu0 %vm424_vm3, %v2832_v35 }
  0xa8   : > { %2198 = vmatmul.mubr.msk.bf16.vlgmr.msra.gmra.mrb[8].mxu1 %vm424_vm3, %v2753_v10  ;;  %2273 = vmatprep.mubr.msk.bf16.mxu0 %vm424_vm3, %v2867_v12 }
  0xa9   : > { %2201 = vmatprep.mubr.msk.bf16.mxu1 %vm424_vm3, %v2790_v55  ;;  %v3023_v55 = vld [vmem:[%s3084_s2] ss:$0 sm:$0xff] }
  0xaf   : > { %2274 = vmatmul.mubr.msk.bf16.gmra.mrb[12].mxu0 %vm424_vm3, %v2021_v61 }
  0xb0   : > { %2202 = vmatmul.mubr.msk.bf16.gmra.mrb[12].mxu1 %vm424_vm3, %v1979_v19 }
 0x15b   : > { %v2173_v3 = vpop.f32.mrb[0].mxu1 }
 0x15c   : > { %v994_v33 = vpop.f32.mrb[1].mxu1 }
 0x15d   : > { %v2174_v11 = vpop.f32.mrb[2].mxu1 }
 0x15e   : > { %v997_v40 = vpop.f32.mrb[3].mxu1 }
 0x163   : > { %v2177_v60 = vpop.f32.mrb[4].mxu1 }
 0x164   : > { %v1010_v10 = vpop.f32.mrb[5].mxu1 }
 0x165   : > { %v2178_v44 = vpop.f32.mrb[6].mxu1 }
 0x166   : > { %v1013_v59 = vpop.f32.mrb[7].mxu1 }
 0x16a   : > { %v2263_v27 = vpop.f32.mrb[0].mxu0 }
 0x16b   : > { %v2279_v9 = vadd.f32 %v2263_v27, %v2173_v3  ;;  %v1680_v35 = vpop.f32.mrb[1].mxu0 }
 0x16c   : > { %v2280_v47 = vadd.f32 %v1680_v35, %v994_v33  ;;  %v2264_v6 = vpop.f32.mrb[2].mxu0 }
 0x16d   : > { %v1768_v17 = vadd.f32 %v2279_v9, %v3023_v55  ;;  %v2281_v22 = vadd.f32 %v2264_v6, %v2174_v11  ;;  %v1683_v50 = vpop.f32.mrb[3].mxu0 }
 0x16e   : > { %v1766_v63 = vadd.f32 %v2280_v47, %v3023_v55  ;;  %v2282_v54 = vadd.f32 %v1683_v50, %v997_v40 }
 0x16f   : > { %vm1784_vm8 = vcmp.ge.f32.partialorder %v1768_v17, 0.0  ;;  %v1800_v12 = vmul.f32 0.01, %v1768_v17  ;;  %v1769_v45 = vadd.f32 %v2281_v22, %v3023_v55 }
 0x170   : > { %vm1782_vm10 = vcmp.ge.f32.partialorder %v1766_v63, 0.0  ;;  %v1798_v15 = vmul.f32 0.01, %v1766_v63  ;;  %v1767_v39 = vadd.f32 %v2282_v54, %v3023_v55 }
 0x171   : > { %v1816_v2 = vsel %vm1784_vm8, %v1768_v17, %v1800_v12  ;;  %vm1785_vm11 = vcmp.ge.f32.partialorder %v1769_v45, 0.0  ;;  %v1801_v21 = vmul.f32 0.01, %v1769_v45 }
 0x172   : > { %1833 = vst.msk [vmem:[%s3031_s16 + $0x10] sm:$0xff] %vm1830_vm9, %v1816_v2  ;;  %v1814_v38 = vsel %vm1782_vm10, %v1766_v63, %v1798_v15  ;;  %vm1783_vm12 = vcmp.ge.f32.partialorder %v1767_v39, 0.0  ;;  %v1799_v24 = vmul.f32 0.01, %v1767_v39  ;;  %v2267_v26 = vpop.f32.mrb[4].mxu0 }
 0x173   : > { %1831 = vst.msk [vmem:[%s3031_s16] sm:$0xff] %vm1830_vm9, %v1814_v38  ;;  %v1817_v18 = vsel %vm1785_vm11, %v1769_v45, %v1801_v21  ;;  %v2283_v30 = vadd.f32 %v2267_v26, %v2177_v60  ;;  %v1696_v31 = vpop.f32.mrb[5].mxu0 }
 0x174   : > { %1834 = vst.msk [vmem:[%s3031_s16 + $0x18] sm:$0xff] %vm1830_vm9, %v1817_v18  ;;  %v1815_v7 = vsel %vm1783_vm12, %v1767_v39, %v1799_v24  ;;  %v2284_v41 = vadd.f32 %v1696_v31, %v1010_v10  ;;  %v2268_v8 = vpop.f32.mrb[6].mxu0 }
 0x175   : > { %1832 = vst.msk [vmem:[%s3031_s16 + $0x8] sm:$0xff] %vm1830_vm9, %v1815_v7  ;;  %v1772_v56 = vadd.f32 %v2283_v30, %v3023_v55  ;;  %v2285_v61 = vadd.f32 %v2268_v8, %v2178_v44  ;;  %v1699_v13 = vpop.f32.mrb[7].mxu0 }
 0x176   : > { %v1770_v28 = vadd.f32 %v2284_v41, %v3023_v55  ;;  %v2286_v62 = vadd.f32 %v1699_v13, %v1013_v59 }
 0x177   : > { %vm1788_vm13 = vcmp.ge.f32.partialorder %v1772_v56, 0.0  ;;  %v1804_v20 = vmul.f32 0.01, %v1772_v56  ;;  %v1773_v4 = vadd.f32 %v2285_v61, %v3023_v55 }
 0x178   : > { %vm1786_vm14 = vcmp.ge.f32.partialorder %v1770_v28, 0.0  ;;  %v1802_v14 = vmul.f32 0.01, %v1770_v28  ;;  %v1771_v51 = vadd.f32 %v2286_v62, %v3023_v55 }
 0x179   : > { %v1820_v57 = vsel %vm1788_vm13, %v1772_v56, %v1804_v20  ;;  %vm1789_vm15 = vcmp.ge.f32.partialorder %v1773_v4, 0.0  ;;  %v1805_v36 = vmul.f32 0.01, %v1773_v4 }
 0x17a   : > { %1837 = vst.msk [vmem:[%s3031_s16 + $0x30] sm:$0xff] %vm1830_vm9, %v1820_v57  ;;  %v1818_v42 = vsel %vm1786_vm14, %v1770_v28, %v1802_v14  ;;  %vm1787_vm0 = vcmp.ge.f32.partialorder %v1771_v51, 0.0  ;;  %v1803_v46 = vmul.f32 0.01, %v1771_v51  ;;  %v2271_v0 = vpop.f32.mrb[8].mxu0 }
 0x17b   : > { %1835 = vst.msk [vmem:[%s3031_s16 + $0x20] sm:$0xff] %vm1830_vm9, %v1818_v42  ;;  %v1821_v1 = vsel %vm1789_vm15, %v1773_v4, %v1805_v36  ;;  %v2199_v29 = vpop.f32.mrb[8].mxu1  ;;  %v1712_v58 = vpop.f32.mrb[9].mxu0 }
 0x17c   : > { %1838 = vst.msk [vmem:[%s3031_s16 + $0x38] sm:$0xff] %vm1830_vm9, %v1821_v1  ;;  %v1819_v34 = vsel %vm1787_vm0, %v1771_v51, %v1803_v46  ;;  %v2287_v23 = vadd.f32 %v2271_v0, %v2199_v29  ;;  %v1174_v16 = vpop.f32.mrb[9].mxu1  ;;  %v2272_v48 = vpop.f32.mrb[10].mxu0 }
 0x17d   : > { %1836 = vst.msk [vmem:[%s3031_s16 + $0x28] sm:$0xff] %vm1830_vm9, %v1819_v34  ;;  %v2288_v52 = vadd.f32 %v1712_v58, %v1174_v16  ;;  %v2200_v53 = vpop.f32.mrb[10].mxu1  ;;  %v1715_v5 = vpop.f32.mrb[11].mxu0 }
 0x17e   : > { %v1776_v32 = vadd.f32 %v2287_v23, %v3023_v55  ;;  %v2289_v37 = vadd.f32 %v2272_v48, %v2200_v53  ;;  %v1177_v49 = vpop.f32.mrb[11].mxu1 }
 0x17f   : > { %v1774_v25 = vadd.f32 %v2288_v52, %v3023_v55  ;;  %v2290_v43 = vadd.f32 %v1715_v5, %v1177_v49 }
 0x180   : > { %vm1792_vm1 = vcmp.ge.f32.partialorder %v1776_v32, 0.0  ;;  %v1808_v19 = vmul.f32 0.01, %v1776_v32  ;;  %v1777_v3 = vadd.f32 %v2289_v37, %v3023_v55 }
 0x181   : > { %vm1790_vm2 = vcmp.ge.f32.partialorder %v1774_v25, 0.0  ;;  %v1806_v33 = vmul.f32 0.01, %v1774_v25  ;;  %v1775_v11 = vadd.f32 %v2290_v43, %v3023_v55 }
 0x182   : > { %v1824_v40 = vsel %vm1792_vm1, %v1776_v32, %v1808_v19  ;;  %vm1793_vm3 = vcmp.ge.f32.partialorder %v1777_v3, 0.0  ;;  %v1809_v60 = vmul.f32 0.01, %v1777_v3  ;;  %v2275_v10 = vpop.f32.mrb[12].mxu0 }
 0x183   : > { %1841 = vst.msk [vmem:[%s3031_s16 + $0x50] sm:$0xff] %vm1830_vm9, %v1824_v40  ;;  %v1822_v44 = vsel %vm1790_vm2, %v1774_v25, %v1806_v33  ;;  %vm1791_vm4 = vcmp.ge.f32.partialorder %v1775_v11, 0.0  ;;  %v1807_v59 = vmul.f32 0.01, %v1775_v11  ;;  %v2203_v27 = vpop.f32.mrb[12].mxu1  ;;  %v1728_v9 = vpop.f32.mrb[13].mxu0 }
 0x184   : > { %1839 = vst.msk [vmem:[%s3031_s16 + $0x40] sm:$0xff] %vm1830_vm9, %v1822_v44  ;;  %v1825_v35 = vsel %vm1793_vm3, %v1777_v3, %v1809_v60  ;;  %v2291_v47 = vadd.f32 %v2275_v10, %v2203_v27  ;;  %v1190_v6 = vpop.f32.mrb[13].mxu1  ;;  %v2276_v17 = vpop.f32.mrb[14].mxu0 }
 0x185   : > { %1842 = vst.msk [vmem:[%s3031_s16 + $0x58] sm:$0xff] %vm1830_vm9, %v1825_v35  ;;  %v1823_v22 = vsel %vm1791_vm4, %v1775_v11, %v1807_v59  ;;  %v2292_v50 = vadd.f32 %v1728_v9, %v1190_v6  ;;  %v2204_v63 = vpop.f32.mrb[14].mxu1  ;;  %v1731_v54 = vpop.f32.mrb[15].mxu0 }
 0x186   : > { %1840 = vst.msk [vmem:[%s3031_s16 + $0x48] sm:$0xff] %vm1830_vm9, %v1823_v22  ;;  %v1780_v12 = vadd.f32 %v2291_v47, %v3023_v55  ;;  %v2293_v45 = vadd.f32 %v2276_v17, %v2204_v63  ;;  %v1193_v15 = vpop.f32.mrb[15].mxu1 }
 0x187   : > { %v1778_v39 = vadd.f32 %v2292_v50, %v3023_v55  ;;  %v2294_v2 = vadd.f32 %v1731_v54, %v1193_v15 }
 0x188   : > { %vm1796_vm5 = vcmp.ge.f32.partialorder %v1780_v12, 0.0  ;;  %v1812_v21 = vmul.f32 0.01, %v1780_v12  ;;  %v1781_v38 = vadd.f32 %v2293_v45, %v3023_v55 }
 0x189   : > { %vm1794_vm6 = vcmp.ge.f32.partialorder %v1778_v39, 0.0  ;;  %v1810_v24 = vmul.f32 0.01, %v1778_v39  ;;  %v1779_v26 = vadd.f32 %v2294_v2, %v3023_v55 }
 0x18a   : > { %v1828_v18 = vsel %vm1796_vm5, %v1780_v12, %v1812_v21  ;;  %vm1797_vm7 = vcmp.ge.f32.partialorder %v1781_v38, 0.0  ;;  %v1813_v30 = vmul.f32 0.01, %v1781_v38 }
 0x18b   : > { %1845 = vst.msk [vmem:[%s3031_s16 + $0x70] sm:$0xff] %vm1830_vm9, %v1828_v18  ;;  %v1826_v31 = vsel %vm1794_vm6, %v1778_v39, %v1810_v24  ;;  %vm1795_vm8 = vcmp.ge.f32.partialorder %v1779_v26, 0.0  ;;  %v1811_v7 = vmul.f32 0.01, %v1779_v26 }
 0x18c   : > { %1843 = vst.msk [vmem:[%s3031_s16 + $0x60] sm:$0xff] %vm1830_vm9, %v1826_v31  ;;  %v1829_v41 = vsel %vm1797_vm7, %v1781_v38, %v1813_v30 }
 0x18d   : > { %1846 = vst.msk [vmem:[%s3031_s16 + $0x78] sm:$0xff] %vm1830_vm9, %v1829_v41  ;;  %v1827_v8 = vsel %vm1795_vm8, %v1779_v26, %v1811_v7 }
 0x18e   : > { %1844 = vst.msk [vmem:[%s3031_s16 + $0x68] sm:$0xff] %vm1830_vm9, %v1827_v8 }
 0x18f PF: > { %s13_s12 = sadd.s32 1, %s2442_s12  }
 0x190   : > { %p10_p4 = scmp.ge.s32.totalorder %s13_s12, 6  }
 0x192   :  { %12 = sbr.rel (!%p10_p4) target bundleno = 1 (0x1), region = 70 }

// kernel: ex_net_forward.9
= control target key start
LH: loop header
LB: loop body
LE: loop exit
PB: predicated region body
PF: predicated region fallthrough
CT: control target
= control target key end

     0   :  { %s357_s6 = smov 0   ;;  %s442_s0 = inlined_call_operand.vmem [shape: f32[16,2,8,128], index: 0, kind: input, shape index: {}]   ;;  %s443_s1 = inlined_call_operand.vmem [shape: f32[16,8,64], index: 1, kind: output, shape index: {}]  }
   0x1 LB: > { %s316_s7 = sadd.s32 4294967295, %s344_s6   ;;  %p320_p0 = scmp.ge.s32.totalorder %s344_s6, 1  ;;  %s344_s6 = sphi %s357_s6, %s11_s6  }
   0x2   : > { %p89_p1 = scmp.lt.s32.totalorder %s344_s6, 3 }
   0x4   : > { %p90_p2 = pnand %p320_p0, %p89_p1 }
   0x5   : > { %s321_s8 = sshll.u32 (!%p90_p2), %s316_s7, 3  ;;  %s346_s13 = smov (!%p90_p2), 64   ;;  %vm251_vm0 = vcmask (!%p90_p2), 523264  }
   0x6   : > { %93 = sbr.rel (%p90_p2) target bundleno = 169 (0xa9), region = 24  ;;  %p111_p3 = scmp.lt.s32.totalorder (!%p90_p2), %s321_s8, 15 }
   0xd   : > { %s445_s8 = smov (!%p111_p3, %s321_s8), 15 }
   0xe   : > { %s328_s9 = sshll.u32 %s445_s8, 4  ;;  %s325_s14 = sshll.u32 %s445_s8, 3 }
   0xf   : > { %s371_s12 = scalar_lea.vmem %s442_s0, %s328_s9  ;;  %s414_s17 = scalar_lea.vmem %s443_s1, %s325_s14 }
  0x10   : > { %v374_v0 = vld [vmem:[%s371_s12 + $0x20] sm:$0xff]  ;;  %v129_v2 = vld [vmem:[%s371_s12 + $0x30] sm:$0xff]  ;;  %v126_v8 = vld [vmem:[%s371_s12 + $0x18] sm:$0xff] }
  0x11   : > { %v123_v1 = vld [vmem:[%s371_s12] sm:$0xff]  ;;  %151 = vrot.lane.b32.xlu1 %v374_v0, %s346_s13  ;;  %v125_v3 = vld [vmem:[%s371_s12 + $0x10] sm:$0xff]  ;;  %v124_v9 = vld [vmem:[%s371_s12 + $0x8] sm:$0xff] }
  0x12   : > { %147 = vrot.lane.b32.xlu0 %v123_v1, %s346_s13  ;;  %v381_v4 = vld [vmem:[%s371_s12 + $0x50] sm:$0xff]  ;;  %v384_v5 = vld [vmem:[%s371_s12 + $0x40] sm:$0xff]  ;;  %v130_v10 = vld [vmem:[%s371_s12 + $0x38] sm:$0xff] }
  0x13   : > { %v389_v6 = vld [vmem:[%s371_s12 + $0x70] sm:$0xff]  ;;  %v392_v7 = vld [vmem:[%s371_s12 + $0x60] sm:$0xff]  ;;  %v128_v11 = vld [vmem:[%s371_s12 + $0x28] sm:$0xff] }
  0x14   : > { %v134_v12 = vld [vmem:[%s371_s12 + $0x58] sm:$0xff]  ;;  %v132_v13 = vld [vmem:[%s371_s12 + $0x48] sm:$0xff] }
  0x15   : > { %153 = vrot.lane.b32.xlu1 %v129_v2, %s346_s13  ;;  %v403_v14 = vld [vmem:[%s371_s12 + $0x78] sm:$0xff]  ;;  %v406_v15 = vld [vmem:[%s371_s12 + $0x68] sm:$0xff] }
  0x16   : > { %149 = vrot.lane.b32.xlu0 %v125_v3, %s346_s13 }
  0x19   : > { %157 = vrot.lane.b32.xlu1 %v381_v4, %s346_s13 }
  0x1a   : > { %155 = vrot.lane.b32.xlu0 %v384_v5, %s346_s13 }
  0x1d   : > { %161 = vrot.lane.b32.xlu1 %v389_v6, %s346_s13 }
  0x1e   : > { %159 = vrot.lane.b32.xlu0 %v392_v7, %s346_s13 }
  0x21   : > { %189 = vrot.lane.b32.xlu1 %v126_v8, %s346_s13 }
  0x22   : > { %187 = vrot.lane.b32.xlu0 %v124_v9, %s346_s13 }
  0x25   : > { %193 = vrot.lane.b32.xlu1 %v130_v10, %s346_s13 }
  0x26   : > { %191 = vrot.lane.b32.xlu0 %v128_v11, %s346_s13 }
  0x29   : > { %197 = vrot.lane.b32.xlu1 %v134_v12, %s346_s13 }
  0x2a   : > { %195 = vrot.lane.b32.xlu0 %v132_v13, %s346_s13 }
  0x2d   : > { %201 = vrot.lane.b32.xlu1 %v403_v14, %s346_s13 }
  0x2e   : > { %199 = vrot.lane.b32.xlu0 %v406_v15, %s346_s13 }
  0x83   : > { %v152_v16 = vpop.permute.xlu1 %151 }
  0x84   : > { %v148_v17 = vpop.permute.xlu0 %147  ;;  %v173_v36 = vmax.f32 %v374_v0, %v152_v16 }
  0x85   : > { %v171_v26 = vmax.f32 %v123_v1, %v148_v17 }
  0x87   : > { %v154_v18 = vpop.permute.xlu1 %153 }
  0x88   : > { %v150_v19 = vpop.permute.xlu0 %149  ;;  %v174_v37 = vmax.f32 %v129_v2, %v154_v18 }
  0x89   : > { %v172_v27 = vmax.f32 %v125_v3, %v150_v19 }
  0x8b   : > { %v158_v20 = vpop.permute.xlu1 %157 }
  0x8c   : > { %v156_v21 = vpop.permute.xlu0 %155  ;;  %v176_v46 = vmax.f32 %v381_v4, %v158_v20 }
  0x8d   : > { %v175_v47 = vmax.f32 %v384_v5, %v156_v21 }
  0x8f   : > { %v162_v22 = vpop.permute.xlu1 %161 }
  0x90   : > { %v160_v23 = vpop.permute.xlu0 %159  ;;  %v178_v60 = vmax.f32 %v389_v6, %v162_v22 }
  0x91   : > { %v177_v61 = vmax.f32 %v392_v7, %v160_v23 }
  0x93   : > { %v190_v24 = vpop.permute.xlu1 %189 }
  0x94   : > { %v188_v25 = vpop.permute.xlu0 %187  ;;  %v212_v28 = vmax.f32 %v126_v8, %v190_v24 }
  0x95   : > { %v211_v29 = vmax.f32 %v124_v9, %v188_v25 }
  0x96   : > { %v220_v30 = vmax.f32 %v172_v27, %v212_v28 }
  0x97   : > { %v219_v31 = vmax.f32 %v171_v26, %v211_v29  ;;  %v194_v32 = vpop.permute.xlu1 %193 }
  0x98   : > { %v192_v33 = vpop.permute.xlu0 %191  ;;  %vm228_vm1 = vcmp.ge.f32.partialorder %v220_v30, 0.0  ;;  %v236_v34 = vmul.f32 0.01, %v220_v30  ;;  %v214_v38 = vmax.f32 %v130_v10, %v194_v32 }
  0x99   : > { %vm227_vm2 = vcmp.ge.f32.partialorder %v219_v31, 0.0  ;;  %v235_v35 = vmul.f32 0.01, %v219_v31  ;;  %v213_v39 = vmax.f32 %v128_v11, %v192_v33 }
  0x9a   : > { %v244_v40 = vsel %vm228_vm1, %v220_v30, %v236_v34  ;;  %v222_v42 = vmax.f32 %v174_v37, %v214_v38 }
  0x9b   : > { %v243_v41 = vsel %vm227_vm2, %v219_v31, %v235_v35  ;;  %253 = vst.msk [vmem:[%s414_s17 + $0x8] sm:$0xff] %vm251_vm0, %v244_v40  ;;  %v221_v43 = vmax.f32 %v173_v36, %v213_v39  ;;  %v198_v44 = vpop.permute.xlu1 %197 }
  0x9c   : > { %252 = vst.msk [vmem:[%s414_s17] sm:$0xff] %vm251_vm0, %v243_v41  ;;  %v196_v45 = vpop.permute.xlu0 %195  ;;  %v216_v48 = vmax.f32 %v134_v12, %v198_v44  ;;  %vm230_vm3 = vcmp.ge.f32.partialorder %v222_v42, 0.0  ;;  %v238_v50 = vmul.f32 0.01, %v222_v42 }
  0x9d   : > { %v215_v49 = vmax.f32 %v132_v13, %v196_v45  ;;  %vm229_vm4 = vcmp.ge.f32.partialorder %v221_v43, 0.0  ;;  %v237_v51 = vmul.f32 0.01, %v221_v43 }
  0x9e   : > { %v224_v52 = vmax.f32 %v176_v46, %v216_v48  ;;  %v246_v54 = vsel %vm230_vm3, %v222_v42, %v238_v50 }
  0x9f   : > { %v223_v53 = vmax.f32 %v175_v47, %v215_v49  ;;  %v245_v55 = vsel %vm229_vm4, %v221_v43, %v237_v51  ;;  %v202_v56 = vpop.permute.xlu1 %201  ;;  %255 = vst.msk [vmem:[%s414_s17 + $0x18] sm:$0xff] %vm251_vm0, %v246_v54 }
  0xa0   : > { %v200_v57 = vpop.permute.xlu0 %199  ;;  %254 = vst.msk [vmem:[%s414_s17 + $0x10] sm:$0xff] %vm251_vm0, %v245_v55  ;;  %vm232_vm5 = vcmp.ge.f32.partialorder %v224_v52, 0.0  ;;  %v240_v58 = vmul.f32 0.01, %v224_v52  ;;  %v218_v62 = vmax.f32 %v403_v14, %v202_v56 }
  0xa1   : > { %vm231_vm6 = vcmp.ge.f32.partialorder %v223_v53, 0.0  ;;  %v239_v59 = vmul.f32 0.01, %v223_v53  ;;  %v217_v63 = vmax.f32 %v406_v15, %v200_v57 }
  0xa2   : > { %v248_v0 = vsel %vm232_vm5, %v224_v52, %v240_v58  ;;  %v226_v2 = vmax.f32 %v178_v60, %v218_v62 }
  0xa3   : > { %v247_v1 = vsel %vm231_vm6, %v223_v53, %v239_v59  ;;  %257 = vst.msk [vmem:[%s414_s17 + $0x28] sm:$0xff] %vm251_vm0, %v248_v0  ;;  %v225_v3 = vmax.f32 %v177_v61, %v217_v63 }
  0xa4   : > { %256 = vst.msk [vmem:[%s414_s17 + $0x20] sm:$0xff] %vm251_vm0, %v247_v1  ;;  %vm234_vm7 = vcmp.ge.f32.partialorder %v226_v2, 0.0  ;;  %v242_v4 = vmul.f32 0.01, %v226_v2 }
  0xa5   : > { %vm233_vm8 = vcmp.ge.f32.partialorder %v225_v3, 0.0  ;;  %v241_v5 = vmul.f32 0.01, %v225_v3 }
  0xa6   : > { %v250_v6 = vsel %vm234_vm7, %v226_v2, %v242_v4 }
  0xa7   : > { %v249_v8 = vsel %vm233_vm8, %v225_v3, %v241_v5  ;;  %259 = vst.msk [vmem:[%s414_s17 + $0x38] sm:$0xff] %vm251_vm0, %v250_v6 }
  0xa8   : > { %258 = vst.msk [vmem:[%s414_s17 + $0x30] sm:$0xff] %vm251_vm0, %v249_v8 }
  0xa9 PF: > { %s11_s6 = sadd.s32 1, %s344_s6  }
  0xaa   : > { %p8_p4 = scmp.ge.s32.totalorder %s11_s6, 4  }
  0xac   :  { %10 = sbr.rel (!%p8_p4) target bundleno = 1 (0x1), region = 54 }

// kernel: ex_net_forward.8
= control target key start
LH: loop header
LB: loop body
LE: loop exit
PB: predicated region body
PF: predicated region fallthrough
CT: control target
= control target key end

     0   :  { %s2921_s12 = smov 0   ;;  %s3640_s0 = inlined_call_operand.vmem [shape: bf16[4,10,18,64], index: 0, kind: input, shape index: {}]   ;;  %s3641_s1 = inlined_call_operand.vmem [shape: bf16[9,64,64], index: 1, kind: input, shape index: {}]   ;;  %s3642_s2 = inlined_call_operand.vmem [shape: f32[1,64], index: 2, kind: input, shape index: {}]   ;;  %s3643_s3 = inlined_call_operand.vmem [shape: f32[4,128,64], index: 3, kind: output, shape index: {}]  }
   0x1 LB: > { %s2152_s13 = sadd.s32 4294967295, %s2899_s12   ;;  %p2156_p0 = scmp.ge.s32.totalorder %s2899_s12, 1  ;;  %s2899_s12 = sphi %s2921_s12, %s13_s12  }
   0x2   : > { %p137_p1 = scmp.lt.s32.totalorder %s2899_s12, 5 }
   0x4   : > { %p138_p2 = pnand %p2156_p0, %p137_p1 }
   0x5   : > { %v2845_v0 = vld [vmem:[%s3641_s1 + $0x20] sm:$0xff] (!%p138_p2)   ;;  %p161_p3 = scmp.lt.s32.totalorder (!%p138_p2), %s2152_s13, 3  ;;  %v2847_v2 = vld [vmem:[%s3641_s1 + $0x28] sm:$0xff] (!%p138_p2)   ;;  %v2849_v4 = vld [vmem:[%s3641_s1 + $0x30] sm:$0xff] (!%p138_p2)   ;;  %vm210_vm0 = vsmask.f32 (!%p138_p2), 3328 }
   0x6   : > { %141 = sbr.rel (%p138_p2) target bundleno = 399 (0x18f), region = 32  ;;  %v2935_v1 = vld [vmem:[%s3641_s1 + $0x80] sm:$0xff] (!%p138_p2)   ;;  %2484 = vmatprep.subr.bf16.mxu1 (!%p138_p2), %v2845_v0  ;;  %v2946_v3 = vld [vmem:[%s3641_s1 + $0x88] sm:$0xff] (!%p138_p2)   ;;  %v2957_v5 = vld [vmem:[%s3641_s1 + $0x90] sm:$0xff] (!%p138_p2)   ;;  %vm211_vm1 = vsmask.f32 (!%p138_p2), 7440 }
   0x7   : > { %2580 = vmatprep.subr.bf16.mxu0 (!%p138_p2), %v2935_v1  ;;  %2485 = vmatpush3.bf16.msra.mxu1 (!%p138_p2), %v2845_v0  ;;  %v2851_v6 = vld [vmem:[%s3641_s1 + $0x38] sm:$0xff] (!%p138_p2)   ;;  %v2991_v18 = vld [vmem:[%s3641_s1] sm:$0xff] (!%p138_p2)   ;;  %vm3013_vm2 = vmor (!%p138_p2), %vm210_vm0, %vm211_vm1  ;;  %vm462_vm3 = vcmask (!%p138_p2), 523264   ;;  %vm777_vm4 = vcmask (!%p138_p2), 1042432   ;;  %vm778_vm5 = vcmask (!%p138_p2), 1046532  }
   0x8   : > { %2581 = vmatpush3.bf16.msra.mxu0 (!%p138_p2), %v2935_v1  ;;  %2486 = vmatprep.subr.bf16.mxu1 (!%p138_p2), %v2847_v2  ;;  %v2970_v7 = vld [vmem:[%s3641_s1 + $0x98] sm:$0xff] (!%p138_p2)   ;;  %v3000_v23 = vld [vmem:[%s3641_s1 + $0xa0] sm:$0xff] (!%p138_p2)   ;;  %v2857_v0 = vld [vmem:[%s3641_s1 + $0x8] sm:$0xff] (!%p138_p2)  }
   0x9   : > { %2582 = vmatprep.subr.bf16.mxu0 (!%p138_p2), %v2946_v3  ;;  %vm3099_vm6 = vmor (!%p138_p2), %vm777_vm4, %vm778_vm5  ;;  %v2892_v29 = vld [vmem:[%s3641_s1 + $0x88] sm:$0xff] (!%p138_p2)  }
   0xb   : > { %2487 = vmatpush3.bf16.msra.mxu1 (!%p138_p2), %v2847_v2 }
   0xc   : > { %2583 = vmatpush3.bf16.msra.mxu0 (!%p138_p2), %v2946_v3  ;;  %2488 = vmatprep.subr.bf16.mxu1 (!%p138_p2), %v2849_v4 }
   0xd   : > { %s3649_s13 = smov (!%p161_p3, %s2152_s13), 3  ;;  %2584 = vmatprep.subr.bf16.mxu0 %v2957_v5 }
   0xe   : > { %s2836_s24 = smul.u32 120, %s3649_s13  ;;  %s2375_s21 = sshll.u32 %s3649_s13, 7 }
   0xf   : > { %2489 = vmatpush3.bf16.msra.mxu1 %v2849_v4 }
  0x10   : > { %s2965_s4 = scalar_lea.vmem %s3640_s0, %s2836_s24  ;;  %2585 = vmatpush3.bf16.msra.mxu0 %v2957_v5  ;;  %2490 = vmatprep.subr.bf16.mxu1 %v2851_v6  ;;  %s3589_s24 = scalar_lea.vmem %s3643_s3, %s2375_s21 }
  0x11   : > { %v2974_v8 = vld [vmem:[%s2965_s4] sm:$0xf]  ;;  %v2977_v9 = vld [vmem:[%s2965_s4 + $0x4] sm:$0xf]  ;;  %v2980_v10 = vld [vmem:[%s2965_s4 + $0x8] sm:$0x1]  ;;  %2586 = vmatprep.subr.bf16.mxu0 %v2970_v7 }
  0x12   : > { %v214_v11 = vshrl.u32 %v2974_v8, 16  ;;  %v217_v12 = vshll.u32 %v2974_v8, 16  ;;  %v223_v13 = vshll.u32 %v2977_v9, 16  ;;  %v227_v14 = vshrl.u32 %v2977_v9, 16  ;;  %v2995_v22 = vld [vmem:[%s2965_s4 + $0xc] sm:$0xf] }
  0x13   : > { %v233_v15 = vshll.u32 %v2980_v10, 16  ;;  %v3004_v25 = vld [vmem:[%s2965_s4 + $0x10] sm:$0xf]  ;;  %v3007_v26 = vld [vmem:[%s2965_s4 + $0x14] sm:$0x1]  ;;  %v238_v27 = vshrl.u32 %v2995_v22, 16  ;;  %2491 = vmatpush3.bf16.msra.mxu1 %v2851_v6 }
  0x14   : > { %v216_v16 = vrot.slane %v214_v11, 4  ;;  %v219_v17 = vrot.slane %v217_v12, 5  ;;  %v225_v19 = vrot.slane %v223_v13, 5  ;;  %v229_v20 = vrot.slane %v227_v14, 4  ;;  %2587 = vmatpush3.bf16.msra.mxu0 %v2970_v7  ;;  %2508 = vmatprep.subr.bf16.mxu1 %v2991_v18  ;;  %v3023_v41 = vld [vmem:[%s2965_s4 + $0x18] sm:$0xf] }
  0x15   : > { %v235_v21 = vrot.slane %v233_v15, 5  ;;  %v241_v28 = vshll.u32 %v2995_v22, 16  ;;  %v247_v31 = vshll.u32 %v3004_v25, 16  ;;  %v251_v32 = vshrl.u32 %v3004_v25, 16  ;;  %2604 = vmatprep.subr.bf16.mxu0 %v3000_v23  ;;  %v3030_v45 = vld [vmem:[%s2965_s4 + $0x1c] sm:$0xf] }
  0x16   : > { %v220_v24 = vor.u32 %v219_v17, %v216_v16  ;;  %v230_v30 = vor.u32 %v229_v20, %v225_v19  ;;  %v257_v33 = vshll.u32 %v3007_v26, 16  ;;  %v240_v35 = vrot.slane %v238_v27, 4  ;;  %v3033_v46 = vld [vmem:[%s2965_s4 + $0x20] sm:$0x1]  ;;  %v3051_v2 = vld [vmem:[%s2965_s4 + $0x24] sm:$0xf] }
  0x17   : > { %v243_v36 = vrot.slane %v241_v28, 5  ;;  %v249_v38 = vrot.slane %v247_v31, 5  ;;  %v253_v39 = vrot.slane %v251_v32, 4  ;;  %v792_v44 = vrot.slane %v3007_v26, 5  ;;  %v3056_v12 = vld [vmem:[%s2965_s4 + $0x28] sm:$0xf] }
  0x18   : > { %v221_v34 = vrot.slane %v220_v24, 4  ;;  %v231_v37 = vrot.slane %v230_v30, 4  ;;  %v259_v40 = vrot.slane %v257_v33, 5  ;;  %v262_v47 = vshrl.u32 %v3023_v41, 16  ;;  %v3059_v13 = vld [vmem:[%s2965_s4 + $0x2c] sm:$0x1] }
  0x19   : > { %v244_v43 = vor.u32 %v243_v36, %v240_v35  ;;  %v254_v49 = vor.u32 %v253_v39, %v249_v38  ;;  %v265_v50 = vshll.u32 %v3023_v41, 16  ;;  %v271_v51 = vshll.u32 %v3030_v45, 16  ;;  %v3067_v28 = vld [vmem:[%s2965_s4 + $0x30] sm:$0xf]  ;;  %v3072_v33 = vld [vmem:[%s2965_s4 + $0x34] sm:$0xf] }
  0x1a   : > { %v226_v42 = vsel %vm3013_vm2, %v221_v34, %v225_v19  ;;  %v236_v48 = vsel %vm3013_vm2, %v231_v37, %v235_v21  ;;  %v264_v54 = vrot.slane %v262_v47, 4  ;;  %v275_v55 = vshrl.u32 %v3030_v45, 16  ;;  %v2856_v36 = vld [vmem:[%s3641_s1 + $0xa8] sm:$0xff]   ;;  %v3082_v39 = vld [vmem:[%s2965_s4 + $0x38] sm:$0x1] }
  0x1b   : > { %v2168_v52 = vcombine.low %v226_v42, %v236_v48  ;;  %v245_v53 = vrot.slane %v244_v43, 4  ;;  %v255_v56 = vrot.slane %v254_v49, 4  ;;  %v267_v57 = vrot.slane %v265_v50, 5  ;;  %v3088_v42 = vld [vmem:[%s3641_s1 + $0x10] sm:$0xff]   ;;  %v2859_v26 = vld [vmem:[%s3641_s1 + $0xb8] sm:$0xff]  }
  0x1c   : > { %v273_v58 = vrot.slane %v271_v51, 5  ;;  %v281_v59 = vshll.u32 %v3033_v46, 16  ;;  %v277_v61 = vrot.slane %v275_v55, 4  ;;  %v796_v62 = vrot.slane %v3030_v45, 5 }
  0x1d   : > { %2492 = vmatprep.mubr.msk.bf16.mxu1 %vm462_vm3, %v2168_v52  ;;  %v250_v60 = vsel %vm3013_vm2, %v245_v53, %v249_v38  ;;  %v799_v63 = vrot.slane %v3033_v46, 5  ;;  %v260_v4 = vsel %vm3013_vm2, %v255_v56, %v259_v40  ;;  %v268_v6 = vor.u32 %v267_v57, %v264_v54 }
  0x1e   : > { %v283_v11 = vrot.slane %v281_v59, 5  ;;  %v286_v14 = vshrl.u32 %v3051_v2, 16  ;;  %v2169_v15 = vcombine.low %v250_v60, %v260_v4  ;;  %v278_v16 = vor.u32 %v277_v61, %v273_v58 }
  0x1f   : > { %v289_v17 = vshll.u32 %v3051_v2, 16  ;;  %v295_v19 = vshll.u32 %v3056_v12, 16  ;;  %v269_v20 = vrot.slane %v268_v6, 4  ;;  %v299_v24 = vshrl.u32 %v3056_v12, 16 }
  0x20   : > { %v288_v21 = vrot.slane %v286_v14, 4  ;;  %v305_v27 = vshll.u32 %v3059_v13, 16  ;;  %2588 = vmatprep.mubr.msk.bf16.mxu0 %vm462_vm3, %v2169_v15  ;;  %2493 = vmatmul.mubr.msk.bf16.vlgmr.msra.gmra.mrb[0].mxu1 %vm462_vm3, %v2169_v15  ;;  %v279_v30 = vrot.slane %v278_v16, 4  ;;  %v310_v34 = vshrl.u32 %v3067_v28, 16  ;;  %v3116_v14 = vld [vmem:[%s2965_s4 + $0x40] sm:$0xf] }
  0x21   : > { %v291_v31 = vrot.slane %v289_v17, 5  ;;  %v297_v32 = vrot.slane %v295_v19, 5  ;;  %2509 = vmatpush3.bf16.msra.mxu1 %v2991_v18  ;;  %v274_v35 = vsel %vm3013_vm2, %v269_v20, %v273_v58  ;;  %v301_v37 = vrot.slane %v299_v24, 4 }
  0x22   : > { %v307_v38 = vrot.slane %v305_v27, 5  ;;  %v313_v40 = vshll.u32 %v3067_v28, 16  ;;  %v284_v18 = vsel %vm3013_vm2, %v279_v30, %v283_v11  ;;  %2510 = vmatprep.subr.bf16.mxu1 %v2857_v0  ;;  %v312_v47 = vrot.slane %v310_v34, 4  ;;  %v3113_v11 = vld [vmem:[%s2965_s4 + $0x3c] sm:$0xf] }
  0x23   : > { %v292_v43 = vor.u32 %v291_v31, %v288_v21  ;;  %v319_v48 = vshll.u32 %v3072_v33, 16  ;;  %v3093_v49 = vcombine.low %v274_v35, %v284_v18  ;;  %v302_v50 = vor.u32 %v301_v37, %v297_v32  ;;  %v3130_v21 = vld [vmem:[%s2965_s4 + $0x44] sm:$0x1]  ;;  %v3147_v18 = vld [vmem:[%s2965_s4 + $0x50] sm:$0x1] }
  0x24   : > { %v315_v51 = vrot.slane %v313_v40, 5  ;;  %v323_v52 = vshrl.u32 %v3072_v33, 16  ;;  %v329_v55 = vshll.u32 %v3082_v39, 16  ;;  %v2209_v57 = vrot.slane %v2995_v22, 9  ;;  %v3144_v40 = vld [vmem:[%s2965_s4 + $0x4c] sm:$0xf] }
  0x25   : > { %v293_v53 = vrot.slane %v292_v43, 4  ;;  %v321_v54 = vrot.slane %v319_v48, 5  ;;  %2589 = vmatmul.mubr.msk.bf16.vlgmr.msra.gmra.mrb[0].mxu0 %vm462_vm3, %v3093_v49  ;;  %2496 = vmatprep.mubr.msk.bf16.mxu1 %vm462_vm3, %v3093_v49  ;;  %v303_v58 = vrot.slane %v302_v50, 4  ;;  %v789_v61 = vrot.slane %v3004_v25, 5  ;;  %v2862_v43 = vld [vmem:[%s3641_s1 + $0x18] sm:$0xff]  }
  0x26   : > { %v316_v59 = vor.u32 %v315_v51, %v312_v47  ;;  %v325_v60 = vrot.slane %v323_v52, 4  ;;  %2605 = vmatpush3.bf16.msra.mxu0 %v3000_v23  ;;  %2511 = vmatpush3.bf16.msra.mxu1 %v2857_v0  ;;  %v331_v6 = vrot.slane %v329_v55, 5  ;;  %v2210_v15 = vrot.slane %v3023_v41, 9  ;;  %v2858_v23 = vld [vmem:[%s3641_s1 + $0xb0] sm:$0xff]  }
  0x27   : > { %v298_v4 = vsel %vm3013_vm2, %v293_v53, %v297_v32  ;;  %v2188_v16 = vcombine.low %v2974_v8, %v2977_v9  ;;  %2606 = vmatprep.subr.bf16.mxu0 %v2856_v36  ;;  %v308_v17 = vsel %vm3013_vm2, %v303_v58, %v307_v38  ;;  %2512 = vmatprep.subr.bf16.mxu1 %v3088_v42  ;;  %v791_v27 = vrot.slane %v789_v61, 4  ;;  %v3137_v32 = vld [vmem:[%s2965_s4 + $0x48] sm:$0xf] }
  0x28   : > { %v317_v0 = vrot.slane %v316_v59, 4  ;;  %v326_v19 = vor.u32 %v325_v60, %v321_v54  ;;  %v790_v20 = vsel %vm3099_vm6, %v2209_v57, %v789_v61  ;;  %v3132_v24 = vcombine.low %v298_v4, %v308_v17 }
  0x29   : > { %v334_v30 = vshrl.u32 %v3113_v11, 16  ;;  %v337_v31 = vshll.u32 %v3113_v11, 16  ;;  %v343_v37 = vshll.u32 %v3116_v14, 16  ;;  %v347_v38 = vshrl.u32 %v3116_v14, 16 }
  0x2a   : > { %v322_v34 = vsel %vm3013_vm2, %v317_v0, %v321_v54  ;;  %v327_v35 = vrot.slane %v326_v19, 4  ;;  %2607 = vmatpush3.bf16.msra.mxu0 %v2856_v36  ;;  %2592 = vmatprep.mubr.msk.bf16.mxu0 %vm462_vm3, %v3132_v24  ;;  %v793_v47 = vsel %vm3099_vm6, %v791_v27, %v792_v44  ;;  %v353_v51 = vshll.u32 %v3130_v21, 16  ;;  %v3192_v0 = vld [vmem:[%s2965_s4 + $0x54] sm:$0xf]  ;;  %v3195_v19 = vld [vmem:[%s2965_s4 + $0x58] sm:$0xf] }
  0x2b   : > { %v336_v48 = vrot.slane %v334_v30, 4  ;;  %v339_v50 = vrot.slane %v337_v31, 5  ;;  %2608 = vmatprep.subr.bf16.mxu0 %v2858_v23  ;;  %2497 = vmatmul.mubr.msk.bf16.gmra.mrb[4].mxu1 %vm462_vm3, %v3132_v24  ;;  %v3163_v36 = vcombine.low %v790_v20, %v793_v47  ;;  %v345_v53 = vrot.slane %v343_v37, 5  ;;  %v2861_v20 = vld [vmem:[%s3641_s1 + $0xc0] sm:$0xff]  }
  0x2c   : > { %v332_v52 = vsel %vm3013_vm2, %v327_v35, %v331_v6  ;;  %v349_v54 = vrot.slane %v347_v38, 4  ;;  %v355_v57 = vrot.slane %v353_v51, 5  ;;  %2513 = vmatpush3.bf16.msra.mxu1 %v3088_v42  ;;  %v797_v58 = vsel %vm3099_vm6, %v2210_v15, %v796_v62  ;;  %v3182_v6 = vld [vmem:[%s3641_s1 + $0x40] sm:$0xff]   ;;  %v3214_v51 = vld [vmem:[%s2965_s4 + $0x5c] sm:$0x1] }
  0x2d   : > { %v3165_v55 = vcombine.low %v322_v34, %v332_v52  ;;  %v340_v44 = vor.u32 %v339_v50, %v336_v48  ;;  %v798_v60 = vrot.slane %v796_v62, 4  ;;  %v358_v61 = vshrl.u32 %v3137_v32, 16  ;;  %2514 = vmatprep.subr.bf16.mxu1 %v2862_v43 }
  0x2e   : > { %v350_v59 = vor.u32 %v349_v54, %v345_v53  ;;  %v361_v4 = vshll.u32 %v3137_v32, 16  ;;  %v367_v15 = vshll.u32 %v3144_v40, 16  ;;  %v371_v62 = vshrl.u32 %v3144_v40, 16  ;;  %2609 = vmatpush3.bf16.msra.mxu0 %v2858_v23 }
  0x2f   : > { %2593 = vmatmul.mubr.msk.bf16.gmra.mrb[4].mxu0 %vm462_vm3, %v3165_v55  ;;  %2500 = vmatprep.mubr.msk.bf16.mxu1 %vm462_vm3, %v3165_v55  ;;  %v341_v42 = vrot.slane %v340_v44, 4  ;;  %v377_v17 = vshll.u32 %v3147_v18, 16  ;;  %v800_v30 = vsel %vm3099_vm6, %v798_v60, %v799_v63  ;;  %v360_v31 = vrot.slane %v358_v61, 4 }
  0x30   : > { %2612 = vmatprep.mubr.msk.bf16.mxu0 %vm462_vm3, %v3163_v36  ;;  %v351_v27 = vrot.slane %v350_v59, 4  ;;  %v363_v34 = vrot.slane %v361_v4, 5  ;;  %2610 = vmatprep.subr.bf16.mxu0 %v2859_v26  ;;  %v3208_v35 = vcombine.low %v797_v58, %v800_v30  ;;  %v369_v37 = vrot.slane %v367_v15, 5 }
  0x31   : > { %v346_v23 = vsel %vm3013_vm2, %v341_v42, %v345_v53  ;;  %v373_v38 = vrot.slane %v371_v62, 4  ;;  %2515 = vmatpush3.bf16.msra.mxu1 %v2862_v43  ;;  %v379_v50 = vrot.slane %v377_v17, 5  ;;  %v2211_v46 = vrot.slane %v3051_v2, 9 }
  0x32   : > { %v356_v47 = vsel %vm3013_vm2, %v351_v27, %v355_v57  ;;  %v364_v48 = vor.u32 %v363_v34, %v360_v31  ;;  %2532 = vmatprep.subr.bf16.mxu1 %v3182_v6  ;;  %v803_v53 = vrot.slane %v3056_v12, 5  ;;  %v806_v54 = vrot.slane %v3059_v13, 5  ;;  %2611 = vmatpush3.bf16.msra.mxu0 %v2859_v26  ;;  %v2863_v13 = vld [vmem:[%s3641_s1 + $0xc8] sm:$0xff]  }
  0x33   : > { %v3217_v63 = vcombine.low %v346_v23, %v356_v47  ;;  %v374_v52 = vor.u32 %v373_v38, %v369_v37  ;;  %v382_v44 = vshrl.u32 %v3192_v0, 16  ;;  %v385_v57 = vshll.u32 %v3192_v0, 16  ;;  %2628 = vmatprep.subr.bf16.mxu0 %v2861_v20 }
  0x34   : > { %v365_v43 = vrot.slane %v364_v48, 4  ;;  %v391_v58 = vshll.u32 %v3195_v19, 16  ;;  %v804_v60 = vsel %vm3099_vm6, %v2211_v46, %v803_v53  ;;  %v805_v61 = vrot.slane %v803_v53, 4 }
  0x35   : > { %2501 = vmatmul.mubr.msk.bf16.gmra.mrb[8].mxu1 %vm462_vm3, %v3217_v63  ;;  %v375_v59 = vrot.slane %v374_v52, 4  ;;  %v395_v26 = vshrl.u32 %v3195_v19, 16  ;;  %v384_v42 = vrot.slane %v382_v44, 4  ;;  %v387_v15 = vrot.slane %v385_v57, 5  ;;  %v2866_v52 = vld [vmem:[%s3641_s1 + $0xd0] sm:$0xff]  }
  0x36   : > { %v370_v4 = vsel %vm3013_vm2, %v365_v43, %v369_v37  ;;  %v393_v62 = vrot.slane %v391_v58, 5  ;;  %v807_v27 = vsel %vm3099_vm6, %v805_v61, %v806_v54  ;;  %v401_v31 = vshll.u32 %v3214_v51, 16 }
  0x37   : > { %2613 = vmatmul.mubr.msk.bf16.vlgmr.msra.gmra.mrb[0].mxu0 %vm462_vm3, %v3208_v35  ;;  %v380_v17 = vsel %vm3013_vm2, %v375_v59, %v379_v50  ;;  %v397_v30 = vrot.slane %v395_v26, 4  ;;  %v3243_v23 = vcombine.low %v804_v60, %v807_v27  ;;  %v388_v37 = vor.u32 %v387_v15, %v384_v42 }
  0x38   : > { %2629 = vmatpush3.bf16.msra.mxu0 %v2861_v20  ;;  %v3241_v34 = vcombine.low %v370_v4, %v380_v17  ;;  %v2212_v38 = vrot.slane %v3067_v28, 9  ;;  %v403_v48 = vrot.slane %v401_v31, 5  ;;  %v810_v46 = vrot.slane %v3072_v33, 5  ;;  %v3267_v4 = vld [vmem:[%s2965_s4 + $0x64] sm:$0xf] }
  0x39   : > { %2630 = vmatprep.subr.bf16.mxu0 %v2863_v13  ;;  %v398_v47 = vor.u32 %v397_v30, %v393_v62  ;;  %v813_v50 = vrot.slane %v3082_v39, 5  ;;  %2616 = vmatprep.mubr.msk.bf16.mxu0 %vm462_vm3, %v3243_v23  ;;  %v389_v20 = vrot.slane %v388_v37, 4  ;;  %v2213_v53 = vrot.slane %v3113_v11, 9 }
  0x3a   : > { %2504 = vmatprep.mubr.msk.bf16.mxu1 %vm462_vm3, %v3241_v34  ;;  %v817_v54 = vrot.slane %v3116_v14, 5  ;;  %v820_v43 = vrot.slane %v3130_v21, 5  ;;  %v811_v39 = vsel %vm3099_vm6, %v2212_v38, %v810_v46  ;;  %v812_v57 = vrot.slane %v810_v46, 4 }
  0x3b   : > { %v399_v44 = vrot.slane %v398_v47, 4  ;;  %v2214_v58 = vrot.slane %v3137_v32, 9  ;;  %v394_v59 = vsel %vm3013_vm2, %v389_v20, %v393_v62  ;;  %v824_v26 = vrot.slane %v3144_v40, 5  ;;  %v3293_v47 = vld [vmem:[%s2965_s4 + $0x60] sm:$0xf] }
  0x3c   : > { %2631 = vmatpush3.bf16.msra.mxu0 %v2863_v13  ;;  %v818_v60 = vsel %vm3099_vm6, %v2213_v53, %v817_v54  ;;  %v819_v61 = vrot.slane %v817_v54, 4  ;;  %v814_v42 = vsel %vm3099_vm6, %v812_v57, %v813_v50  ;;  %v827_v15 = vrot.slane %v3147_v18, 5  ;;  %v2869_v18 = vld [vmem:[%s3641_s1 + $0xd8] sm:$0xff]   ;;  %v3306_v50 = vld [vmem:[%s2965_s4 + $0x68] sm:$0x1] }
  0x3d   : > { %v404_v21 = vsel %vm3013_vm2, %v399_v44, %v403_v48  ;;  %2632 = vmatprep.subr.bf16.mxu0 %v2866_v52  ;;  %v2215_v13 = vrot.slane %v3192_v0, 9  ;;  %v3277_v17 = vcombine.low %v811_v39, %v814_v42  ;;  %v826_v31 = vrot.slane %v824_v26, 4  ;;  %v3316_v54 = vld [vmem:[%s2965_s4 + $0x6c] sm:$0xf] }
  0x3e   : > { %v3275_v62 = vcombine.low %v394_v59, %v404_v21  ;;  %v821_v27 = vsel %vm3099_vm6, %v819_v61, %v820_v43  ;;  %v831_v37 = vrot.slane %v3195_v19, 5  ;;  %v834_v38 = vrot.slane %v3214_v51, 5  ;;  %v3336_v61 = vld [vmem:[%s2965_s4 + $0x70] sm:$0xf] }
  0x3f   : > { %v3281_v30 = vcombine.low %v818_v60, %v821_v27  ;;  %2617 = vmatmul.mubr.msk.bf16.gmra.mrb[4].mxu0 %vm462_vm3, %v3277_v17  ;;  %v825_v51 = vsel %vm3099_vm6, %v2214_v58, %v824_v26  ;;  %v828_v48 = vsel %vm3099_vm6, %v826_v31, %v827_v15  ;;  %v1363_v20 = vrot.slane %v3267_v4, 5  ;;  %v2868_v58 = vld [vmem:[%s3641_s1 + $0x48] sm:$0xff]   ;;  %v201_v31 = vld [vmem:[%s2965_s4 + $0x74] sm:$0x1] }
  0x40   : > { %2505 = vmatmul.mubr.msk.bf16.gmra.mrb[12].mxu1 %vm462_vm3, %v3275_v62  ;;  %v833_v46 = vrot.slane %v831_v37, 4  ;;  %v785_v53 = vrot.slane %v2980_v10, 5  ;;  %2633 = vmatpush3.bf16.msra.mxu0 %v2866_v52  ;;  %v832_v43 = vsel %vm3099_vm6, %v2215_v13, %v831_v37  ;;  %v2286_v39 = vrot.slane %v3293_v47, 9 }
  0x41   : > { %2516 = vmatprep.mubr.msk.bf16.mxu1 %vm462_vm3, %v2188_v16  ;;  %2620 = vmatprep.mubr.msk.bf16.mxu0 %vm462_vm3, %v3281_v30  ;;  %v3313_v16 = vld [vmem:[%s3641_s1 + $0xe0] sm:$0xff]   ;;  %v2208_v57 = vrot.slane %v2974_v8, 9  ;;  %v3326_v10 = vcombine.low %v2995_v22, %v3004_v25  ;;  %v3328_v52 = vcombine.low %v825_v51, %v828_v48  ;;  %v1366_v59 = vrot.slane %v3306_v50, 5 }
  0x42   : > { %v835_v44 = vsel %vm3099_vm6, %v833_v46, %v834_v38  ;;  %2634 = vmatprep.subr.bf16.mxu0 %v2869_v18  ;;  %v782_v60 = vrot.slane %v2977_v9, 5  ;;  %v3340_v26 = vcombine.low %v3023_v41, %v3030_v45  ;;  %v1365_v8 = vrot.slane %v1363_v20, 4 }
  0x43   : > { %v1675_v22 = vshrl.u32 %v3316_v54, 16  ;;  %v3343_v25 = vcombine.low %v832_v43, %v835_v44  ;;  %v1678_v9 = vshll.u32 %v3316_v54, 16  ;;  %v1688_v15 = vshrl.u32 %v3336_v61, 16 }
  0x44   : > { %2635 = vmatpush3.bf16.msra.mxu0 %v2869_v18  ;;  %v3347_v21 = vsel %vm3099_vm6, %v2208_v57, %v782_v60  ;;  %v784_v42 = vrot.slane %v782_v60, 4  ;;  %v1364_v45 = vsel %vm3099_vm6, %v2286_v39, %v1363_v20  ;;  %v1367_v13 = vsel %vm3099_vm6, %v1365_v8, %v1366_v59  ;;  %v2876_v8 = vld [vmem:[%s3641_s1 + $0x58] sm:$0xff]  }
  0x45   : > { %2652 = vmatprep.subr.bf16.mxu0 %v3313_v16  ;;  %v1677_v37 = vrot.slane %v1675_v22, 4  ;;  %v1680_v38 = vrot.slane %v1678_v9, 5  ;;  %v3377_v18 = vcombine.low %v3051_v2, %v3056_v12  ;;  %v1684_v51 = vshll.u32 %v3336_v61, 16  ;;  %v2879_v9 = vld [vmem:[%s3641_s1 + $0x60] sm:$0xff]  }
  0x46   : > { %v3358_v41 = vsel %vm3099_vm6, %v784_v42, %v785_v53  ;;  %v1690_v48 = vrot.slane %v1688_v15, 4  ;;  %v1694_v46 = vshll.u32 %v201_v31, 16  ;;  %v3380_v20 = vcombine.low %v1364_v45, %v1367_v13  ;;  %v2877_v13 = vld [vmem:[%s3641_s1 + $0xe8] sm:$0xff]  }
  0x47   : > { %2621 = vmatmul.mubr.msk.bf16.gmra.mrb[8].mxu0 %vm462_vm3, %v3328_v52  ;;  %v2224_v27 = vcombine.low %v3347_v21, %v3358_v41  ;;  %v1681_v53 = vor.u32 %v1680_v38, %v1677_v37  ;;  %v2350_v43 = vrot.slane %v3316_v54, 9  ;;  %v1853_v44 = vrot.slane %v3336_v61, 5  ;;  %v2888_v37 = vld [vmem:[%s3641_s1 + $0x108] sm:$0xff]  }
  0x48   : > { %2517 = vmatmul.mubr.msk.bf16.vlgmr.msra.gmra.mrb[0].mxu1 %vm462_vm3, %v3326_v10  ;;  %2624 = vmatprep.mubr.msk.bf16.mxu0 %vm462_vm3, %v3343_v25  ;;  %v3386_v39 = vcombine.low %v3067_v28, %v3072_v33  ;;  %v1686_v57 = vrot.slane %v1684_v51, 5  ;;  %v1856_v59 = vrot.slane %v201_v31, 5  ;;  %v1696_v21 = vrot.slane %v1694_v46, 5 }
  0x49   : > { %2533 = vmatpush3.bf16.msra.mxu1 %v3182_v6  ;;  %2520 = vmatprep.mubr.msk.bf16.mxu1 %vm462_vm3, %v3340_v26  ;;  %v2872_v6 = vld [vmem:[%s3641_s1 + $0x50] sm:$0xff]   ;;  %v1682_v2 = vrot.slane %v1681_v53, 4  ;;  %v3390_v12 = vsel %vm3099_vm6, %v2350_v43, %v1853_v44  ;;  %v1855_v60 = vrot.slane %v1853_v44, 4  ;;  %v3418_v15 = vcombine.low %v3113_v11, %v3116_v14  ;;  %v2890_v44 = vld [vmem:[%s3641_s1 + $0x118] sm:$0xff]  }
  0x4a   : > { %2534 = vmatprep.subr.bf16.mxu1 %v2868_v58  ;;  %v1691_v22 = vor.u32 %v1690_v48, %v1686_v57  ;;  %v3424_v45 = vcombine.low %v3137_v32, %v3144_v40  ;;  %v2880_v11 = vld [vmem:[%s3641_s1 + $0xf0] sm:$0xff]   ;;  %v3443_v14 = vcombine.low %v3192_v0, %v3195_v19  ;;  %v2883_v32 = vld [vmem:[%s3641_s1 + $0xf8] sm:$0xff]   ;;  %v2886_v40 = vld [vmem:[%s3641_s1 + $0x100] sm:$0xff]   ;;  %v3463_v19 = vcombine.low %v3293_v47, %v3267_v4 }
  0x4b   : > { %v1687_v28 = vsel %vm3013_vm2, %v1682_v2, %v1686_v57  ;;  %v3403_v33 = vsel %vm3099_vm6, %v1855_v60, %v1856_v59  ;;  %v2881_v0 = vld [vmem:[%s3641_s1 + $0x68] sm:$0xff]   ;;  %v1194_v31 = vshll.u32 %v3267_v4, 16  ;;  %v1204_v46 = vshll.u32 %v3306_v50, 16 }
  0x4c   : > { %v2359_v42 = vcombine.low %v3390_v12, %v3403_v33 }
  0x4d   : > { %2535 = vmatpush3.bf16.msra.mxu1 %v2868_v58  ;;  %v1692_v58 = vrot.slane %v1691_v22, 4  ;;  %v1206_v43 = vrot.slane %v1204_v46, 5 }
  0x4e   : > { %2536 = vmatprep.subr.bf16.mxu1 %v2872_v6 }
  0x4f   : > { %2625 = vmatmul.mubr.msk.bf16.gmra.mrb[12].mxu0 %vm462_vm3, %v3380_v20  ;;  %v1697_v56 = vsel %vm3013_vm2, %v1692_v58, %v1696_v21 }
  0x50   : > { %2521 = vmatmul.mubr.msk.bf16.gmra.mrb[4].mxu1 %vm462_vm3, %v3377_v18  ;;  %2636 = vmatprep.mubr.msk.bf16.mxu0 %vm462_vm3, %v3340_v26  ;;  %v3420_v41 = vcombine.low %v1687_v28, %v1697_v56 }
  0x51   : > { %2524 = vmatprep.mubr.msk.bf16.mxu1 %vm462_vm3, %v3386_v39  ;;  %2537 = vmatpush3.bf16.msra.mxu1 %v2872_v6  ;;  %v1198_v6 = vshrl.u32 %v3267_v4, 16 }
  0x52   : > { %2538 = vmatprep.subr.bf16.mxu1 %v2876_v8 }
  0x53   : > { %v1200_v48 = vrot.slane %v1198_v6, 4 }
  0x55   : > { %2539 = vmatpush3.bf16.msra.mxu1 %v2876_v8 }
  0x56   : > { %2556 = vmatprep.subr.bf16.mxu1 %v2879_v9 }
  0x57   : > { %2637 = vmatmul.mubr.msk.bf16.vlgmr.msra.gmra.mrb[0].mxu0 %vm462_vm3, %v3377_v18 }
  0x58   : > { %2525 = vmatmul.mubr.msk.bf16.gmra.mrb[8].mxu1 %vm462_vm3, %v3418_v15  ;;  %2653 = vmatpush3.bf16.msra.mxu0 %v3313_v16  ;;  %v2885_v16 = vld [vmem:[%s3641_s1 + $0x70] sm:$0xff]  }
  0x59   : > { %2528 = vmatprep.mubr.msk.bf16.mxu1 %vm462_vm3, %v3424_v45  ;;  %2640 = vmatprep.mubr.msk.bf16.mxu0 %vm462_vm3, %v3386_v39 }
  0x5a   : > { %2654 = vmatprep.subr.bf16.mxu0 %v2877_v13 }
  0x5c   : > { %2655 = vmatpush3.bf16.msra.mxu0 %v2877_v13 }
  0x5d   : > { %2656 = vmatprep.subr.bf16.mxu0 %v2880_v11 }
  0x5f   : > { %2641 = vmatmul.mubr.msk.bf16.gmra.mrb[4].mxu0 %vm462_vm3, %v3418_v15 }
  0x60   : > { %2529 = vmatmul.mubr.msk.bf16.gmra.mrb[12].mxu1 %vm462_vm3, %v3443_v14  ;;  %2644 = vmatprep.mubr.msk.bf16.mxu0 %vm462_vm3, %v3424_v45 }
  0x61   : > { %2540 = vmatprep.mubr.msk.bf16.mxu1 %vm462_vm3, %v2224_v27  ;;  %2657 = vmatpush3.bf16.msra.mxu0 %v2880_v11  ;;  %v2316_v27 = vcombine.low %v3316_v54, %v3336_v61  ;;  %v1185_v54 = vshrl.u32 %v3293_v47, 16  ;;  %v1188_v61 = vshll.u32 %v3293_v47, 16 }
  0x62   : > { %2658 = vmatprep.subr.bf16.mxu0 %v2883_v32 }
  0x63   : > { %v1187_v38 = vrot.slane %v1185_v54, 4  ;;  %v1190_v51 = vrot.slane %v1188_v61, 5 }
  0x65   : > { %2659 = vmatpush3.bf16.msra.mxu0 %v2883_v32  ;;  %v1191_v4 = vor.u32 %v1190_v51, %v1187_v38 }
  0x66   : > { %2676 = vmatprep.subr.bf16.mxu0 %v2886_v40 }
  0x67   : > { %2645 = vmatmul.mubr.msk.bf16.gmra.mrb[8].mxu0 %vm462_vm3, %v3443_v14  ;;  %v1192_v53 = vrot.slane %v1191_v4, 4 }
  0x68   : > { %2541 = vmatmul.mubr.msk.bf16.vlgmr.msra.gmra.mrb[0].mxu1 %vm462_vm3, %v3163_v36  ;;  %2648 = vmatprep.mubr.msk.bf16.mxu0 %vm462_vm3, %v3463_v19  ;;  %v2887_v36 = vld [vmem:[%s3641_s1 + $0x78] sm:$0xff]  }
  0x69   : > { %2557 = vmatpush3.bf16.msra.mxu1 %v2879_v9  ;;  %2544 = vmatprep.mubr.msk.bf16.mxu1 %vm462_vm3, %v3208_v35 }
  0x6a   : > { %2558 = vmatprep.subr.bf16.mxu1 %v2881_v0 }
  0x6d   : > { %2559 = vmatpush3.bf16.msra.mxu1 %v2881_v0 }
  0x6e   : > { %2560 = vmatprep.subr.bf16.mxu1 %v2885_v16 }
  0x6f   : > { %2649 = vmatmul.mubr.msk.bf16.gmra.mrb[12].mxu0 %vm462_vm3, %v2316_v27 }
  0x70   : > { %2545 = vmatmul.mubr.msk.bf16.gmra.mrb[4].mxu1 %vm462_vm3, %v3243_v23  ;;  %2660 = vmatprep.mubr.msk.bf16.mxu0 %vm462_vm3, %v3093_v49  ;;  %v1196_v49 = vrot.slane %v1194_v31, 5 }
  0x71   : > { %2548 = vmatprep.mubr.msk.bf16.mxu1 %vm462_vm3, %v3277_v17  ;;  %2561 = vmatpush3.bf16.msra.mxu1 %v2885_v16 }
  0x72   : > { %2562 = vmatprep.subr.bf16.mxu1 %v2887_v36  ;;  %v1201_v47 = vor.u32 %v1200_v48, %v1196_v49 }
  0x75   : > { %2563 = vmatpush3.bf16.msra.mxu1 %v2887_v36 }
  0x76   : > { %2700 = vmatprep.subr.bf16.mxu1 %v2935_v1  ;;  %v2889_v1 = vld [vmem:[%s3641_s1 + $0x110] sm:$0xff]  }
  0x77   : > { %2661 = vmatmul.mubr.msk.bf16.vlgmr.msra.gmra.mrb[0].mxu0 %vm462_vm3, %v3132_v24  ;;  %v1202_v24 = vrot.slane %v1201_v47, 4 }
  0x78   : > { %2549 = vmatmul.mubr.msk.bf16.gmra.mrb[8].mxu1 %vm462_vm3, %v3281_v30  ;;  %2677 = vmatpush3.bf16.msra.mxu0 %v2886_v40 }
  0x79   : > { %2552 = vmatprep.mubr.msk.bf16.mxu1 %vm462_vm3, %v3328_v52  ;;  %2664 = vmatprep.mubr.msk.bf16.mxu0 %vm462_vm3, %v3165_v55  ;;  %v1197_v55 = vsel %vm3013_vm2, %v1192_v53, %v1196_v49  ;;  %v1207_v50 = vsel %vm3013_vm2, %v1202_v24, %v1206_v43 }
  0x7a   : > { %2678 = vmatprep.subr.bf16.mxu0 %v2888_v37  ;;  %v2273_v57 = vcombine.low %v1197_v55, %v1207_v50 }
  0x7c   : > { %2679 = vmatpush3.bf16.msra.mxu0 %v2888_v37 }
  0x7d   : > { %2680 = vmatprep.subr.bf16.mxu0 %v2889_v1 }
  0x7f   : > { %2665 = vmatmul.mubr.msk.bf16.gmra.mrb[4].mxu0 %vm462_vm3, %v3217_v63 }
  0x80   : > { %2553 = vmatmul.mubr.msk.bf16.gmra.mrb[12].mxu1 %vm462_vm3, %v3343_v25  ;;  %2668 = vmatprep.mubr.msk.bf16.mxu0 %vm462_vm3, %v3241_v34 }
  0x81   : > { %2564 = vmatprep.mubr.msk.bf16.mxu1 %vm462_vm3, %v3326_v10  ;;  %2681 = vmatpush3.bf16.msra.mxu0 %v2889_v1  ;;  %v2891_v10 = vld [vmem:[%s3641_s1 + $0x80] sm:$0xff]  }
  0x82   : > { %2682 = vmatprep.subr.bf16.mxu0 %v2890_v44 }
  0x85   : > { %2683 = vmatpush3.bf16.msra.mxu0 %v2890_v44 }
  0x87   : > { %2669 = vmatmul.mubr.msk.bf16.gmra.mrb[8].mxu0 %vm462_vm3, %v3275_v62 }
  0x88   : > { %2565 = vmatmul.mubr.msk.bf16.vlgmr.msra.gmra.mrb[0].mxu1 %vm462_vm3, %v3340_v26  ;;  %2672 = vmatprep.mubr.msk.bf16.mxu0 %vm462_vm3, %v2273_v57 }
  0x89   : > { %2704 = vmatpush3.bf16.msra.mxu1 %v2891_v10  ;;  %2568 = vmatprep.mubr.msk.bf16.mxu1 %vm462_vm3, %v3377_v18 }
  0x8a   : > { %2701 = vmatprep.subr.bf16.mxu1 %v2946_v3 }
  0x8d   : > { %2705 = vmatpush3.bf16.msra.mxu1 %v2892_v29 }
  0x8e   : > { %2702 = vmatprep.subr.bf16.mxu1 %v2957_v5 }
  0x8f   : > { %2673 = vmatmul.mubr.msk.bf16.gmra.mrb[12].mxu0 %vm462_vm3, %v3420_v41 }
  0x90   : > { %2569 = vmatmul.mubr.msk.bf16.gmra.mrb[4].mxu1 %vm462_vm3, %v3386_v39  ;;  %2684 = vmatprep.mubr.msk.bf16.mxu0 %vm462_vm3, %v3208_v35 }
  0x91   : > { %2572 = vmatprep.mubr.msk.bf16.mxu1 %vm462_vm3, %v3418_v15  ;;  %2706 = vmatpush3.bf16.msra.mxu1 %v2957_v5 }
  0x92   : > { %2703 = vmatprep.subr.bf16.mxu1 %v2970_v7 }
  0x95   : > { %2707 = vmatpush3.bf16.msra.mxu1 %v2970_v7 }
  0x97   : > { %2685 = vmatmul.mubr.msk.bf16.vlgmr.msra.gmra.mrb[0].mxu0 %vm462_vm3, %v3243_v23 }
  0x98   : > { %2573 = vmatmul.mubr.msk.bf16.gmra.mrb[8].mxu1 %vm462_vm3, %v3424_v45  ;;  %2688 = vmatprep.mubr.msk.bf16.mxu0 %vm462_vm3, %v3277_v17 }
  0x99   : > { %2576 = vmatprep.mubr.msk.bf16.mxu1 %vm462_vm3, %v3443_v14 }
  0x9f   : > { %2689 = vmatmul.mubr.msk.bf16.gmra.mrb[4].mxu0 %vm462_vm3, %v3281_v30  ;;  %v3581_v30 = vld [vmem:[%s3642_s2] ss:$0 sm:$0xff] }
  0xa0   : > { %2577 = vmatmul.mubr.msk.bf16.gmra.mrb[12].mxu1 %vm462_vm3, %v3463_v19  ;;  %2692 = vmatprep.mubr.msk.bf16.mxu0 %vm462_vm3, %v3328_v52 }
  0xa1   : > { %2596 = vmatprep.mubr.msk.bf16.mxu1 %vm462_vm3, %v3217_v63 }
  0xa7   : > { %2693 = vmatmul.mubr.msk.bf16.gmra.mrb[8].mxu0 %vm462_vm3, %v3343_v25 }
  0xa8   : > { %2597 = vmatmul.mubr.msk.bf16.vlgmr.msra.gmra.mrb[8].mxu1 %vm462_vm3, %v3241_v34  ;;  %2696 = vmatprep.mubr.msk.bf16.mxu0 %vm462_vm3, %v3380_v20 }
  0xa9   : > { %2600 = vmatprep.mubr.msk.bf16.mxu1 %vm462_vm3, %v3275_v62 }
  0xaf   : > { %2697 = vmatmul.mubr.msk.bf16.gmra.mrb[12].mxu0 %vm462_vm3, %v2359_v42 }
  0xb0   : > { %2601 = vmatmul.mubr.msk.bf16.gmra.mrb[12].mxu1 %vm462_vm3, %v2273_v57 }
 0x15b   : > { %v2566_v3 = vpop.f32.mrb[0].mxu1 }
 0x15c   : > { %v1105_v5 = vpop.f32.mrb[1].mxu1 }
 0x15d   : > { %v2567_v7 = vpop.f32.mrb[2].mxu1 }
 0x15e   : > { %v1108_v35 = vpop.f32.mrb[3].mxu1 }
 0x163   : > { %v2570_v63 = vpop.f32.mrb[4].mxu1 }
 0x164   : > { %v1121_v34 = vpop.f32.mrb[5].mxu1 }
 0x165   : > { %v2571_v23 = vpop.f32.mrb[6].mxu1 }
 0x166   : > { %v1124_v17 = vpop.f32.mrb[7].mxu1 }
 0x16a   : > { %v2686_v62 = vpop.f32.mrb[0].mxu0 }
 0x16b   : > { %v2708_v52 = vadd.f32 %v2686_v62, %v2566_v3  ;;  %v1931_v26 = vpop.f32.mrb[1].mxu0 }
 0x16c   : > { %v2709_v25 = vadd.f32 %v1931_v26, %v1105_v5  ;;  %v2687_v18 = vpop.f32.mrb[2].mxu0 }
 0x16d   : > { %v2019_v20 = vadd.f32 %v2708_v52, %v3581_v30  ;;  %v2710_v39 = vadd.f32 %v2687_v18, %v2567_v7  ;;  %v1934_v59 = vpop.f32.mrb[3].mxu0 }
 0x16e   : > { %v2017_v2 = vadd.f32 %v2709_v25, %v3581_v30  ;;  %v2711_v12 = vadd.f32 %v1934_v59, %v1108_v35 }
 0x16f   : > { %vm2035_vm7 = vcmp.ge.f32.partialorder %v2019_v20, 0.0  ;;  %v2051_v60 = vmul.f32 0.01, %v2019_v20  ;;  %v2020_v8 = vadd.f32 %v2710_v39, %v3581_v30 }
 0x170   : > { %vm2033_vm8 = vcmp.ge.f32.partialorder %v2017_v2, 0.0  ;;  %v2049_v22 = vmul.f32 0.01, %v2017_v2  ;;  %v2018_v21 = vadd.f32 %v2711_v12, %v3581_v30 }
 0x171   : > { %v2067_v28 = vsel %vm2035_vm7, %v2019_v20, %v2051_v60  ;;  %vm2036_vm9 = vcmp.ge.f32.partialorder %v2020_v8, 0.0  ;;  %v2052_v33 = vmul.f32 0.01, %v2020_v8 }
 0x172   : > { %2083 = vst.msk [vmem:[%s3589_s24 + $0x10] sm:$0xff] %vm462_vm3, %v2067_v28  ;;  %v2065_v58 = vsel %vm2033_vm8, %v2017_v2, %v2049_v22  ;;  %vm2034_vm10 = vcmp.ge.f32.partialorder %v2018_v21, 0.0  ;;  %v2050_v42 = vmul.f32 0.01, %v2018_v21  ;;  %v2690_v9 = vpop.f32.mrb[4].mxu0 }
 0x173   : > { %2081 = vst.msk [vmem:[%s3589_s24] sm:$0xff] %vm462_vm3, %v2065_v58  ;;  %v2068_v56 = vsel %vm2036_vm9, %v2020_v8, %v2052_v33  ;;  %v2712_v15 = vadd.f32 %v2690_v9, %v2570_v63  ;;  %v1947_v41 = vpop.f32.mrb[5].mxu0 }
 0x174   : > { %2084 = vst.msk [vmem:[%s3589_s24 + $0x18] sm:$0xff] %vm462_vm3, %v2068_v56  ;;  %v2066_v45 = vsel %vm2034_vm10, %v2018_v21, %v2050_v42  ;;  %v2713_v13 = vadd.f32 %v1947_v41, %v1121_v34  ;;  %v2691_v11 = vpop.f32.mrb[6].mxu0 }
 0x175   : > { %2082 = vst.msk [vmem:[%s3589_s24 + $0x8] sm:$0xff] %vm462_vm3, %v2066_v45  ;;  %v2023_v14 = vadd.f32 %v2712_v15, %v3581_v30  ;;  %v2714_v32 = vadd.f32 %v2691_v11, %v2571_v23  ;;  %v1950_v40 = vpop.f32.mrb[7].mxu0 }
 0x176   : > { %v2021_v0 = vadd.f32 %v2713_v13, %v3581_v30  ;;  %v2715_v19 = vadd.f32 %v1950_v40, %v1124_v17 }
 0x177   : > { %vm2039_vm11 = vcmp.ge.f32.partialorder %v2023_v14, 0.0  ;;  %v2055_v16 = vmul.f32 0.01, %v2023_v14  ;;  %v2024_v27 = vadd.f32 %v2714_v32, %v3581_v30 }
 0x178   : > { %vm2037_vm12 = vcmp.ge.f32.partialorder %v2021_v0, 0.0  ;;  %v2053_v36 = vmul.f32 0.01, %v2021_v0  ;;  %v2022_v54 = vadd.f32 %v2715_v19, %v3581_v30 }
 0x179   : > { %v2071_v61 = vsel %vm2039_vm11, %v2023_v14, %v2055_v16  ;;  %vm2040_vm13 = vcmp.ge.f32.partialorder %v2024_v27, 0.0  ;;  %v2056_v31 = vmul.f32 0.01, %v2024_v27 }
 0x17a   : > { %2087 = vst.msk [vmem:[%s3589_s24 + $0x30] sm:$0xff] %vm462_vm3, %v2071_v61  ;;  %v2069_v6 = vsel %vm2037_vm12, %v2021_v0, %v2053_v36  ;;  %vm2038_vm14 = vcmp.ge.f32.partialorder %v2022_v54, 0.0  ;;  %v2054_v37 = vmul.f32 0.01, %v2022_v54  ;;  %v2694_v51 = vpop.f32.mrb[8].mxu0 }
 0x17b   : > { %v2598_v38 = vpop.f32.mrb[8].mxu1  ;;  %2085 = vst.msk [vmem:[%s3589_s24 + $0x20] sm:$0xff] %vm462_vm3, %v2069_v6  ;;  %v2072_v49 = vsel %vm2040_vm13, %v2024_v27, %v2056_v31  ;;  %v1963_v4 = vpop.f32.mrb[9].mxu0 }
 0x17c   : > { %v2716_v48 = vadd.f32 %v2694_v51, %v2598_v38  ;;  %v1313_v1 = vpop.f32.mrb[9].mxu1  ;;  %2088 = vst.msk [vmem:[%s3589_s24 + $0x38] sm:$0xff] %vm462_vm3, %v2072_v49  ;;  %v2070_v47 = vsel %vm2038_vm14, %v2022_v54, %v2054_v37  ;;  %v2695_v24 = vpop.f32.mrb[10].mxu0 }
 0x17d   : > { %v2717_v46 = vadd.f32 %v1963_v4, %v1313_v1  ;;  %v2599_v53 = vpop.f32.mrb[10].mxu1  ;;  %2086 = vst.msk [vmem:[%s3589_s24 + $0x28] sm:$0xff] %vm462_vm3, %v2070_v47  ;;  %v1966_v50 = vpop.f32.mrb[11].mxu0 }
 0x17e   : > { %v2027_v43 = vadd.f32 %v2716_v48, %v3581_v30  ;;  %v2718_v44 = vadd.f32 %v2695_v24, %v2599_v53  ;;  %v1316_v55 = vpop.f32.mrb[11].mxu1 }
 0x17f   : > { %v2025_v57 = vadd.f32 %v2717_v46, %v3581_v30  ;;  %v2719_v10 = vadd.f32 %v1966_v50, %v1316_v55 }
 0x180   : > { %vm2043_vm15 = vcmp.ge.f32.partialorder %v2027_v43, 0.0  ;;  %v2059_v29 = vmul.f32 0.01, %v2027_v43  ;;  %v2028_v3 = vadd.f32 %v2718_v44, %v3581_v30 }
 0x181   : > { %vm2041_vm0 = vcmp.ge.f32.partialorder %v2025_v57, 0.0  ;;  %v2057_v5 = vmul.f32 0.01, %v2025_v57  ;;  %v2026_v7 = vadd.f32 %v2719_v10, %v3581_v30 }
 0x182   : > { %v2075_v35 = vsel %vm2043_vm15, %v2027_v43, %v2059_v29  ;;  %vm2044_vm1 = vcmp.ge.f32.partialorder %v2028_v3, 0.0  ;;  %v2060_v63 = vmul.f32 0.01, %v2028_v3  ;;  %v2698_v62 = vpop.f32.mrb[12].mxu0 }
 0x183   : > { %2091 = vst.msk [vmem:[%s3589_s24 + $0x50] sm:$0xff] %vm462_vm3, %v2075_v35  ;;  %v2073_v34 = vsel %vm2041_vm0, %v2025_v57, %v2057_v5  ;;  %vm2042_vm2 = vcmp.ge.f32.partialorder %v2026_v7, 0.0  ;;  %v2058_v23 = vmul.f32 0.01, %v2026_v7  ;;  %v2602_v17 = vpop.f32.mrb[12].mxu1  ;;  %v1979_v18 = vpop.f32.mrb[13].mxu0 }
 0x184   : > { %2089 = vst.msk [vmem:[%s3589_s24 + $0x40] sm:$0xff] %vm462_vm3, %v2073_v34  ;;  %v2076_v52 = vsel %vm2044_vm1, %v2028_v3, %v2060_v63  ;;  %v2720_v26 = vadd.f32 %v2698_v62, %v2602_v17  ;;  %v1329_v25 = vpop.f32.mrb[13].mxu1  ;;  %v2699_v2 = vpop.f32.mrb[14].mxu0 }
 0x185   : > { %2092 = vst.msk [vmem:[%s3589_s24 + $0x58] sm:$0xff] %vm462_vm3, %v2076_v52  ;;  %v2074_v20 = vsel %vm2042_vm2, %v2026_v7, %v2058_v23  ;;  %v2721_v39 = vadd.f32 %v1979_v18, %v1329_v25  ;;  %v2603_v59 = vpop.f32.mrb[14].mxu1  ;;  %v1982_v22 = vpop.f32.mrb[15].mxu0 }
 0x186   : > { %2090 = vst.msk [vmem:[%s3589_s24 + $0x48] sm:$0xff] %vm462_vm3, %v2074_v20  ;;  %v2031_v12 = vadd.f32 %v2720_v26, %v3581_v30  ;;  %v2722_v60 = vadd.f32 %v2699_v2, %v2603_v59  ;;  %v1332_v8 = vpop.f32.mrb[15].mxu1 }
 0x187   : > { %v2029_v21 = vadd.f32 %v2721_v39, %v3581_v30  ;;  %v2723_v28 = vadd.f32 %v1982_v22, %v1332_v8 }
 0x188   : > { %vm2047_vm4 = vcmp.ge.f32.partialorder %v2031_v12, 0.0  ;;  %v2063_v33 = vmul.f32 0.01, %v2031_v12  ;;  %v2032_v58 = vadd.f32 %v2722_v60, %v3581_v30 }
 0x189   : > { %vm2045_vm5 = vcmp.ge.f32.partialorder %v2029_v21, 0.0  ;;  %v2061_v42 = vmul.f32 0.01, %v2029_v21  ;;  %v2030_v9 = vadd.f32 %v2723_v28, %v3581_v30 }
 0x18a   : > { %v2079_v56 = vsel %vm2047_vm4, %v2031_v12, %v2063_v33  ;;  %vm2048_vm6 = vcmp.ge.f32.partialorder %v2032_v58, 0.0  ;;  %v2064_v15 = vmul.f32 0.01, %v2032_v58 }
 0x18b   : > { %2095 = vst.msk [vmem:[%s3589_s24 + $0x70] sm:$0xff] %vm462_vm3, %v2079_v56  ;;  %v2077_v41 = vsel %vm2045_vm5, %v2029_v21, %v2061_v42  ;;  %vm2046_vm7 = vcmp.ge.f32.partialorder %v2030_v9, 0.0  ;;  %v2062_v45 = vmul.f32 0.01, %v2030_v9 }
 0x18c   : > { %2093 = vst.msk [vmem:[%s3589_s24 + $0x60] sm:$0xff] %vm462_vm3, %v2077_v41  ;;  %v2080_v13 = vsel %vm2048_vm6, %v2032_v58, %v2064_v15 }
 0x18d   : > { %2096 = vst.msk [vmem:[%s3589_s24 + $0x78] sm:$0xff] %vm462_vm3, %v2080_v13  ;;  %v2078_v11 = vsel %vm2046_vm7, %v2030_v9, %v2062_v45 }
 0x18e   : > { %2094 = vst.msk [vmem:[%s3589_s24 + $0x68] sm:$0xff] %vm462_vm3, %v2078_v11 }
 0x18f PF: > { %s13_s12 = sadd.s32 1, %s2899_s12  }
 0x190   : > { %p10_p4 = scmp.ge.s32.totalorder %s13_s12, 6  }
 0x192   :  { %12 = sbr.rel (!%p10_p4) target bundleno = 1 (0x1), region = 70 }

// kernel: ex_net_forward.10
= control target key start
LH: loop header
LB: loop body
LE: loop exit
PB: predicated region body
PF: predicated region fallthrough
CT: control target
= control target key end

     0   :  { %s1659_s12 = smov 0   ;;  %s1937_s0 = inlined_call_operand.vmem [shape: bf16[4,6,10,64], index: 0, kind: input, shape index: {}]   ;;  %s1938_s1 = inlined_call_operand.vmem [shape: bf16[9,64,128], index: 1, kind: input, shape index: {}]   ;;  %s1939_s2 = inlined_call_operand.vmem [shape: f32[1,128], index: 2, kind: input, shape index: {}]   ;;  %s1940_s3 = inlined_call_operand.vmem [shape: f32[4,32,128], index: 3, kind: output, shape index: {}]  }
   0x1 LB: > { %s1236_s13 = sadd.s32 4294967295, %s1637_s12   ;;  %p1240_p0 = scmp.ge.s32.totalorder %s1637_s12, 1  ;;  %s1637_s12 = sphi %s1659_s12, %s13_s12  }
   0x2   : > { %p137_p1 = scmp.lt.s32.totalorder %s1637_s12, 5 }
   0x4   : > { %p138_p2 = pnand %p1240_p0, %p137_p1 }
   0x5   : > { %v1590_v0 = vld [vmem:[%s1938_s1 + $0x20] sm:$0xff] (!%p138_p2)   ;;  %p161_p3 = scmp.lt.s32.totalorder (!%p138_p2), %s1236_s13, 3  ;;  %v1592_v2 = vld [vmem:[%s1938_s1 + $0x28] sm:$0xff] (!%p138_p2)   ;;  %v1594_v4 = vld [vmem:[%s1938_s1 + $0x30] sm:$0xff] (!%p138_p2)   ;;  %vm192_vm0 = vsmask.f32 (!%p138_p2), 3328 }
   0x6   : > { %141 = sbr.rel (%p138_p2) target bundleno = 324 (0x144), region = 32  ;;  %v1591_v1 = vld [vmem:[%s1938_s1 + $0x80] sm:$0xff] (!%p138_p2)   ;;  %1441 = vmatprep.subr.bf16.mxu1 (!%p138_p2), %v1590_v0  ;;  %v1593_v3 = vld [vmem:[%s1938_s1 + $0x88] sm:$0xff] (!%p138_p2)   ;;  %v1595_v5 = vld [vmem:[%s1938_s1 + $0x90] sm:$0xff] (!%p138_p2)   ;;  %vm193_vm1 = vsmask.f32 (!%p138_p2), 7440 }
   0x7   : > { %1489 = vmatprep.subr.bf16.mxu0 (!%p138_p2), %v1591_v1  ;;  %1442 = vmatpush3.bf16.msra.mxu1 (!%p138_p2), %v1590_v0  ;;  %v1596_v6 = vld [vmem:[%s1938_s1 + $0x38] sm:$0xff] (!%p138_p2)   ;;  %v1720_v21 = vld [vmem:[%s1938_s1] sm:$0xff] (!%p138_p2)   ;;  %vm1741_vm2 = vmor (!%p138_p2), %vm192_vm0, %vm193_vm1  ;;  %vm290_vm3 = vcmask (!%p138_p2), 523264   ;;  %vm439_vm4 = vcmask (!%p138_p2), 1042432   ;;  %vm440_vm5 = vcmask (!%p138_p2), 1046532  }
   0x8   : > { %1490 = vmatpush3.bf16.msra.mxu0 (!%p138_p2), %v1591_v1  ;;  %1443 = vmatprep.subr.bf16.mxu1 (!%p138_p2), %v1592_v2  ;;  %v1597_v10 = vld [vmem:[%s1938_s1 + $0x98] sm:$0xff] (!%p138_p2)   ;;  %v1731_v25 = vld [vmem:[%s1938_s1 + $0xa0] sm:$0xff] (!%p138_p2)   ;;  %vm1781_vm6 = vmor (!%p138_p2), %vm439_vm4, %vm440_vm5 }
   0x9   : > { %1491 = vmatprep.subr.bf16.mxu0 (!%p138_p2), %v1593_v3  ;;  %v1629_v30 = vld [vmem:[%s1938_s1 + $0x110] sm:$0xff] (!%p138_p2)  }
   0xb   : > { %1444 = vmatpush3.bf16.msra.mxu1 (!%p138_p2), %v1592_v2 }
   0xc   : > { %1492 = vmatpush3.bf16.msra.mxu0 (!%p138_p2), %v1593_v3  ;;  %1445 = vmatprep.subr.bf16.mxu1 (!%p138_p2), %v1594_v4 }
   0xd   : > { %s1946_s13 = smov (!%p161_p3, %s1236_s13), 3  ;;  %1493 = vmatprep.subr.bf16.mxu0 %v1595_v5 }
   0xe   : > { %s1581_s24 = smul.u32 48, %s1946_s13  ;;  %s1386_s18 = sshll.u32 %s1946_s13, 5 }
   0xf   : > { %1446 = vmatpush3.bf16.msra.mxu1 %v1594_v4  ;;  %s170_s21 = scalar_lea.vmem %s1940_s3, %s1386_s18 }
  0x10   : > { %s1691_s29 = scalar_lea.vmem %s1937_s0, %s1581_s24  ;;  %1494 = vmatpush3.bf16.msra.mxu0 %v1595_v5  ;;  %1447 = vmatprep.subr.bf16.mxu1 %v1596_v6 }
  0x11   : > { %v1697_v7 = vld [vmem:[%s1691_s29] sm:$0xf]  ;;  %v1700_v8 = vld [vmem:[%s1691_s29 + $0x4] sm:$0x1]  ;;  %v1703_v9 = vld [vmem:[%s1691_s29 + $0x8] sm:$0xf]  ;;  %1495 = vmatprep.subr.bf16.mxu0 %v1597_v10 }
  0x12   : > { %v1709_v11 = vld [vmem:[%s1691_s29 + $0xc] sm:$0x1]  ;;  %v196_v12 = vshrl.u32 %v1697_v7, 16  ;;  %v199_v13 = vshll.u32 %v1697_v7, 16  ;;  %v205_v14 = vshll.u32 %v1700_v8, 16  ;;  %v210_v15 = vshrl.u32 %v1703_v9, 16 }
  0x13   : > { %v213_v16 = vshll.u32 %v1703_v9, 16  ;;  %v219_v17 = vshll.u32 %v1709_v11, 16  ;;  %v1723_v23 = vld [vmem:[%s1691_s29 + $0x10] sm:$0xf]  ;;  %v1726_v24 = vld [vmem:[%s1691_s29 + $0x14] sm:$0x1]  ;;  %1448 = vmatpush3.bf16.msra.mxu1 %v1596_v6  ;;  %v1260_v63 = vcombine.low %v1697_v7, %v1703_v9 }
  0x14   : > { %v198_v18 = vrot.slane %v196_v12, 4  ;;  %v201_v19 = vrot.slane %v199_v13, 5  ;;  %v212_v20 = vrot.slane %v210_v15, 4  ;;  %v207_v27 = vrot.slane %v205_v14, 5  ;;  %v1734_v28 = vld [vmem:[%s1691_s29 + $0x18] sm:$0xf]  ;;  %1496 = vmatpush3.bf16.msra.mxu0 %v1597_v10  ;;  %1453 = vmatprep.subr.bf16.mxu1 %v1720_v21 }
  0x15   : > { %v215_v22 = vrot.slane %v213_v16, 5  ;;  %v1737_v29 = vld [vmem:[%s1691_s29 + $0x1c] sm:$0x1]  ;;  %v221_v32 = vrot.slane %v219_v17, 5  ;;  %v1747_v34 = vld [vmem:[%s1691_s29 + $0x20] sm:$0xf]  ;;  %1501 = vmatprep.subr.bf16.mxu0 %v1731_v25 }
  0x16   : > { %v202_v26 = vor.u32 %v201_v19, %v198_v18  ;;  %v224_v35 = vshrl.u32 %v1723_v23, 16  ;;  %v227_v36 = vshll.u32 %v1723_v23, 16  ;;  %v233_v37 = vshll.u32 %v1726_v24, 16  ;;  %v1759_v43 = vld [vmem:[%s1691_s29 + $0x24] sm:$0x1]  ;;  %v1600_v6 = vld [vmem:[%s1938_s1 + $0x8] sm:$0xff]  }
  0x17   : > { %v216_v31 = vor.u32 %v215_v22, %v212_v20  ;;  %v238_v39 = vshrl.u32 %v1734_v28, 16  ;;  %v241_v40 = vshll.u32 %v1734_v28, 16  ;;  %v247_v41 = vshll.u32 %v1737_v29, 16  ;;  %v1601_v15 = vld [vmem:[%s1938_s1 + $0xa8] sm:$0xff]   ;;  %v1602_v17 = vld [vmem:[%s1938_s1 + $0x10] sm:$0xff]  }
  0x18   : > { %v203_v33 = vrot.slane %v202_v26, 4  ;;  %v226_v44 = vrot.slane %v224_v35, 4  ;;  %v229_v45 = vrot.slane %v227_v36, 5  ;;  %v235_v51 = vrot.slane %v233_v37, 5  ;;  %v1608_v37 = vld [vmem:[%s1938_s1 + $0xc0] sm:$0xff]  }
  0x19   : > { %v217_v38 = vrot.slane %v216_v31, 4  ;;  %v240_v47 = vrot.slane %v238_v39, 4  ;;  %v243_v48 = vrot.slane %v241_v40, 5  ;;  %v249_v52 = vrot.slane %v247_v41, 5  ;;  %v1611_v41 = vld [vmem:[%s1938_s1 + $0xc8] sm:$0xff]  }
  0x1a   : > { %v208_v42 = vsel %vm1741_vm2, %v203_v33, %v207_v27  ;;  %v230_v50 = vor.u32 %v229_v45, %v226_v44  ;;  %v653_v54 = vshrl.u32 %v1747_v34, 16  ;;  %v656_v55 = vshll.u32 %v1747_v34, 16  ;;  %v1614_v44 = vld [vmem:[%s1938_s1 + $0x58] sm:$0xff]  }
  0x1b   : > { %v222_v46 = vsel %vm1741_vm2, %v217_v38, %v221_v32  ;;  %v244_v53 = vor.u32 %v243_v48, %v240_v47  ;;  %v662_v56 = vshll.u32 %v1759_v43, 16  ;;  %v448_v61 = vrot.slane %v1709_v11, 5  ;;  %v1610_v38 = vld [vmem:[%s1938_s1 + $0x48] sm:$0xff]   ;;  %v1615_v45 = vld [vmem:[%s1938_s1 + $0xd8] sm:$0xff]  }
  0x1c   : > { %v1252_v49 = vcombine.low %v208_v42, %v222_v46  ;;  %v231_v57 = vrot.slane %v230_v50, 4  ;;  %v655_v59 = vrot.slane %v653_v54, 4  ;;  %v658_v60 = vrot.slane %v656_v55, 5  ;;  %v1612_v42 = vld [vmem:[%s1938_s1 + $0x50] sm:$0xff]   ;;  %v1867_v47 = vld [vmem:[%s1691_s29 + $0x28] sm:$0xf] }
  0x1d   : > { %v245_v58 = vrot.slane %v244_v53, 4  ;;  %v664_v2 = vrot.slane %v662_v56, 5  ;;  %v452_v5 = vrot.slane %v1726_v24, 5  ;;  %v1269_v12 = vrot.slane %v1703_v9, 9  ;;  %v1604_v24 = vld [vmem:[%s1938_s1 + $0x18] sm:$0xff]  }
  0x1e   : > { %1449 = vmatprep.mubr.msk.bf16.mxu1 %vm290_vm3, %v1252_v49  ;;  %v236_v62 = vsel %vm1741_vm2, %v231_v57, %v235_v51  ;;  %v659_v1 = vor.u32 %v658_v60, %v655_v59  ;;  %v1270_v13 = vrot.slane %v1723_v23, 9  ;;  %v444_v22 = vrot.slane %v1700_v8, 5  ;;  %v1617_v51 = vld [vmem:[%s1938_s1 + $0xe0] sm:$0xff]   ;;  %v183_v57 = vld [vmem:[%s1691_s29 + $0x2c] sm:$0x1]  ;;  %v1622_v60 = vld [vmem:[%s1938_s1 + $0xf0] sm:$0xff]  }
  0x1f   : > { %v250_v0 = vsel %vm1741_vm2, %v245_v58, %v249_v52  ;;  %v1312_v3 = vcombine.low %v222_v46, %v236_v62  ;;  %v449_v18 = vsel %vm1781_vm6, %v1269_v12, %v448_v61  ;;  %v456_v26 = vrot.slane %v1737_v29, 5  ;;  %v1607_v29 = vld [vmem:[%s1938_s1 + $0x40] sm:$0xff]   ;;  %v1619_v52 = vld [vmem:[%s1938_s1 + $0x68] sm:$0xff]   ;;  %v1623_v61 = vld [vmem:[%s1938_s1 + $0x78] sm:$0xff]  }
  0x20   : > { %v1774_v4 = vcombine.low %v236_v62, %v250_v0  ;;  %v660_v10 = vrot.slane %v659_v1, 4  ;;  %v453_v19 = vsel %vm1781_vm6, %v1270_v13, %v452_v5  ;;  %v764_v27 = vrot.slane %v1759_v43, 5  ;;  %v1613_v43 = vld [vmem:[%s1938_s1 + $0xd0] sm:$0xff]   ;;  %v1616_v46 = vld [vmem:[%s1938_s1 + $0x60] sm:$0xff]   ;;  %v1620_v58 = vld [vmem:[%s1938_s1 + $0xe8] sm:$0xff]  }
  0x21   : > { %1497 = vmatprep.mubr.msk.bf16.mxu0 %vm290_vm3, %v1312_v3  ;;  %v1329_v20 = vcombine.low %v449_v18, %v453_v19  ;;  %v1268_v31 = vrot.slane %v1697_v7, 9  ;;  %v1271_v8 = vrot.slane %v1734_v28, 9  ;;  %v1320_v32 = vrot.slane %v1747_v34, 9  ;;  %v1627_v3 = vld [vmem:[%s1938_s1 + $0x100] sm:$0xff]  }
  0x22   : > { %1450 = vmatmul.mubr.msk.bf16.vlgmr.msra.gmra.mrb[0].mxu1 %vm290_vm3, %v1774_v4  ;;  %v1791_v14 = vsel %vm1741_vm2, %v660_v10, %v664_v2  ;;  %v1261_v33 = vcombine.low %v1723_v23, %v1734_v28  ;;  %v954_v49 = vshrl.u32 %v1867_v47, 16  ;;  %v957_v50 = vshll.u32 %v1867_v47, 16 }
  0x23   : > { %1454 = vmatpush3.bf16.msra.mxu1 %v1720_v21  ;;  %1461 = vmatprep.mubr.msk.bf16.mxu1 %vm290_vm3, %v1260_v63  ;;  %v1313_v16 = vcombine.low %v250_v0, %v1791_v14  ;;  %v1603_v21 = vld [vmem:[%s1938_s1 + $0xb0] sm:$0xff]   ;;  %v445_v35 = vsel %vm1781_vm6, %v1268_v31, %v444_v22  ;;  %v457_v7 = vsel %vm1781_vm6, %v1271_v8, %v456_v26  ;;  %v963_v59 = vshll.u32 %v183_v57, 16  ;;  %v1624_v0 = vld [vmem:[%s1938_s1 + $0xf8] sm:$0xff]  }
  0x24   : > { %1455 = vmatprep.subr.bf16.mxu1 %v1600_v6  ;;  %v1835_v36 = vsel %vm1781_vm6, %v1320_v32, %v764_v27  ;;  %v1280_v39 = vcombine.low %v445_v35, %v449_v18  ;;  %v1281_v48 = vcombine.low %v453_v19, %v457_v7  ;;  %v1296_v53 = vcombine.low %v1703_v9, %v1723_v23  ;;  %v1621_v9 = vld [vmem:[%s1938_s1 + $0x70] sm:$0xff]   ;;  %v1383_v18 = vld [vmem:[%s1939_s2] ss:$0 sm:$0xff] }
  0x25   : > { %1498 = vmatmul.mubr.msk.bf16.vlgmr.msra.gmra.mrb[0].mxu0 %vm290_vm3, %v1313_v16  ;;  %v1330_v40 = vcombine.low %v457_v7, %v1835_v36  ;;  %v1345_v54 = vcombine.low %v1747_v34, %v1867_v47  ;;  %v956_v55 = vrot.slane %v954_v49, 4  ;;  %v959_v56 = vrot.slane %v957_v50, 5 }
  0x26   : > { %1502 = vmatpush3.bf16.msra.mxu0 %v1731_v25  ;;  %1509 = vmatprep.mubr.msk.bf16.mxu0 %vm290_vm3, %v1329_v20  ;;  %v1605_v25 = vld [vmem:[%s1938_s1 + $0xb8] sm:$0xff]   ;;  %v965_v63 = vrot.slane %v963_v59, 5  ;;  %v1297_v1 = vcombine.low %v1734_v28, %v1747_v34  ;;  %v1628_v28 = vld [vmem:[%s1938_s1 + $0x108] sm:$0xff]   ;;  %v1061_v34 = vrot.slane %v183_v57, 5  ;;  %v1367_v5 = vrot.slane %v1867_v47, 9 }
  0x27   : > { %1456 = vmatpush3.bf16.msra.mxu1 %v1600_v6  ;;  %1503 = vmatprep.subr.bf16.mxu0 %v1601_v15  ;;  %v960_v23 = vor.u32 %v959_v56, %v956_v55  ;;  %v1630_v6 = vld [vmem:[%s1938_s1 + $0x118] sm:$0xff]  }
  0x28   : > { %1457 = vmatprep.subr.bf16.mxu1 %v1602_v17  ;;  %v1062_v10 = vsel %vm1781_vm6, %v1367_v5, %v1061_v34 }
  0x29   : > { %v961_v62 = vrot.slane %v960_v23, 4  ;;  %v1376_v12 = vcombine.low %v1835_v36, %v1062_v10 }
  0x2a   : > { %1504 = vmatpush3.bf16.msra.mxu0 %v1601_v15 }
  0x2b   : > { %1458 = vmatpush3.bf16.msra.mxu1 %v1602_v17  ;;  %1505 = vmatprep.subr.bf16.mxu0 %v1603_v21  ;;  %v966_v2 = vsel %vm1741_vm2, %v961_v62, %v965_v63 }
  0x2c   : > { %1459 = vmatprep.subr.bf16.mxu1 %v1604_v24 }
  0x2e   : > { %1506 = vmatpush3.bf16.msra.mxu0 %v1603_v21 }
  0x2f   : > { %1460 = vmatpush3.bf16.msra.mxu1 %v1604_v24  ;;  %1507 = vmatprep.subr.bf16.mxu0 %v1605_v25 }
  0x30   : > { %1465 = vmatprep.subr.bf16.mxu1 %v1607_v29 }
  0x32   : > { %1462 = vmatmul.mubr.msk.bf16.vlgmr.msra.gmra.mrb[0].mxu1 %vm290_vm3, %v1261_v33  ;;  %1508 = vmatpush3.bf16.msra.mxu0 %v1605_v25 }
  0x33   : > { %1466 = vmatpush3.bf16.msra.mxu1 %v1607_v29  ;;  %1513 = vmatprep.subr.bf16.mxu0 %v1608_v37 }
  0x34   : > { %1467 = vmatprep.subr.bf16.mxu1 %v1610_v38  ;;  %1473 = vmatprep.mubr.msk.bf16.mxu1 %vm290_vm3, %v1280_v39 }
  0x35   : > { %1510 = vmatmul.mubr.msk.bf16.vlgmr.msra.gmra.mrb[0].mxu0 %vm290_vm3, %v1330_v40 }
  0x36   : > { %1514 = vmatpush3.bf16.msra.mxu0 %v1608_v37  ;;  %1521 = vmatprep.mubr.msk.bf16.mxu0 %vm290_vm3, %v1261_v33 }
  0x37   : > { %1468 = vmatpush3.bf16.msra.mxu1 %v1610_v38  ;;  %1515 = vmatprep.subr.bf16.mxu0 %v1611_v41 }
  0x38   : > { %1469 = vmatprep.subr.bf16.mxu1 %v1612_v42 }
  0x3a   : > { %1516 = vmatpush3.bf16.msra.mxu0 %v1611_v41 }
  0x3b   : > { %1470 = vmatpush3.bf16.msra.mxu1 %v1612_v42  ;;  %1517 = vmatprep.subr.bf16.mxu0 %v1613_v43 }
  0x3c   : > { %1471 = vmatprep.subr.bf16.mxu1 %v1614_v44 }
  0x3e   : > { %1518 = vmatpush3.bf16.msra.mxu0 %v1613_v43 }
  0x3f   : > { %1472 = vmatpush3.bf16.msra.mxu1 %v1614_v44  ;;  %1519 = vmatprep.subr.bf16.mxu0 %v1615_v45 }
  0x40   : > { %1477 = vmatprep.subr.bf16.mxu1 %v1616_v46 }
  0x42   : > { %1474 = vmatmul.mubr.msk.bf16.vlgmr.msra.gmra.mrb[0].mxu1 %vm290_vm3, %v1281_v48  ;;  %1520 = vmatpush3.bf16.msra.mxu0 %v1615_v45 }
  0x43   : > { %1478 = vmatpush3.bf16.msra.mxu1 %v1616_v46  ;;  %1525 = vmatprep.subr.bf16.mxu0 %v1617_v51 }
  0x44   : > { %1479 = vmatprep.subr.bf16.mxu1 %v1619_v52  ;;  %1485 = vmatprep.mubr.msk.bf16.mxu1 %vm290_vm3, %v1296_v53 }
  0x45   : > { %1522 = vmatmul.mubr.msk.bf16.vlgmr.msra.gmra.mrb[0].mxu0 %vm290_vm3, %v1345_v54 }
  0x46   : > { %1526 = vmatpush3.bf16.msra.mxu0 %v1617_v51  ;;  %1533 = vmatprep.mubr.msk.bf16.mxu0 %vm290_vm3, %v1774_v4  ;;  %v1360_v4 = vcombine.low %v1791_v14, %v966_v2 }
  0x47   : > { %1480 = vmatpush3.bf16.msra.mxu1 %v1619_v52  ;;  %1527 = vmatprep.subr.bf16.mxu0 %v1620_v58 }
  0x48   : > { %1481 = vmatprep.subr.bf16.mxu1 %v1621_v9 }
  0x4a   : > { %1528 = vmatpush3.bf16.msra.mxu0 %v1620_v58 }
  0x4b   : > { %1482 = vmatpush3.bf16.msra.mxu1 %v1621_v9  ;;  %1529 = vmatprep.subr.bf16.mxu0 %v1622_v60 }
  0x4c   : > { %1483 = vmatprep.subr.bf16.mxu1 %v1623_v61 }
  0x4e   : > { %1530 = vmatpush3.bf16.msra.mxu0 %v1622_v60 }
  0x4f   : > { %1484 = vmatpush3.bf16.msra.mxu1 %v1623_v61  ;;  %1531 = vmatprep.subr.bf16.mxu0 %v1624_v0 }
  0x52   : > { %1486 = vmatmul.mubr.msk.bf16.vlgmr.msra.gmra.mrb[0].mxu1 %vm290_vm3, %v1297_v1  ;;  %1532 = vmatpush3.bf16.msra.mxu0 %v1624_v0 }
  0x53   : > { %1537 = vmatprep.subr.bf16.mxu0 %v1627_v3 }
  0x55   : > { %1534 = vmatmul.mubr.msk.bf16.vlgmr.msra.gmra.mrb[0].mxu0 %vm290_vm3, %v1360_v4 }
  0x56   : > { %1538 = vmatpush3.bf16.msra.mxu0 %v1627_v3  ;;  %1545 = vmatprep.mubr.msk.bf16.mxu0 %vm290_vm3, %v1281_v48 }
  0x57   : > { %1539 = vmatprep.subr.bf16.mxu0 %v1628_v28 }
  0x5a   : > { %1540 = vmatpush3.bf16.msra.mxu0 %v1628_v28 }
  0x5b   : > { %1541 = vmatprep.subr.bf16.mxu0 %v1629_v30 }
  0x5e   : > { %1542 = vmatpush3.bf16.msra.mxu0 %v1629_v30 }
  0x5f   : > { %1543 = vmatprep.subr.bf16.mxu0 %v1630_v6 }
  0x62   : > { %1544 = vmatpush3.bf16.msra.mxu0 %v1630_v6 }
  0x65   : > { %1546 = vmatmul.mubr.msk.bf16.vlgmr.msra.gmra.mrb[0].mxu0 %vm290_vm3, %v1376_v12 }
 0x125   : > { %v1487_v13 = vpop.f32.mrb[0].mxu1 }
 0x126   : > { %v633_v14 = vpop.f32.mrb[1].mxu1 }
 0x127   : > { %v1488_v15 = vpop.f32.mrb[2].mxu1 }
 0x128   : > { %v636_v16 = vpop.f32.mrb[3].mxu1 }
 0x138   : > { %v1547_v17 = vpop.f32.mrb[0].mxu0 }
 0x139   : > { %v1549_v19 = vadd.f32 %v1547_v17, %v1487_v13  ;;  %v1135_v20 = vpop.f32.mrb[1].mxu0 }
 0x13a   : > { %v1550_v11 = vadd.f32 %v1135_v20, %v633_v14  ;;  %v1548_v21 = vpop.f32.mrb[2].mxu0 }
 0x13b   : > { %v1163_v22 = vadd.f32 %v1549_v19, %v1383_v18  ;;  %v1551_v24 = vadd.f32 %v1548_v21, %v1488_v15  ;;  %v1138_v26 = vpop.f32.mrb[3].mxu0 }
 0x13c   : > { %v1161_v27 = vadd.f32 %v1550_v11, %v1383_v18  ;;  %v1552_v25 = vadd.f32 %v1138_v26, %v636_v16 }
 0x13d   : > { %vm1167_vm7 = vcmp.ge.f32.partialorder %v1163_v22, 0.0  ;;  %v1171_v31 = vmul.f32 0.01, %v1163_v22  ;;  %v1164_v8 = vadd.f32 %v1551_v24, %v1383_v18 }
 0x13e   : > { %vm1165_vm8 = vcmp.ge.f32.partialorder %v1161_v27, 0.0  ;;  %v1169_v32 = vmul.f32 0.01, %v1161_v27  ;;  %v1162_v29 = vadd.f32 %v1552_v25, %v1383_v18 }
 0x13f   : > { %v1175_v33 = vsel %vm1167_vm7, %v1163_v22, %v1171_v31  ;;  %vm1168_vm9 = vcmp.ge.f32.partialorder %v1164_v8, 0.0  ;;  %v1172_v35 = vmul.f32 0.01, %v1164_v8 }
 0x140   : > { %1179 = vst [vmem:[%s170_s21 + $0x10] sm:$0xff] %v1175_v33  ;;  %v1173_v7 = vsel %vm1165_vm8, %v1161_v27, %v1169_v32  ;;  %vm1166_vm10 = vcmp.ge.f32.partialorder %v1162_v29, 0.0  ;;  %v1170_v36 = vmul.f32 0.01, %v1162_v29 }
 0x141   : > { %1177 = vst [vmem:[%s170_s21] sm:$0xff] %v1173_v7  ;;  %v1176_v37 = vsel %vm1168_vm9, %v1164_v8, %v1172_v35 }
 0x142   : > { %1180 = vst [vmem:[%s170_s21 + $0x18] sm:$0xff] %v1176_v37  ;;  %v1174_v38 = vsel %vm1166_vm10, %v1162_v29, %v1170_v36 }
 0x143   : > { %1178 = vst [vmem:[%s170_s21 + $0x8] sm:$0xff] %v1174_v38 }
 0x144 PF: > { %s13_s12 = sadd.s32 1, %s1637_s12  }
 0x145   : > { %p10_p4 = scmp.ge.s32.totalorder %s13_s12, 6  }
 0x147   :  { %12 = sbr.rel (!%p10_p4) target bundleno = 1 (0x1), region = 70 }

// kernel: ex_net_forward.12
= control target key start
LH: loop header
LB: loop body
LE: loop exit
PB: predicated region body
PF: predicated region fallthrough
CT: control target
= control target key end

     0   :  { %s248_s6 = smov 0   ;;  %s265_s0 = inlined_call_operand.vmem [shape: f32[4,2,2,256], index: 0, kind: input, shape index: {}]   ;;  %s266_s1 = inlined_call_operand.vmem [shape: f32[4,2,128], index: 1, kind: output, shape index: {}]  }
   0x1 LB: > { %s209_s7 = sadd.s32 4294967295, %s236_s6   ;;  %p213_p0 = scmp.ge.s32.totalorder %s236_s6, 1  ;;  %s236_s6 = sphi %s248_s6, %s11_s6  }
   0x2   : > { %p89_p1 = scmp.lt.s32.totalorder %s236_s6, 3 }
   0x4   : > { %p90_p2 = pnand %p213_p0, %p89_p1 }
   0x5   : > { %s214_s8 = sshll.u32 (!%p90_p2), %s209_s7, 1 }
   0x6   : > { %93 = sbr.rel (%p90_p2) target bundleno = 28 (0x1c), region = 24  ;;  %p111_p3 = scmp.lt.s32.totalorder (!%p90_p2), %s214_s8, 3 }
   0xd   : > { %s268_s8 = smov (!%p111_p3, %s214_s8), 3 }
   0xe   : > { %s221_s9 = sshll.u32 %s268_s8, 3  ;;  %s218_s13 = sshll.u32 %s268_s8, 1 }
   0xf   : > { %s115_s12 = scalar_lea.vmem %s265_s0, %s221_s9  ;;  %s121_s16 = scalar_lea.vmem %s266_s1, %s218_s13 }
  0x10   : > { %v123_v0 = vld [vmem:[%s115_s12] sm:$0xf]  ;;  %v124_v1 = vld [vmem:[%s115_s12 + $0x4] sm:$0xf]  ;;  %v125_v2 = vld [vmem:[%s115_s12 + $0x8] sm:$0xf] }
  0x11   : > { %v126_v3 = vld [vmem:[%s115_s12 + $0xc] sm:$0xf]  ;;  %v129_v4 = vrot.slane %v123_v0, 2  ;;  %v130_v5 = vrot.slane %v125_v2, 2  ;;  %v137_v6 = vrot.slane %v124_v1, 2 }
  0x12   : > { %v138_v7 = vrot.slane %v126_v3, 2 }
  0x13   : > { %v133_v8 = vmax.f32 %v123_v0, %v129_v4  ;;  %v141_v9 = vmax.f32 %v124_v1, %v137_v6  ;;  %v134_v10 = vmax.f32 %v125_v2, %v130_v5 }
  0x14   : > { %v142_v11 = vmax.f32 %v126_v3, %v138_v7 }
  0x15   : > { %v143_v12 = vmax.f32 %v133_v8, %v141_v9 }
  0x16   : > { %v144_v13 = vmax.f32 %v134_v10, %v142_v11 }
  0x17   : > { %vm145_vm0 = vcmp.ge.f32.partialorder %v143_v12, 0.0  ;;  %v147_v14 = vmul.f32 0.01, %v143_v12 }
  0x18   : > { %vm146_vm1 = vcmp.ge.f32.partialorder %v144_v13, 0.0  ;;  %v148_v15 = vmul.f32 0.01, %v144_v13 }
  0x19   : > { %v149_v16 = vsel %vm145_vm0, %v143_v12, %v147_v14 }
  0x1a   : > { %151 = vst [vmem:[%s121_s16] sm:$0x3] %v149_v16  ;;  %v150_v17 = vsel %vm146_vm1, %v144_v13, %v148_v15 }
  0x1b   : > { %152 = vst [vmem:[%s121_s16 + $0x2] sm:$0x3] %v150_v17 }
  0x1c PF: > { %s11_s6 = sadd.s32 1, %s236_s6  }
  0x1d   : > { %p8_p4 = scmp.ge.s32.totalorder %s11_s6, 4  }
  0x1f   :  { %10 = sbr.rel (!%p8_p4) target bundleno = 1 (0x1), region = 54 }

// kernel: ex_net_forward.11
= control target key start
LH: loop header
LB: loop body
LE: loop exit
PB: predicated region body
PF: predicated region fallthrough
CT: control target
= control target key end

     0   :  { %s1988_s12 = smov 0   ;;  %s2401_s0 = inlined_call_operand.vmem [shape: bf16[4,6,5,256], index: 0, kind: input, shape index: {}]   ;;  %s2402_s1 = inlined_call_operand.vmem [shape: bf16[9,128,128], index: 1, kind: input, shape index: {}]   ;;  %s2403_s2 = inlined_call_operand.vmem [shape: f32[1,128], index: 2, kind: input, shape index: {}]   ;;  %s2404_s3 = inlined_call_operand.vmem [shape: f32[4,8,128], index: 3, kind: output, shape index: {}]  }
   0x1 LB: > { %s1399_s13 = sadd.s32 4294967295, %s1963_s12   ;;  %p1403_p0 = scmp.ge.s32.totalorder %s1963_s12, 1  ;;  %s1963_s12 = sphi %s1988_s12, %s13_s12  }
   0x2   : > { %p137_p1 = scmp.lt.s32.totalorder %s1963_s12, 5 }
   0x4   : > { %p138_p2 = pnand %p1403_p0, %p137_p1 }
   0x5   : > { %v1882_v0 = vld [vmem:[%s2402_s1 + $0x40] sm:$0xff] (!%p138_p2)   ;;  %v1965_v1 = vmov (!%p138_p2), 0.0   ;;  %v1884_v3 = vld [vmem:[%s2402_s1 + $0x48] sm:$0xff] (!%p138_p2)   ;;  %vm1966_vm0 = vmmov (!%p138_p2), 0   ;;  %p160_p3 = scmp.lt.s32.totalorder (!%p138_p2), %s1399_s13, 3  ;;  %v1886_v5 = vld [vmem:[%s2402_s1 + $0x50] sm:$0xff] (!%p138_p2)   ;;  %v196_v9 = vlaneseq (!%p138_p2) }
   0x6   : > { %141 = sbr.rel (%p138_p2) target bundleno = 386 (0x182), region = 32  ;;  %1690 = vmatprep.subr.bf16.mxu0 (!%p138_p2), %v1965_v1  ;;  %1710 = vmatprep.subr.bf16.mxu1 (!%p138_p2), %v1965_v1  ;;  %v1883_v2 = vld [vmem:[%s2402_s1] sm:$0xff] (!%p138_p2)   ;;  %v1885_v4 = vld [vmem:[%s2402_s1 + $0x8] sm:$0xff] (!%p138_p2)   ;;  %v1887_v6 = vld [vmem:[%s2402_s1 + $0x10] sm:$0xff] (!%p138_p2)   ;;  %v1967_v13 = vmov (!%p138_p2), 1983009808  }
   0x7   : > { %1691 = vmatpush3.bf16.msra.mxu0 (!%p138_p2), %v1882_v0  ;;  %1706 = vmatprep.mubr.msk.bf16.mxu0 (!%p138_p2), %vm1966_vm0, %v1965_v1  ;;  %v1888_v7 = vld [vmem:[%s2402_s1 + $0x58] sm:$0xff] (!%p138_p2)   ;;  %v1890_v10 = vld [vmem:[%s2402_s1 + $0x60] sm:$0xff] (!%p138_p2)   ;;  %v1892_v12 = vld [vmem:[%s2402_s1 + $0x68] sm:$0xff] (!%p138_p2)   ;;  %v194_v14 = vunpack.c.l.s4 (!%p138_p2), %v1967_v13  ;;  %v197_v15 = vshrl.u32 (!%p138_p2), %v196_v9, 7  ;;  %vm422_vm1 = vsmask.f32 (!%p138_p2), 1280 }
   0x8   : > { %1711 = vmatpush3.bf16.msra.mxu1 (!%p138_p2), %v1883_v2  ;;  %1692 = vmatprep.subr.bf16.mxu0 (!%p138_p2), %v1965_v1  ;;  %v1889_v8 = vld [vmem:[%s2402_s1 + $0x18] sm:$0xff] (!%p138_p2)   ;;  %v1891_v11 = vld [vmem:[%s2402_s1 + $0x20] sm:$0xff] (!%p138_p2)   ;;  %v1893_v16 = vld [vmem:[%s2402_s1 + $0x28] sm:$0xff] (!%p138_p2)   ;;  %vm423_vm2 = vsmask.f32 (!%p138_p2), 3336 }
   0x9   : > { %1712 = vmatprep.subr.bf16.mxu1 (!%p138_p2), %v1965_v1  ;;  %1726 = vmatprep.mubr.msk.bf16.mxu1 (!%p138_p2), %vm1966_vm0, %v1965_v1  ;;  %v195_v18 = vunpack.c.0.s8 (!%p138_p2), %v194_v14  ;;  %v1894_v21 = vld [vmem:[%s2402_s1 + $0x70] sm:$0xff] (!%p138_p2)   ;;  %v1896_v27 = vld [vmem:[%s2402_s1 + $0x78] sm:$0xff] (!%p138_p2)   ;;  %v1899_v33 = vld [vmem:[%s2402_s1 + $0x80] sm:$0xff] (!%p138_p2)   ;;  %vm425_vm4 = vsmask.f32 (!%p138_p2), 5392 }
   0xa   : > { %v1895_v22 = vld [vmem:[%s2402_s1 + $0x30] sm:$0xff] (!%p138_p2)   ;;  %v1897_v29 = vld [vmem:[%s2402_s1 + $0x38] sm:$0xff] (!%p138_p2)   ;;  %v1900_v34 = vld [vmem:[%s2402_s1 + $0xc0] sm:$0xff] (!%p138_p2)   ;;  %vm427_vm6 = vsmask.f32 (!%p138_p2), 7448 }
   0xb   : > { %1693 = vmatpush3.bf16.msra.mxu0 (!%p138_p2), %v1884_v3  ;;  %v2060_v20 = vsub.s32 (!%p138_p2), %v195_v18, %v197_v15  ;;  %v1901_v35 = vld [vmem:[%s2402_s1 + $0x88] sm:$0xff] (!%p138_p2)   ;;  %v1903_v39 = vld [vmem:[%s2402_s1 + $0x90] sm:$0xff] (!%p138_p2)   ;;  %v1905_v45 = vld [vmem:[%s2402_s1 + $0x98] sm:$0xff] (!%p138_p2)  }
   0xc   : > { %1713 = vmatpush3.bf16.msra.mxu1 (!%p138_p2), %v1885_v4  ;;  %1694 = vmatprep.subr.bf16.mxu0 (!%p138_p2), %v1965_v1  ;;  %v1902_v36 = vld [vmem:[%s2402_s1 + $0xc8] sm:$0xff] (!%p138_p2)   ;;  %v1904_v40 = vld [vmem:[%s2402_s1 + $0xd0] sm:$0xff] (!%p138_p2)   ;;  %v1906_v50 = vld [vmem:[%s2402_s1 + $0xd8] sm:$0xff] (!%p138_p2)  }
   0xd   : > { %1714 = vmatprep.subr.bf16.mxu1 %v1965_v1  ;;  %s2408_s13 = smov (!%p160_p3, %s1399_s13), 3  ;;  %vm424_vm3 = vmor %vm422_vm1, %vm423_vm2  ;;  %v1907_v53 = vld [vmem:[%s2402_s1 + $0xa0] sm:$0xff]   ;;  %v1909_v57 = vld [vmem:[%s2402_s1 + $0xa8] sm:$0xff]  }
   0xe   : > { %s1870_s30 = smul.u32 48, %s2408_s13  ;;  %v1908_v56 = vld [vmem:[%s2402_s1 + $0xe0] sm:$0xff]   ;;  %vm426_vm5 = vmor %vm424_vm3, %vm425_vm4  ;;  %v1910_v58 = vld [vmem:[%s2402_s1 + $0xe8] sm:$0xff]   ;;  %s1405_s16 = sshll.u32 %s2408_s13, 3 }
   0xf   : > { %1695 = vmatpush3.bf16.msra.mxu0 %v1886_v5  ;;  %vm2144_vm7 = vmor %vm426_vm5, %vm427_vm6  ;;  %v1911_v0 = vld [vmem:[%s2402_s1 + $0xb0] sm:$0xff]   ;;  %v1917_v14 = vld [vmem:[%s2402_s1 + $0x140] sm:$0xff]   ;;  %s168_s19 = scalar_lea.vmem %s2404_s3, %s1405_s16 }
  0x10   : > { %1715 = vmatpush3.bf16.msra.mxu1 %v1887_v6  ;;  %1696 = vmatprep.subr.bf16.mxu0 %v1965_v1  ;;  %s2046_s10 = scalar_lea.vmem %s2401_s0, %s1870_s30  ;;  %v1912_v2 = vld [vmem:[%s2402_s1 + $0xf0] sm:$0xff]   ;;  %v1919_v18 = vld [vmem:[%s2402_s1 + $0x148] sm:$0xff]  }
  0x11   : > { %1716 = vmatprep.subr.bf16.mxu1 %v1965_v1  ;;  %v170_v17 = vld [vmem:[%s2046_s10] sm:$0x77]  ;;  %v2058_v19 = vld [vmem:[%s2046_s10 + $0x10] sm:$0x77]  ;;  %v171_v5 = vld [vmem:[%s2046_s10 + $0x8] sm:$0x77] }
  0x12   : > { %v199_v23 = vrot.slane %v170_v17, %v2060_v20  ;;  %v2072_v24 = vrot.slane %v2058_v19, %v2060_v20  ;;  %v323_v28 = vcombine.low %v170_v17, %v2058_v19  ;;  %v173_v6 = vld [vmem:[%s2046_s10 + $0x18] sm:$0x77]  ;;  %v2184_v15 = vrot.slane %v171_v5, %v2060_v20  ;;  %v1918_v17 = vld [vmem:[%s2402_s1 + $0x108] sm:$0xff]  }
  0x13   : > { %1697 = vmatpush3.bf16.msra.mxu0 %v1888_v7  ;;  %v591_v9 = vcombine.low %v171_v5, %v173_v6  ;;  %v1928_v5 = vld [vmem:[%s2402_s1 + $0x130] sm:$0xff]  }
  0x14   : > { %1717 = vmatpush3.bf16.msra.mxu1 %v1889_v8  ;;  %1698 = vmatprep.subr.bf16.mxu0 %v1965_v1  ;;  %v207_v25 = vrot.slane %v199_v23, 2  ;;  %v208_v26 = vrot.slane %v2072_v24, 2  ;;  %v330_v32 = vrot.slane %v323_v28, %v2060_v20  ;;  %v430_v37 = vshrl.u32 %v199_v23, 16  ;;  %v1913_v8 = vld [vmem:[%s2402_s1 + $0xb8] sm:$0xff]  }
  0x15   : > { %1718 = vmatprep.subr.bf16.mxu1 %v1965_v1  ;;  %v433_v38 = vshll.u32 %v199_v23, 16  ;;  %v444_v41 = vshrl.u32 %v2072_v24, 16  ;;  %v447_v42 = vshll.u32 %v2072_v24, 16  ;;  %v420_v46 = vcombine.high %v199_v23, %v199_v23  ;;  %v1920_v23 = vld [vmem:[%s2402_s1 + $0x110] sm:$0xff]  }
  0x16   : > { %v226_v30 = vcombine.low %v207_v25, %v208_v26  ;;  %v432_v43 = vrot.slane %v430_v37, 6  ;;  %v421_v47 = vcombine.high %v2072_v24, %v2072_v24  ;;  %v598_v13 = vrot.slane %v591_v9, %v2060_v20  ;;  %v1923_v37 = vld [vmem:[%s2402_s1 + $0x158] sm:$0xff]  }
  0x17   : > { %1699 = vmatpush3.bf16.msra.mxu0 %v1890_v10  ;;  %v435_v44 = vrot.slane %v433_v38, 7  ;;  %v446_v48 = vrot.slane %v444_v41, 6  ;;  %v449_v49 = vrot.slane %v447_v42, 7  ;;  %v439_v51 = vshll.u32 %v420_v46, 16  ;;  %v1914_v10 = vld [vmem:[%s2402_s1 + $0xf8] sm:$0xff]  }
  0x18   : > { %1719 = vmatpush3.bf16.msra.mxu1 %v1891_v11  ;;  %1700 = vmatprep.subr.bf16.mxu0 %v1965_v1  ;;  %v233_v31 = vrot.slane %v226_v30, %v2060_v20  ;;  %v453_v55 = vshll.u32 %v421_v47, 16  ;;  %v826_v25 = vshll.u32 %v2184_v15, 16  ;;  %v820_v41 = vcombine.high %v2184_v15, %v2184_v15 }
  0x19   : > { %1720 = vmatprep.subr.bf16.mxu1 %v1965_v1  ;;  %v436_v52 = vor.u32 %v435_v44, %v432_v43  ;;  %v450_v54 = vor.u32 %v449_v49, %v446_v48  ;;  %v441_v60 = vrot.slane %v439_v51, 7  ;;  %v1924_v48 = vld [vmem:[%s2402_s1 + $0x120] sm:$0xff]  }
  0x1a   : > { %v455_v62 = vrot.slane %v453_v55, 7  ;;  %v828_v38 = vrot.slane %v826_v25, 7  ;;  %v832_v49 = vshll.u32 %v820_v41, 16  ;;  %v1925_v51 = vld [vmem:[%s2402_s1 + $0x160] sm:$0xff]  }
  0x1b   : > { %1701 = vmatpush3.bf16.msra.mxu0 %v1892_v12  ;;  %v437_v59 = vrot.slane %v436_v52, 2  ;;  %v451_v61 = vrot.slane %v450_v54, 2  ;;  %v1915_v12 = vld [vmem:[%s2402_s1 + $0x100] sm:$0xff]  }
  0x1c   : > { %1721 = vmatpush3.bf16.msra.mxu1 %v1893_v16  ;;  %1702 = vmatprep.subr.bf16.mxu0 %v1965_v1  ;;  %v2188_v16 = vrot.slane %v173_v6, %v2060_v20  ;;  %v1929_v6 = vld [vmem:[%s2402_s1 + $0x170] sm:$0xff]   ;;  %v1940_v25 = vld [vmem:[%s2402_s1 + $0x1a0] sm:$0xff]  }
  0x1d   : > { %1722 = vmatprep.subr.bf16.mxu1 %v1965_v1  ;;  %v442_v3 = vsel %vm2144_vm7, %v437_v59, %v441_v60  ;;  %v2159_v4 = vsel %vm2144_vm7, %v451_v61, %v455_v62  ;;  %v1927_v59 = vld [vmem:[%s2402_s1 + $0x168] sm:$0xff]   ;;  %v834_v61 = vrot.slane %v832_v49, 7 }
  0x1e   : > { %v474_v7 = vcombine.low %v442_v3, %v2159_v4  ;;  %v837_v30 = vshrl.u32 %v2188_v16, 16  ;;  %v821_v44 = vcombine.high %v2188_v16, %v2188_v16  ;;  %v703_v3 = vrot.slane %v2184_v15, 2 }
  0x1f   : > { %1703 = vmatpush3.bf16.msra.mxu0 %v1894_v21  ;;  %v823_v21 = vshrl.u32 %v2184_v15, 16  ;;  %v1933_v15 = vld [vmem:[%s2402_s1 + $0x1c0] sm:$0xff]  }
  0x20   : > { %1723 = vmatpush3.bf16.msra.mxu1 %v1895_v22  ;;  %1704 = vmatprep.subr.bf16.mxu0 %v1965_v1  ;;  %v481_v11 = vrot.slane %v474_v7, %v2060_v20  ;;  %v174_v22 = vld [vmem:[%s2046_s10 + $0x20] sm:$0x77]  ;;  %v839_v42 = vrot.slane %v837_v30, 6  ;;  %v846_v54 = vshll.u32 %v821_v44, 16  ;;  %v1944_v30 = vld [vmem:[%s2402_s1 + $0x1b0] sm:$0xff]  }
  0x21   : > { %1724 = vmatprep.subr.bf16.mxu1 %v1965_v1  ;;  %v1087_v28 = vrot.slane %v174_v22, %v2060_v20 }
  0x23   : > { %1705 = vmatpush3.bf16.msra.mxu0 %v1896_v27  ;;  %v983_v27 = vcombine.low %v2058_v19, %v174_v22  ;;  %v1922_v19 = vld [vmem:[%s2402_s1 + $0x118] sm:$0xff]  }
  0x24   : > { %1725 = vmatpush3.bf16.msra.mxu1 %v1897_v29  ;;  %1730 = vmatprep.subr.bf16.mxu0 %v1965_v1  ;;  %v1921_v29 = vld [vmem:[%s2402_s1 + $0x150] sm:$0xff]   ;;  %v1938_v22 = vld [vmem:[%s2402_s1 + $0x198] sm:$0xff]  }
  0x25   : > { %1750 = vmatprep.subr.bf16.mxu1 %v1965_v1 }
  0x26   : > { %1707 = vmatmul.mubr.bf16.vlgmr.msra.gmra.mrb[0].mxu0 %v233_v31  ;;  %v840_v31 = vshll.u32 %v2188_v16, 16 }
  0x27   : > { %1727 = vmatmul.mubr.bf16.vlgmr.msra.gmra.mrb[0].mxu1 %v330_v32  ;;  %1731 = vmatpush3.bf16.msra.mxu0 %v1899_v33  ;;  %v2217_v32 = vrot.slane %v983_v27, %v2060_v20  ;;  %v1088_v33 = vrot.slane %v1087_v28, 2  ;;  %v1941_v27 = vld [vmem:[%s2402_s1 + $0x1e0] sm:$0xff]  }
  0x28   : > { %1751 = vmatpush3.bf16.msra.mxu1 %v1900_v34  ;;  %1732 = vmatprep.subr.bf16.mxu0 %v1965_v1  ;;  %v825_v34 = vrot.slane %v823_v21, 6  ;;  %v1937_v21 = vld [vmem:[%s2402_s1 + $0x1d0] sm:$0xff]  }
  0x29   : > { %1752 = vmatprep.subr.bf16.mxu1 %v1965_v1  ;;  %1746 = vmatprep.mubr.msk.bf16.mxu0 %vm1966_vm0, %v1965_v1 }
  0x2a   : > { %1766 = vmatprep.mubr.msk.bf16.mxu1 %vm1966_vm0, %v1965_v1  ;;  %v829_v52 = vor.u32 %v828_v38, %v825_v34  ;;  %v1949_v34 = vld [vmem:[%s2402_s1 + $0x200] sm:$0xff]   ;;  %v1955_v38 = vld [vmem:[%s2402_s1 + $0x230] sm:$0xff]  }
  0x2b   : > { %1733 = vmatpush3.bf16.msra.mxu0 %v1901_v35  ;;  %v1204_v35 = vcombine.high %v1087_v28, %v1087_v28 }
  0x2c   : > { %1753 = vmatpush3.bf16.msra.mxu1 %v1902_v36  ;;  %1734 = vmatprep.subr.bf16.mxu0 %v1965_v1  ;;  %v1206_v36 = vshrl.u32 %v1087_v28, 16  ;;  %v830_v60 = vrot.slane %v829_v52, 2 }
  0x2d   : > { %1754 = vmatprep.subr.bf16.mxu1 %v1965_v1 }
  0x2e   : > { %v1208_v43 = vrot.slane %v1206_v36, 6  ;;  %v835_v7 = vsel %vm2144_vm7, %v830_v60, %v834_v61  ;;  %v1951_v36 = vld [vmem:[%s2402_s1 + $0x210] sm:$0xff]  }
  0x2f   : > { %1735 = vmatpush3.bf16.msra.mxu0 %v1903_v39  ;;  %v2228_v39 = vcombine.low %v208_v26, %v1088_v33  ;;  %v1215_v26 = vshll.u32 %v1204_v35, 16  ;;  %v1946_v33 = vld [vmem:[%s2402_s1 + $0x1b8] sm:$0xff]   ;;  %v1950_v35 = vld [vmem:[%s2402_s1 + $0x208] sm:$0xff]  }
  0x30   : > { %1755 = vmatpush3.bf16.msra.mxu1 %v1904_v40  ;;  %1736 = vmatprep.subr.bf16.mxu0 %v1965_v1  ;;  %v1209_v40 = vshll.u32 %v1087_v28, 16  ;;  %v1942_v28 = vld [vmem:[%s2402_s1 + $0x1a8] sm:$0xff]  }
  0x31   : > { %1756 = vmatprep.subr.bf16.mxu1 %v1965_v1  ;;  %v1113_v46 = vrot.slane %v2228_v39, %v2060_v20  ;;  %v1956_v39 = vld [vmem:[%s2402_s1 + $0x238] sm:$0xff]  }
  0x32   : > { %v1211_v24 = vrot.slane %v1209_v40, 7 }
  0x33   : > { %1737 = vmatpush3.bf16.msra.mxu0 %v1905_v45  ;;  %v842_v45 = vrot.slane %v840_v31, 7  ;;  %v1945_v31 = vld [vmem:[%s2402_s1 + $0x1f0] sm:$0xff]  }
  0x34   : > { %1757 = vmatpush3.bf16.msra.mxu1 %v1906_v50  ;;  %1738 = vmatprep.subr.bf16.mxu0 %v1965_v1  ;;  %v1212_v47 = vor.u32 %v1211_v24, %v1208_v43  ;;  %v1217_v50 = vrot.slane %v1215_v26, 7 }
  0x35   : > { %1758 = vmatprep.subr.bf16.mxu1 %v1965_v1 }
  0x36   : > { %v1213_v55 = vrot.slane %v1212_v47, 2 }
  0x37   : > { %1739 = vmatpush3.bf16.msra.mxu0 %v1907_v53  ;;  %v843_v53 = vor.u32 %v842_v45, %v839_v42 }
  0x38   : > { %1759 = vmatpush3.bf16.msra.mxu1 %v1908_v56  ;;  %1740 = vmatprep.subr.bf16.mxu0 %v1965_v1  ;;  %v1218_v56 = vsel %vm2144_vm7, %v1213_v55, %v1217_v50 }
  0x39   : > { %1760 = vmatprep.subr.bf16.mxu1 %v1965_v1  ;;  %v844_v62 = vrot.slane %v843_v53, 2 }
  0x3b   : > { %1741 = vmatpush3.bf16.msra.mxu0 %v1909_v57  ;;  %v1926_v57 = vld [vmem:[%s2402_s1 + $0x128] sm:$0xff]  }
  0x3c   : > { %1761 = vmatpush3.bf16.msra.mxu1 %v1910_v58  ;;  %1742 = vmatprep.subr.bf16.mxu0 %v1965_v1  ;;  %v1236_v58 = vcombine.low %v2159_v4, %v1218_v56  ;;  %v704_v4 = vrot.slane %v2188_v16, 2  ;;  %v1934_v16 = vld [vmem:[%s2402_s1 + $0x188] sm:$0xff]  }
  0x3d   : > { %1762 = vmatprep.subr.bf16.mxu1 %v1965_v1 }
  0x3e   : > { %v722_v9 = vcombine.low %v703_v3, %v704_v4 }
  0x3f   : > { %1743 = vmatpush3.bf16.msra.mxu0 %v1911_v0  ;;  %v848_v0 = vrot.slane %v846_v54, 7 }
  0x40   : > { %1763 = vmatpush3.bf16.msra.mxu1 %v1912_v2  ;;  %1744 = vmatprep.subr.bf16.mxu0 %v1965_v1  ;;  %v2258_v2 = vrot.slane %v1236_v58, %v2060_v20  ;;  %v729_v63 = vrot.slane %v722_v9, %v2060_v20 }
  0x41   : > { %1764 = vmatprep.subr.bf16.mxu1 %v1965_v1 }
  0x43   : > { %1745 = vmatpush3.bf16.msra.mxu0 %v1913_v8  ;;  %v849_v8 = vsel %vm2144_vm7, %v844_v62, %v848_v0 }
  0x44   : > { %1765 = vmatpush3.bf16.msra.mxu1 %v1914_v10  ;;  %1770 = vmatprep.subr.bf16.mxu0 %v1965_v1  ;;  %v1930_v10 = vld [vmem:[%s2402_s1 + $0x138] sm:$0xff]  }
  0x45   : > { %1790 = vmatprep.subr.bf16.mxu1 %v1965_v1 }
  0x46   : > { %1747 = vmatmul.mubr.bf16.vlgmr.msra.gmra.mrb[4].mxu0 %v481_v11  ;;  %v867_v11 = vcombine.low %v835_v7, %v849_v8 }
  0x47   : > { %1771 = vmatpush3.bf16.msra.mxu0 %v1915_v12  ;;  %1767 = vmatmul.mubr.bf16.vlgmr.msra.gmra.mrb[4].mxu1 %v598_v13  ;;  %v1931_v12 = vld [vmem:[%s2402_s1 + $0x178] sm:$0xff]   ;;  %v1932_v13 = vld [vmem:[%s2402_s1 + $0x180] sm:$0xff]  }
  0x48   : > { %1791 = vmatpush3.bf16.msra.mxu1 %v1917_v14  ;;  %1772 = vmatprep.subr.bf16.mxu0 %v1965_v1  ;;  %v874_v14 = vrot.slane %v867_v11, %v2060_v20  ;;  %v1952_v20 = vld [vmem:[%s2402_s1 + $0x218] sm:$0xff]  }
  0x49   : > { %1792 = vmatprep.subr.bf16.mxu1 %v1965_v1  ;;  %1786 = vmatprep.mubr.msk.bf16.mxu0 %vm1966_vm0, %v1965_v1 }
  0x4a   : > { %1806 = vmatprep.mubr.msk.bf16.mxu1 %vm1966_vm0, %v1965_v1 }
  0x4b   : > { %1773 = vmatpush3.bf16.msra.mxu0 %v1918_v17  ;;  %v1935_v17 = vld [vmem:[%s2402_s1 + $0x1c8] sm:$0xff]  }
  0x4c   : > { %1793 = vmatpush3.bf16.msra.mxu1 %v1919_v18  ;;  %1774 = vmatprep.subr.bf16.mxu0 %v1965_v1  ;;  %v1936_v18 = vld [vmem:[%s2402_s1 + $0x190] sm:$0xff]  }
  0x4d   : > { %1794 = vmatprep.subr.bf16.mxu1 %v1965_v1 }
  0x4f   : > { %1775 = vmatpush3.bf16.msra.mxu0 %v1920_v23  ;;  %v1939_v23 = vld [vmem:[%s2402_s1 + $0x1d8] sm:$0xff]  }
  0x50   : > { %1795 = vmatpush3.bf16.msra.mxu1 %v1921_v29  ;;  %1776 = vmatprep.subr.bf16.mxu0 %v1965_v1  ;;  %v1943_v29 = vld [vmem:[%s2402_s1 + $0x1e8] sm:$0xff]  }
  0x51   : > { %1796 = vmatprep.subr.bf16.mxu1 %v1965_v1 }
  0x53   : > { %1777 = vmatpush3.bf16.msra.mxu0 %v1922_v19  ;;  %v1947_v19 = vld [vmem:[%s2402_s1 + $0x1f8] sm:$0xff]  }
  0x54   : > { %1797 = vmatpush3.bf16.msra.mxu1 %v1923_v37  ;;  %1778 = vmatprep.subr.bf16.mxu0 %v1965_v1  ;;  %v1954_v37 = vld [vmem:[%s2402_s1 + $0x228] sm:$0xff]  }
  0x55   : > { %1798 = vmatprep.subr.bf16.mxu1 %v1965_v1 }
  0x57   : > { %1779 = vmatpush3.bf16.msra.mxu0 %v1924_v48 }
  0x58   : > { %1799 = vmatpush3.bf16.msra.mxu1 %v1925_v51  ;;  %1780 = vmatprep.subr.bf16.mxu0 %v1965_v1 }
  0x59   : > { %1800 = vmatprep.subr.bf16.mxu1 %v1965_v1 }
  0x5b   : > { %1781 = vmatpush3.bf16.msra.mxu0 %v1926_v57 }
  0x5c   : > { %1801 = vmatpush3.bf16.msra.mxu1 %v1927_v59  ;;  %1782 = vmatprep.subr.bf16.mxu0 %v1965_v1 }
  0x5d   : > { %1802 = vmatprep.subr.bf16.mxu1 %v1965_v1 }
  0x5f   : > { %1783 = vmatpush3.bf16.msra.mxu0 %v1928_v5 }
  0x60   : > { %1803 = vmatpush3.bf16.msra.mxu1 %v1929_v6  ;;  %1784 = vmatprep.subr.bf16.mxu0 %v1965_v1 }
  0x61   : > { %1804 = vmatprep.subr.bf16.mxu1 %v1965_v1 }
  0x63   : > { %1785 = vmatpush3.bf16.msra.mxu0 %v1930_v10 }
  0x64   : > { %1805 = vmatpush3.bf16.msra.mxu1 %v1931_v12  ;;  %1810 = vmatprep.subr.bf16.mxu0 %v1965_v1 }
  0x65   : > { %1830 = vmatprep.subr.bf16.mxu1 %v1965_v1 }
  0x66   : > { %1787 = vmatmul.mubr.bf16.vlgmr.msra.gmra.mrb[8].mxu0 %v729_v63 }
  0x67   : > { %1811 = vmatpush3.bf16.msra.mxu0 %v1932_v13  ;;  %1807 = vmatmul.mubr.bf16.vlgmr.msra.gmra.mrb[8].mxu1 %v874_v14  ;;  %v1606_v14 = vld [vmem:[%s2403_s2] ss:$0 sm:$0xff] }
  0x68   : > { %1831 = vmatpush3.bf16.msra.mxu1 %v1933_v15  ;;  %1812 = vmatprep.subr.bf16.mxu0 %v1965_v1 }
  0x69   : > { %1832 = vmatprep.subr.bf16.mxu1 %v1965_v1  ;;  %1826 = vmatprep.mubr.msk.bf16.mxu0 %vm1966_vm0, %v1965_v1 }
  0x6a   : > { %1846 = vmatprep.mubr.msk.bf16.mxu1 %vm1966_vm0, %v1965_v1 }
  0x6b   : > { %1813 = vmatpush3.bf16.msra.mxu0 %v1934_v16 }
  0x6c   : > { %1833 = vmatpush3.bf16.msra.mxu1 %v1935_v17  ;;  %1814 = vmatprep.subr.bf16.mxu0 %v1965_v1 }
  0x6d   : > { %1834 = vmatprep.subr.bf16.mxu1 %v1965_v1 }
  0x6f   : > { %1815 = vmatpush3.bf16.msra.mxu0 %v1936_v18 }
  0x70   : > { %1835 = vmatpush3.bf16.msra.mxu1 %v1937_v21  ;;  %1816 = vmatprep.subr.bf16.mxu0 %v1965_v1 }
  0x71   : > { %1836 = vmatprep.subr.bf16.mxu1 %v1965_v1 }
  0x73   : > { %1817 = vmatpush3.bf16.msra.mxu0 %v1938_v22 }
  0x74   : > { %1837 = vmatpush3.bf16.msra.mxu1 %v1939_v23  ;;  %1818 = vmatprep.subr.bf16.mxu0 %v1965_v1 }
  0x75   : > { %1838 = vmatprep.subr.bf16.mxu1 %v1965_v1 }
  0x77   : > { %1819 = vmatpush3.bf16.msra.mxu0 %v1940_v25 }
  0x78   : > { %1839 = vmatpush3.bf16.msra.mxu1 %v1941_v27  ;;  %1820 = vmatprep.subr.bf16.mxu0 %v1965_v1 }
  0x79   : > { %1840 = vmatprep.subr.bf16.mxu1 %v1965_v1 }
  0x7b   : > { %1821 = vmatpush3.bf16.msra.mxu0 %v1942_v28 }
  0x7c   : > { %1841 = vmatpush3.bf16.msra.mxu1 %v1943_v29  ;;  %1822 = vmatprep.subr.bf16.mxu0 %v1965_v1 }
  0x7d   : > { %1842 = vmatprep.subr.bf16.mxu1 %v1965_v1 }
  0x7f   : > { %1823 = vmatpush3.bf16.msra.mxu0 %v1944_v30 }
  0x80   : > { %1843 = vmatpush3.bf16.msra.mxu1 %v1945_v31  ;;  %1824 = vmatprep.subr.bf16.mxu0 %v1965_v1 }
  0x81   : > { %1844 = vmatprep.subr.bf16.mxu1 %v1965_v1 }
  0x83   : > { %1825 = vmatpush3.bf16.msra.mxu0 %v1946_v33 }
  0x84   : > { %1845 = vmatpush3.bf16.msra.mxu1 %v1947_v19  ;;  %1850 = vmatprep.subr.bf16.mxu0 %v1965_v1 }
  0x86   : > { %1827 = vmatmul.mubr.bf16.vlgmr.msra.gmra.mrb[12].mxu0 %v2217_v32  ;;  %v1953_v32 = vld [vmem:[%s2402_s1 + $0x220] sm:$0xff]  }
  0x87   : > { %1851 = vmatpush3.bf16.msra.mxu0 %v1949_v34  ;;  %1847 = vmatmul.mubr.bf16.vlgmr.msra.gmra.mrb[12].mxu1 %v1113_v46 }
  0x88   : > { %1852 = vmatprep.subr.bf16.mxu0 %v1965_v1  ;;  %1866 = vmatprep.mubr.msk.bf16.mxu0 %vm1966_vm0, %v1965_v1 }
  0x8b   : > { %1853 = vmatpush3.bf16.msra.mxu0 %v1950_v35 }
  0x8c   : > { %1854 = vmatprep.subr.bf16.mxu0 %v1965_v1 }
  0x8f   : > { %1855 = vmatpush3.bf16.msra.mxu0 %v1951_v36 }
  0x90   : > { %1856 = vmatprep.subr.bf16.mxu0 %v1965_v1 }
  0x93   : > { %1857 = vmatpush3.bf16.msra.mxu0 %v1952_v20 }
  0x94   : > { %1858 = vmatprep.subr.bf16.mxu0 %v1965_v1 }
  0x97   : > { %1859 = vmatpush3.bf16.msra.mxu0 %v1953_v32 }
  0x98   : > { %1860 = vmatprep.subr.bf16.mxu0 %v1965_v1 }
  0x9b   : > { %1861 = vmatpush3.bf16.msra.mxu0 %v1954_v37 }
  0x9c   : > { %1862 = vmatprep.subr.bf16.mxu0 %v1965_v1 }
  0x9f   : > { %1863 = vmatpush3.bf16.msra.mxu0 %v1955_v38 }
  0xa0   : > { %1864 = vmatprep.subr.bf16.mxu0 %v1965_v1 }
  0xa3   : > { %1865 = vmatpush3.bf16.msra.mxu0 %v1956_v39 }
  0xa6   : > { %1867 = vmatmul.mubr.bf16.vlgmr.msra.gmra.mrb[16].mxu0 %v2258_v2 }
  0xf9   : > { %v317_v40 = vpop.f32.mrb[0].mxu0 }
  0xfa   : > { %v1708_v41 = vpop.f32.mrb[1].mxu0  ;;  %v414_v42 = vpop.f32.mrb[0].mxu1 }
  0xfb   : > { %v415_v43 = vadd.f32 %v414_v42, %v317_v40  ;;  %v320_v44 = vpop.f32.mrb[2].mxu0  ;;  %v1728_v45 = vpop.f32.mrb[1].mxu1 }
  0xfc   : > { %v1709_v46 = vpop.f32.mrb[3].mxu0  ;;  %v417_v24 = vpop.f32.mrb[2].mxu1 }
  0xfd   : > { %v1729_v26 = vpop.f32.mrb[3].mxu1 }
 0x119   : > { %v565_v47 = vpop.f32.mrb[4].mxu0 }
 0x11a   : > { %v571_v48 = vadd.f32 %v565_v47, %v415_v43  ;;  %v1748_v49 = vpop.f32.mrb[5].mxu0  ;;  %v682_v50 = vpop.f32.mrb[4].mxu1 }
 0x11b   : > { %v568_v51 = vpop.f32.mrb[6].mxu0  ;;  %v1768_v52 = vpop.f32.mrb[5].mxu1 }
 0x11c   : > { %v688_v53 = vadd.f32 %v682_v50, %v571_v48  ;;  %v1749_v1 = vpop.f32.mrb[7].mxu0  ;;  %v685_v54 = vpop.f32.mrb[6].mxu1 }
 0x11d   : > { %v1769_v55 = vpop.f32.mrb[7].mxu1 }
 0x139   : > { %v813_v56 = vpop.f32.mrb[8].mxu0 }
 0x13a   : > { %v819_v57 = vadd.f32 %v813_v56, %v688_v53  ;;  %v1788_v58 = vpop.f32.mrb[9].mxu0  ;;  %v958_v59 = vpop.f32.mrb[8].mxu1 }
 0x13b   : > { %v816_v60 = vpop.f32.mrb[10].mxu0  ;;  %v1808_v61 = vpop.f32.mrb[9].mxu1 }
 0x13c   : > { %v964_v62 = vadd.f32 %v958_v59, %v819_v57  ;;  %v1789_v0 = vpop.f32.mrb[11].mxu0  ;;  %v961_v2 = vpop.f32.mrb[10].mxu1 }
 0x13d   : > { %v1809_v3 = vpop.f32.mrb[11].mxu1 }
 0x159   : > { %v1074_v4 = vpop.f32.mrb[12].mxu0 }
 0x15a   : > { %v1080_v5 = vadd.f32 %v1074_v4, %v964_v62  ;;  %v1828_v6 = vpop.f32.mrb[13].mxu0  ;;  %v1197_v7 = vpop.f32.mrb[12].mxu1 }
 0x15b   : > { %v1077_v8 = vpop.f32.mrb[14].mxu0  ;;  %v1848_v9 = vpop.f32.mrb[13].mxu1 }
 0x15c   : > { %v1203_v10 = vadd.f32 %v1197_v7, %v1080_v5  ;;  %v1829_v11 = vpop.f32.mrb[15].mxu0  ;;  %v1200_v12 = vpop.f32.mrb[14].mxu1 }
 0x15d   : > { %v1849_v63 = vpop.f32.mrb[15].mxu1 }
 0x179   : > { %v1327_v13 = vpop.f32.mrb[16].mxu0 }
 0x17a   : > { %v1333_v15 = vadd.f32 %v1327_v13, %v1203_v10  ;;  %v1868_v16 = vpop.f32.mrb[17].mxu0 }
 0x17b   : > { %v1330_v17 = vpop.f32.mrb[18].mxu0 }
 0x17c   : > { %v1341_v18 = vadd.f32 %v1606_v14, %v1333_v15  ;;  %v1869_v21 = vpop.f32.mrb[19].mxu0 }
 0x17e   : > { %vm1342_vm8 = vcmp.ge.f32.partialorder %v1341_v18, 0.0  ;;  %v1343_v22 = vmul.f32 0.01, %v1341_v18 }
 0x180   : > { %v1344_v23 = vsel %vm1342_vm8, %v1341_v18, %v1343_v22 }
 0x181   : > { %1345 = vst [vmem:[%s168_s19] sm:$0xff] %v1344_v23 }
 0x182 PF: > { %s13_s12 = sadd.s32 1, %s1963_s12  }
 0x183   : > { %p10_p4 = scmp.ge.s32.totalorder %s13_s12, 6  }
 0x185   :  { %12 = sbr.rel (!%p10_p4) target bundleno = 1 (0x1), region = 70 }

// kernel: ex_net_forward.13
= control target key start
LH: loop header
LB: loop body
LE: loop exit
PB: predicated region body
PF: predicated region fallthrough
CT: control target
= control target key end

     0   :  { %8 = vsyncpa [#allocation3], 0  ;;  %s2363_s0 = inlined_call_operand.vmem [shape: bf16[2,4,2,256], index: 0, kind: input, shape index: {}]   ;;  %s2364_s1 = inlined_call_operand.vmem [shape: bf16[9,128,128], index: 1, kind: input, shape index: {}]   ;;  %s2365_s2 = inlined_call_operand.vmem [shape: f32[1,128], index: 2, kind: input, shape index: {}]   ;;  %s2366_s3 = inlined_call_operand.hbm [shape: f32[2,1,128], index: 3, kind: output, shape index: {}]  }
   0x1   :  { %10 = vsyncpa [#allocation3 + $0x1], 0  ;;  %s1928_s12 = smov 0   ;;  %s1930_s13 = smov 0  }
   0x2   :  { %s1932_s14 = smov 0   ;;  %s1934_s15 = smov 0  }
   0x3 LB: > { %s1949_s16 = sadd.s32 4294967295, %s1902_s15   ;;  %s1257_s17 = sadd.s32 4294967294, %s1902_s15   ;;  %s1902_s15 = sphi %s1934_s15, %s2372_s15   ;;  %s1898_s14 = sphi %s1932_s14, %s2371_s14   ;;  %s1894_s13 = sphi %s1930_s13, %s2370_s13   ;;  %s1890_s12 = sphi %s1928_s12, %s2369_s12  }
   0x4   : > { %s1953_s18 = sadd.s32 1, %s1902_s15   ;;  %s91_s19 = sadd.s32 1, %s1898_s14 }
   0x5   : > { %s88_s20 = ssub.s32 %s1902_s15, %s1953_s18  ;;  %p101_p0 = scmp.ne.s32.totalorder %s1898_s14, %s1894_s13 }
   0x6   : > { %p89_p1 = scmp.eq.s32.totalorder %s88_s20, 0  ;;  %p102_p2 = scmp.eq.s32.totalorder %s1949_s16, 1 }
   0x7   : > { %p107_p3 = scmp.ne.s32.totalorder %s1894_s13, %s1890_s12  ;;  %p108_p4 = scmp.eq.s32.totalorder %s1257_s17, 1 }
   0x8   : > { %s1964_s21 = scalar_select %p89_p1, %s1898_s14, %s91_s19  }
   0x9   : > { %p1966_p5 = por %p102_p2, %p101_p0  ;;  %p1970_p6 = por %p108_p4, %p107_p3 }
   0xa   : > { %p1260_p7 = scmp.ge.s32.totalorder %s1902_s15, 1  ;;  %p139_p8 = scmp.lt.s32.totalorder %s1902_s15, 3 }
   0xc   : > { %p140_p9 = pnand %p1260_p7, %p139_p8 }
   0xd   : > { %v1768_v0 = vld [vmem:[%s2364_s1 + $0x40] sm:$0xff] (!%p140_p9)   ;;  %v1904_v1 = vmov (!%p140_p9), 0.0   ;;  %v1770_v3 = vld [vmem:[%s2364_s1 + $0x48] sm:$0xff] (!%p140_p9)   ;;  %vm1905_vm0 = vmmov (!%p140_p9), 0   ;;  %v1772_v5 = vld [vmem:[%s2364_s1 + $0x50] sm:$0xff] (!%p140_p9)   ;;  %p161_p10 = scmp.lt.s32.totalorder (!%p140_p9), %s1949_s16, 1  ;;  %v401_v27 = vlaneseq (!%p140_p9) }
   0xe   : > { %143 = sbr.rel (%p140_p9) target bundleno = 407 (0x197), region = 32  ;;  %1546 = vmatprep.subr.bf16.mxu0 (!%p140_p9), %v1904_v1  ;;  %1566 = vmatprep.subr.bf16.mxu1 (!%p140_p9), %v1904_v1  ;;  %v1769_v2 = vld [vmem:[%s2364_s1] sm:$0xff] (!%p140_p9)   ;;  %v1771_v4 = vld [vmem:[%s2364_s1 + $0x8] sm:$0xff] (!%p140_p9)   ;;  %v1773_v6 = vld [vmem:[%s2364_s1 + $0x10] sm:$0xff] (!%p140_p9)   ;;  %v1906_v25 = vmov (!%p140_p9), 1966171168  }
   0xf   : > { %1547 = vmatpush3.bf16.msra.mxu0 (!%p140_p9), %v1768_v0  ;;  %1562 = vmatprep.mubr.msk.bf16.mxu0 (!%p140_p9), %vm1905_vm0, %v1904_v1  ;;  %v1774_v7 = vld [vmem:[%s2364_s1 + $0x58] sm:$0xff] (!%p140_p9)   ;;  %v1776_v9 = vld [vmem:[%s2364_s1 + $0x60] sm:$0xff] (!%p140_p9)   ;;  %v1778_v11 = vld [vmem:[%s2364_s1 + $0x68] sm:$0xff] (!%p140_p9)   ;;  %v399_v26 = vunpack.c.l.s4 (!%p140_p9), %v1906_v25  ;;  %v402_v31 = vshrl.u32 (!%p140_p9), %v401_v27, 7  ;;  %s1462_s6 = sshll.u32 (!%p140_p9), %s1949_s16, 4 }
  0x10   : > { %1567 = vmatpush3.bf16.msra.mxu1 (!%p140_p9), %v1769_v2  ;;  %1548 = vmatprep.subr.bf16.mxu0 (!%p140_p9), %v1904_v1  ;;  %v1775_v8 = vld [vmem:[%s2364_s1 + $0x18] sm:$0xff] (!%p140_p9)   ;;  %v1777_v10 = vld [vmem:[%s2364_s1 + $0x20] sm:$0xff] (!%p140_p9)   ;;  %v1779_v12 = vld [vmem:[%s2364_s1 + $0x28] sm:$0xff] (!%p140_p9)   ;;  %s2321_s17 = scalar_lea.hbm (!%p140_p9), %s2366_s3, %s1462_s6 }
  0x11   : > { %1568 = vmatprep.subr.bf16.mxu1 (!%p140_p9), %v1904_v1  ;;  %1582 = vmatprep.mubr.msk.bf16.mxu1 (!%p140_p9), %vm1905_vm0, %v1904_v1  ;;  %v1780_v13 = vld [vmem:[%s2364_s1 + $0x70] sm:$0xff] (!%p140_p9)   ;;  %v1782_v15 = vld [vmem:[%s2364_s1 + $0x78] sm:$0xff] (!%p140_p9)   ;;  %v1784_v19 = vld [vmem:[%s2364_s1 + $0x80] sm:$0xff] (!%p140_p9)   ;;  %v400_v30 = vunpack.c.0.s8 (!%p140_p9), %v399_v26 }
  0x12   : > { %v1781_v14 = vld [vmem:[%s2364_s1 + $0x30] sm:$0xff] (!%p140_p9)   ;;  %v1783_v17 = vld [vmem:[%s2364_s1 + $0x38] sm:$0xff] (!%p140_p9)   ;;  %v1785_v20 = vld [vmem:[%s2364_s1 + $0xc0] sm:$0xff] (!%p140_p9)  }
  0x13   : > { %1549 = vmatpush3.bf16.msra.mxu0 (!%p140_p9), %v1770_v3  ;;  %v1786_v21 = vld [vmem:[%s2364_s1 + $0x88] sm:$0xff] (!%p140_p9)   ;;  %v1788_v23 = vld [vmem:[%s2364_s1 + $0x90] sm:$0xff] (!%p140_p9)   ;;  %v1790_v28 = vld [vmem:[%s2364_s1 + $0x98] sm:$0xff] (!%p140_p9)   ;;  %v2096_v34 = vsub.s32 (!%p140_p9), %v400_v30, %v402_v31 }
  0x14   : > { %1569 = vmatpush3.bf16.msra.mxu1 (!%p140_p9), %v1771_v4  ;;  %1550 = vmatprep.subr.bf16.mxu0 (!%p140_p9), %v1904_v1  ;;  %v1787_v22 = vld [vmem:[%s2364_s1 + $0xc8] sm:$0xff] (!%p140_p9)   ;;  %v1789_v24 = vld [vmem:[%s2364_s1 + $0xd0] sm:$0xff] (!%p140_p9)   ;;  %v1791_v29 = vld [vmem:[%s2364_s1 + $0xd8] sm:$0xff] (!%p140_p9)  }
  0x15   : > { %1570 = vmatprep.subr.bf16.mxu1 %v1904_v1  ;;  %s162_s26 = scalar_select %p161_p10, %s1949_s16, 1  ;;  %v1792_v32 = vld [vmem:[%s2364_s1 + $0xa0] sm:$0xff]   ;;  %v1794_v35 = vld [vmem:[%s2364_s1 + $0xa8] sm:$0xff]   ;;  %v1796_v38 = vld [vmem:[%s2364_s1 + $0xb0] sm:$0xff]  }
  0x16   : > { %v1793_v33 = vld [vmem:[%s2364_s1 + $0xe0] sm:$0xff]   ;;  %v1795_v36 = vld [vmem:[%s2364_s1 + $0xe8] sm:$0xff]   ;;  %v1797_v39 = vld [vmem:[%s2364_s1 + $0xf0] sm:$0xff]   ;;  %s1907_s16 = smov [#allocation2]  }
  0x17   : > { %1551 = vmatpush3.bf16.msra.mxu0 %v1772_v5  ;;  %s1261_s4 = sshll.u32 %s162_s26, 3  ;;  %v1798_v41 = vld [vmem:[%s2364_s1 + $0xb8] sm:$0xff]   ;;  %v1800_v44 = vld [vmem:[%s2364_s1 + $0x100] sm:$0xff]   ;;  %v1802_v48 = vld [vmem:[%s2364_s1 + $0x108] sm:$0xff]   ;;  %s1844_s24 = sshll.u32 %s1907_s16, 4  ;;  %s1845_s24 = int_to_ptr.vmem [resolvable:$false] %s1844_s24 }
  0x18   : > { %1571 = vmatpush3.bf16.msra.mxu1 %v1773_v6  ;;  %1552 = vmatprep.subr.bf16.mxu0 %v1904_v1  ;;  %s2040_s11 = scalar_lea.vmem %s2363_s0, %s1261_s4  ;;  %v1799_v42 = vld [vmem:[%s2364_s1 + $0xf8] sm:$0xff]   ;;  %v1801_v46 = vld [vmem:[%s2364_s1 + $0x140] sm:$0xff]   ;;  %v1803_v50 = vld [vmem:[%s2364_s1 + $0x148] sm:$0xff]   ;;  %s1846_s25 = scalar_lea.vmem %s1845_s24, 32 }
  0x19   : > { %1572 = vmatprep.subr.bf16.mxu1 %v1904_v1  ;;  %v166_v16 = vld [vmem:[%s2040_s11] sm:$0x3]  ;;  %v2128_v45 = vld [vmem:[%s2040_s11 + $0x2] sm:$0x3]  ;;  %v2136_v47 = vld [vmem:[%s2040_s11 + $0x4] sm:$0x3] }
  0x1a   : > { %v186_v18 = vrot.slane %v166_v16, 1  ;;  %v404_v37 = vrot.slane %v166_v16, %v2096_v34  ;;  %v1082_v49 = vrot.slane %v2136_v47, %v2096_v34  ;;  %v1804_v52 = vld [vmem:[%s2364_s1 + $0x110] sm:$0xff]   ;;  %v1806_v54 = vld [vmem:[%s2364_s1 + $0x118] sm:$0xff]   ;;  %v1808_v56 = vld [vmem:[%s2364_s1 + $0x120] sm:$0xff]   ;;  %v743_v60 = vrot.slane %v2128_v45, %v2096_v34  ;;  %s159_s11 = sand.u32 1, %s1894_s13  }
  0x1b   : > { %1553 = vmatpush3.bf16.msra.mxu0 %v1774_v7  ;;  %v1805_v53 = vld [vmem:[%s2364_s1 + $0x150] sm:$0xff]   ;;  %v1807_v55 = vld [vmem:[%s2364_s1 + $0x158] sm:$0xff]   ;;  %v1809_v57 = vld [vmem:[%s2364_s1 + $0x160] sm:$0xff]   ;;  %v612_v3 = vrot.slane %v2128_v45, 1  ;;  %s160_s7 = scalar_lea.vmem [#allocation2], %s159_s11  ;;  %s1190_s19 = scalar_lea.sflag [#allocation3], %s159_s11 }
  0x1c   : > { %1573 = vmatpush3.bf16.msra.mxu1 %v1775_v8  ;;  %1554 = vmatprep.subr.bf16.mxu0 %v1904_v1  ;;  %v411_v40 = vrot.slane %v404_v37, %v2096_v34  ;;  %v2152_v51 = vrot.slane %v1082_v49, %v2096_v34  ;;  %v1810_v58 = vld [vmem:[%s2364_s1 + $0x128] sm:$0xff]   ;;  %v1812_v61 = vld [vmem:[%s2364_s1 + $0x130] sm:$0xff]   ;;  %v750_v63 = vrot.slane %v743_v60, %v2096_v34  ;;  %v1814_v0 = vld [vmem:[%s2364_s1 + $0x138] sm:$0xff]   ;;  %s1202_s8 = sshll.u32 %s160_s7, 4  ;;  %s2323_s8 = int_to_ptr.vmem [resolvable:$true] %s1202_s8 }
  0x1d   : > { %1574 = vmatprep.subr.bf16.mxu1 %v1904_v1  ;;  %v1811_v59 = vld [vmem:[%s2364_s1 + $0x168] sm:$0xff]   ;;  %v1813_v62 = vld [vmem:[%s2364_s1 + $0x170] sm:$0xff]   ;;  %v1815_v2 = vld [vmem:[%s2364_s1 + $0x178] sm:$0xff]   ;;  %s1840_s20 = scalar_lea.vmem %s2323_s8, 16  ;;  %p1847_p0 = scmp.lt.s32.totalorder %s2323_s8, %s1845_s24 }
  0x1e   : > { %v413_v43 = vshrl.u32 %v411_v40, 16  ;;  %v1816_v4 = vld [vmem:[%s2364_s1 + $0x180] sm:$0xff]   ;;  %v752_v5 = vshrl.u32 %v750_v63, 16  ;;  %v1818_v7 = vld [vmem:[%s2364_s1 + $0x188] sm:$0xff]   ;;  %v1835_v25 = vld [vmem:[%s2364_s1 + $0x218] sm:$0xff]   ;;  %v1091_v30 = vshrl.u32 %v2152_v51, 16  ;;  %p1841_p11 = scmp.ne.s32.totalorder %s2323_s8, %s1840_s20  ;;  %p1848_p1 = scmp.lt.s32.totalorder %s1846_s25, %s1840_s20 }
  0x1f   : > { %1555 = vmatpush3.bf16.msra.mxu0 %v1776_v9  ;;  %v1817_v6 = vld [vmem:[%s2364_s1 + $0x1c0] sm:$0xff]   ;;  %v1819_v8 = vld [vmem:[%s2364_s1 + $0x1c8] sm:$0xff]   ;;  %v1820_v9 = vld [vmem:[%s2364_s1 + $0x190] sm:$0xff]  }
  0x20   : > { %1575 = vmatpush3.bf16.msra.mxu1 %v1777_v10  ;;  %1556 = vmatprep.subr.bf16.mxu0 %v1904_v1  ;;  %v1821_v10 = vld [vmem:[%s2364_s1 + $0x1d0] sm:$0xff]   ;;  %v1836_v26 = vld [vmem:[%s2364_s1 + $0x220] sm:$0xff]   ;;  %v1837_v27 = vld [vmem:[%s2364_s1 + $0x228] sm:$0xff]   ;;  %p1842_p12 = pnand %p1841_p11, %p1966_p5  ;;  %p1849_p2 = por %p1848_p1, %p1847_p0 }
  0x21   : > { %1576 = vmatprep.subr.bf16.mxu1 %v1904_v1 }
  0x22   : > { %p1843_p13 = pneg %p1842_p12 }
  0x23   : > { %1557 = vmatpush3.bf16.msra.mxu0 %v1778_v11  ;;  %v1822_v11 = vld [vmem:[%s2364_s1 + $0x198] sm:$0xff]  }
  0x24   : > { %1577 = vmatpush3.bf16.msra.mxu1 %v1779_v12  ;;  %1558 = vmatprep.subr.bf16.mxu0 %v1904_v1  ;;  %v1823_v12 = vld [vmem:[%s2364_s1 + $0x1d8] sm:$0xff]   ;;  %p1850_p3 = pnand %p1849_p2, %p1843_p13 }
  0x25   : > { %1578 = vmatprep.subr.bf16.mxu1 %v1904_v1 }
  0x27   : > { %1559 = vmatpush3.bf16.msra.mxu0 %v1780_v13  ;;  %v1824_v13 = vld [vmem:[%s2364_s1 + $0x1a0] sm:$0xff]  }
  0x28   : > { %1579 = vmatpush3.bf16.msra.mxu1 %v1781_v14  ;;  %1560 = vmatprep.subr.bf16.mxu0 %v1904_v1  ;;  %v1825_v14 = vld [vmem:[%s2364_s1 + $0x1e0] sm:$0xff]  }
  0x29   : > { %1580 = vmatprep.subr.bf16.mxu1 %v1904_v1 }
  0x2b   : > { %1561 = vmatpush3.bf16.msra.mxu0 %v1782_v15  ;;  %v1826_v15 = vld [vmem:[%s2364_s1 + $0x1a8] sm:$0xff]  }
  0x2c   : > { %1581 = vmatpush3.bf16.msra.mxu1 %v1783_v17  ;;  %1586 = vmatprep.subr.bf16.mxu0 %v1904_v1  ;;  %v1828_v17 = vld [vmem:[%s2364_s1 + $0x1b0] sm:$0xff]  }
  0x2d   : > { %1606 = vmatprep.subr.bf16.mxu1 %v1904_v1 }
  0x2e   : > { %1563 = vmatmul.mubr.bf16.vlgmr.msra.gmra.mrb[0].mxu0 %v186_v18  ;;  %v1829_v18 = vld [vmem:[%s2364_s1 + $0x1f0] sm:$0xff]  }
  0x2f   : > { %1583 = vmatmul.mubr.bf16.vlgmr.msra.gmra.mrb[0].mxu1 %v166_v16  ;;  %1587 = vmatpush3.bf16.msra.mxu0 %v1784_v19  ;;  %v1827_v16 = vld [vmem:[%s2364_s1 + $0x1e8] sm:$0xff]   ;;  %v1830_v19 = vld [vmem:[%s2364_s1 + $0x1b8] sm:$0xff]  }
  0x30   : > { %1607 = vmatpush3.bf16.msra.mxu1 %v1785_v20  ;;  %1588 = vmatprep.subr.bf16.mxu0 %v1904_v1  ;;  %v1831_v20 = vld [vmem:[%s2364_s1 + $0x1f8] sm:$0xff]  }
  0x31   : > { %1608 = vmatprep.subr.bf16.mxu1 %v1904_v1  ;;  %1602 = vmatprep.mubr.msk.bf16.mxu0 %vm1905_vm0, %v1904_v1 }
  0x32   : > { %1622 = vmatprep.mubr.msk.bf16.mxu1 %vm1905_vm0, %v1904_v1 }
  0x33   : > { %1589 = vmatpush3.bf16.msra.mxu0 %v1786_v21  ;;  %v951_v21 = vrot.slane %v2136_v47, 1 }
  0x34   : > { %1609 = vmatpush3.bf16.msra.mxu1 %v1787_v22  ;;  %1590 = vmatprep.subr.bf16.mxu0 %v1904_v1  ;;  %v1832_v22 = vld [vmem:[%s2364_s1 + $0x200] sm:$0xff]  }
  0x35   : > { %1610 = vmatprep.subr.bf16.mxu1 %v1904_v1 }
  0x37   : > { %1591 = vmatpush3.bf16.msra.mxu0 %v1788_v23  ;;  %v1833_v23 = vld [vmem:[%s2364_s1 + $0x208] sm:$0xff]  }
  0x38   : > { %1611 = vmatpush3.bf16.msra.mxu1 %v1789_v24  ;;  %1592 = vmatprep.subr.bf16.mxu0 %v1904_v1  ;;  %v1834_v24 = vld [vmem:[%s2364_s1 + $0x210] sm:$0xff]  }
  0x39   : > { %1612 = vmatprep.subr.bf16.mxu1 %v1904_v1 }
  0x3b   : > { %1593 = vmatpush3.bf16.msra.mxu0 %v1790_v28  ;;  %v1838_v28 = vld [vmem:[%s2364_s1 + $0x230] sm:$0xff]  }
  0x3c   : > { %1613 = vmatpush3.bf16.msra.mxu1 %v1791_v29  ;;  %1594 = vmatprep.subr.bf16.mxu0 %v1904_v1  ;;  %v1839_v29 = vld [vmem:[%s2364_s1 + $0x238] sm:$0xff]  }
  0x3d   : > { %1614 = vmatprep.subr.bf16.mxu1 %v1904_v1 }
  0x3f   : > { %1595 = vmatpush3.bf16.msra.mxu0 %v1792_v32 }
  0x40   : > { %1615 = vmatpush3.bf16.msra.mxu1 %v1793_v33  ;;  %1596 = vmatprep.subr.bf16.mxu0 %v1904_v1 }
  0x41   : > { %1616 = vmatprep.subr.bf16.mxu1 %v1904_v1 }
  0x43   : > { %1597 = vmatpush3.bf16.msra.mxu0 %v1794_v35 }
  0x44   : > { %1617 = vmatpush3.bf16.msra.mxu1 %v1795_v36  ;;  %1598 = vmatprep.subr.bf16.mxu0 %v1904_v1 }
  0x45   : > { %1618 = vmatprep.subr.bf16.mxu1 %v1904_v1 }
  0x47   : > { %1599 = vmatpush3.bf16.msra.mxu0 %v1796_v38 }
  0x48   : > { %1619 = vmatpush3.bf16.msra.mxu1 %v1797_v39  ;;  %1600 = vmatprep.subr.bf16.mxu0 %v1904_v1 }
  0x49   : > { %1620 = vmatprep.subr.bf16.mxu1 %v1904_v1 }
  0x4b   : > { %1601 = vmatpush3.bf16.msra.mxu0 %v1798_v41 }
  0x4c   : > { %1621 = vmatpush3.bf16.msra.mxu1 %v1799_v42  ;;  %1626 = vmatprep.subr.bf16.mxu0 %v1904_v1 }
  0x4d   : > { %1646 = vmatprep.subr.bf16.mxu1 %v1904_v1 }
  0x4e   : > { %1603 = vmatmul.mubr.bf16.vlgmr.msra.gmra.mrb[4].mxu0 %v413_v43 }
  0x4f   : > { %1627 = vmatpush3.bf16.msra.mxu0 %v1800_v44  ;;  %1623 = vmatmul.mubr.bf16.vlgmr.msra.gmra.mrb[4].mxu1 %v2128_v45 }
  0x50   : > { %1647 = vmatpush3.bf16.msra.mxu1 %v1801_v46  ;;  %1628 = vmatprep.subr.bf16.mxu0 %v1904_v1 }
  0x51   : > { %1648 = vmatprep.subr.bf16.mxu1 %v1904_v1  ;;  %1642 = vmatprep.mubr.msk.bf16.mxu0 %vm1905_vm0, %v1904_v1 }
  0x52   : > { %1662 = vmatprep.mubr.msk.bf16.mxu1 %vm1905_vm0, %v1904_v1 }
  0x53   : > { %1629 = vmatpush3.bf16.msra.mxu0 %v1802_v48 }
  0x54   : > { %1649 = vmatpush3.bf16.msra.mxu1 %v1803_v50  ;;  %1630 = vmatprep.subr.bf16.mxu0 %v1904_v1 }
  0x55   : > { %1650 = vmatprep.subr.bf16.mxu1 %v1904_v1 }
  0x57   : > { %1631 = vmatpush3.bf16.msra.mxu0 %v1804_v52 }
  0x58   : > { %1651 = vmatpush3.bf16.msra.mxu1 %v1805_v53  ;;  %1632 = vmatprep.subr.bf16.mxu0 %v1904_v1 }
  0x59   : > { %1652 = vmatprep.subr.bf16.mxu1 %v1904_v1 }
  0x5b   : > { %1633 = vmatpush3.bf16.msra.mxu0 %v1806_v54 }
  0x5c   : > { %1653 = vmatpush3.bf16.msra.mxu1 %v1807_v55  ;;  %1634 = vmatprep.subr.bf16.mxu0 %v1904_v1 }
  0x5d   : > { %1654 = vmatprep.subr.bf16.mxu1 %v1904_v1 }
  0x5f   : > { %1635 = vmatpush3.bf16.msra.mxu0 %v1808_v56 }
  0x60   : > { %1655 = vmatpush3.bf16.msra.mxu1 %v1809_v57  ;;  %1636 = vmatprep.subr.bf16.mxu0 %v1904_v1 }
  0x61   : > { %1656 = vmatprep.subr.bf16.mxu1 %v1904_v1 }
  0x63   : > { %1637 = vmatpush3.bf16.msra.mxu0 %v1810_v58 }
  0x64   : > { %1657 = vmatpush3.bf16.msra.mxu1 %v1811_v59  ;;  %1638 = vmatprep.subr.bf16.mxu0 %v1904_v1 }
  0x65   : > { %1658 = vmatprep.subr.bf16.mxu1 %v1904_v1 }
  0x67   : > { %1639 = vmatpush3.bf16.msra.mxu0 %v1812_v61 }
  0x68   : > { %1659 = vmatpush3.bf16.msra.mxu1 %v1813_v62  ;;  %1640 = vmatprep.subr.bf16.mxu0 %v1904_v1 }
  0x69   : > { %1660 = vmatprep.subr.bf16.mxu1 %v1904_v1 }
  0x6b   : > { %1641 = vmatpush3.bf16.msra.mxu0 %v1814_v0 }
  0x6c   : > { %1661 = vmatpush3.bf16.msra.mxu1 %v1815_v2  ;;  %1666 = vmatprep.subr.bf16.mxu0 %v1904_v1 }
  0x6d   : > { %1686 = vmatprep.subr.bf16.mxu1 %v1904_v1 }
  0x6e   : > { %1643 = vmatmul.mubr.bf16.vlgmr.msra.gmra.mrb[8].mxu0 %v612_v3 }
  0x6f   : > { %1667 = vmatpush3.bf16.msra.mxu0 %v1816_v4  ;;  %1663 = vmatmul.mubr.bf16.vlgmr.msra.gmra.mrb[8].mxu1 %v752_v5 }
  0x70   : > { %1687 = vmatpush3.bf16.msra.mxu1 %v1817_v6  ;;  %1668 = vmatprep.subr.bf16.mxu0 %v1904_v1 }
  0x71   : > { %1688 = vmatprep.subr.bf16.mxu1 %v1904_v1  ;;  %1682 = vmatprep.mubr.msk.bf16.mxu0 %vm1905_vm0, %v1904_v1 }
  0x72   : > { %1702 = vmatprep.mubr.msk.bf16.mxu1 %vm1905_vm0, %v1904_v1 }
  0x73   : > { %1669 = vmatpush3.bf16.msra.mxu0 %v1818_v7  ;;  %v1183_v7 = vld [vmem:[%s2365_s2] sm:$0x1] }
  0x74   : > { %1689 = vmatpush3.bf16.msra.mxu1 %v1819_v8  ;;  %1670 = vmatprep.subr.bf16.mxu0 %v1904_v1 }
  0x75   : > { %1690 = vmatprep.subr.bf16.mxu1 %v1904_v1 }
  0x77   : > { %1671 = vmatpush3.bf16.msra.mxu0 %v1820_v9 }
  0x78   : > { %1691 = vmatpush3.bf16.msra.mxu1 %v1821_v10  ;;  %1672 = vmatprep.subr.bf16.mxu0 %v1904_v1 }
  0x79   : > { %1692 = vmatprep.subr.bf16.mxu1 %v1904_v1 }
  0x7b   : > { %1673 = vmatpush3.bf16.msra.mxu0 %v1822_v11 }
  0x7c   : > { %1693 = vmatpush3.bf16.msra.mxu1 %v1823_v12  ;;  %1674 = vmatprep.subr.bf16.mxu0 %v1904_v1 }
  0x7d   : > { %1694 = vmatprep.subr.bf16.mxu1 %v1904_v1 }
  0x7f   : > { %1675 = vmatpush3.bf16.msra.mxu0 %v1824_v13 }
  0x80   : > { %1695 = vmatpush3.bf16.msra.mxu1 %v1825_v14  ;;  %1676 = vmatprep.subr.bf16.mxu0 %v1904_v1 }
  0x81   : > { %1696 = vmatprep.subr.bf16.mxu1 %v1904_v1 }
  0x83   : > { %1677 = vmatpush3.bf16.msra.mxu0 %v1826_v15 }
  0x84   : > { %1697 = vmatpush3.bf16.msra.mxu1 %v1827_v16  ;;  %1678 = vmatprep.subr.bf16.mxu0 %v1904_v1 }
  0x85   : > { %1698 = vmatprep.subr.bf16.mxu1 %v1904_v1 }
  0x87   : > { %1679 = vmatpush3.bf16.msra.mxu0 %v1828_v17 }
  0x88   : > { %1699 = vmatpush3.bf16.msra.mxu1 %v1829_v18  ;;  %1680 = vmatprep.subr.bf16.mxu0 %v1904_v1 }
  0x89   : > { %1700 = vmatprep.subr.bf16.mxu1 %v1904_v1 }
  0x8b   : > { %1681 = vmatpush3.bf16.msra.mxu0 %v1830_v19 }
  0x8c   : > { %1701 = vmatpush3.bf16.msra.mxu1 %v1831_v20  ;;  %1706 = vmatprep.subr.bf16.mxu0 %v1904_v1 }
  0x8e   : > { %1683 = vmatmul.mubr.bf16.vlgmr.msra.gmra.mrb[12].mxu0 %v2136_v47 }
  0x8f   : > { %1707 = vmatpush3.bf16.msra.mxu0 %v1832_v22  ;;  %1703 = vmatmul.mubr.bf16.vlgmr.msra.gmra.mrb[12].mxu1 %v951_v21 }
  0x90   : > { %1708 = vmatprep.subr.bf16.mxu0 %v1904_v1  ;;  %1722 = vmatprep.mubr.msk.bf16.mxu0 %vm1905_vm0, %v1904_v1 }
  0x93   : > { %1709 = vmatpush3.bf16.msra.mxu0 %v1833_v23 }
  0x94   : > { %1710 = vmatprep.subr.bf16.mxu0 %v1904_v1 }
  0x97   : > { %1711 = vmatpush3.bf16.msra.mxu0 %v1834_v24 }
  0x98   : > { %1712 = vmatprep.subr.bf16.mxu0 %v1904_v1 }
  0x9b   : > { %1713 = vmatpush3.bf16.msra.mxu0 %v1835_v25 }
  0x9c   : > { %1714 = vmatprep.subr.bf16.mxu0 %v1904_v1 }
  0x9f   : > { %1715 = vmatpush3.bf16.msra.mxu0 %v1836_v26 }
  0xa0   : > { %1716 = vmatprep.subr.bf16.mxu0 %v1904_v1 }
  0xa3   : > { %1717 = vmatpush3.bf16.msra.mxu0 %v1837_v27 }
  0xa4   : > { %1718 = vmatprep.subr.bf16.mxu0 %v1904_v1 }
  0xa7   : > { %1719 = vmatpush3.bf16.msra.mxu0 %v1838_v28 }
  0xa8   : > { %1720 = vmatprep.subr.bf16.mxu0 %v1904_v1 }
  0xab   : > { %1721 = vmatpush3.bf16.msra.mxu0 %v1839_v29 }
  0xae   : > { %1723 = vmatmul.mubr.bf16.vlgmr.msra.gmra.mrb[16].mxu0 %v1091_v30 }
 0x101   : > { %v287_v31 = vpop.f32.mrb[0].mxu0 }
 0x102   : > { %v1564_v32 = vpop.f32.mrb[1].mxu0  ;;  %v375_v33 = vpop.f32.mrb[0].mxu1 }
 0x103   : > { %v376_v34 = vadd.f32 %v375_v33, %v287_v31  ;;  %v290_v35 = vpop.f32.mrb[2].mxu0  ;;  %v1584_v36 = vpop.f32.mrb[1].mxu1 }
 0x104   : > { %v1565_v37 = vpop.f32.mrb[3].mxu0  ;;  %v378_v38 = vpop.f32.mrb[2].mxu1 }
 0x105   : > { %v1585_v39 = vpop.f32.mrb[3].mxu1 }
 0x121   : > { %v498_v40 = vpop.f32.mrb[4].mxu0 }
 0x122   : > { %v504_v41 = vadd.f32 %v498_v40, %v376_v34  ;;  %v1604_v42 = vpop.f32.mrb[5].mxu0  ;;  %v604_v43 = vpop.f32.mrb[4].mxu1 }
 0x123   : > { %v501_v44 = vpop.f32.mrb[6].mxu0  ;;  %v1624_v45 = vpop.f32.mrb[5].mxu1 }
 0x124   : > { %v610_v1 = vadd.f32 %v604_v43, %v504_v41  ;;  %v1605_v46 = vpop.f32.mrb[7].mxu0  ;;  %v607_v47 = vpop.f32.mrb[6].mxu1 }
 0x125   : > { %v1625_v48 = vpop.f32.mrb[7].mxu1 }
 0x141   : > { %v713_v49 = vpop.f32.mrb[8].mxu0 }
 0x142   : > { %v719_v50 = vadd.f32 %v713_v49, %v610_v1  ;;  %v1644_v51 = vpop.f32.mrb[9].mxu0  ;;  %v837_v52 = vpop.f32.mrb[8].mxu1 }
 0x143   : > { %v716_v53 = vpop.f32.mrb[10].mxu0  ;;  %v1664_v54 = vpop.f32.mrb[9].mxu1 }
 0x144   : > { %v843_v55 = vadd.f32 %v837_v52, %v719_v50  ;;  %v1645_v56 = vpop.f32.mrb[11].mxu0  ;;  %v840_v57 = vpop.f32.mrb[10].mxu1 }
 0x145   : > { %v1665_v58 = vpop.f32.mrb[11].mxu1 }
 0x161   : > { %v943_v59 = vpop.f32.mrb[12].mxu0 }
 0x162   : > { %v949_v60 = vadd.f32 %v943_v59, %v843_v55  ;;  %v1684_v61 = vpop.f32.mrb[13].mxu0  ;;  %v1052_v62 = vpop.f32.mrb[12].mxu1 }
 0x163   : > { %v946_v63 = vpop.f32.mrb[14].mxu0  ;;  %v1704_v0 = vpop.f32.mrb[13].mxu1 }
 0x164   : > { %v1058_v2 = vadd.f32 %v1052_v62, %v949_v60  ;;  %v1685_v3 = vpop.f32.mrb[15].mxu0  ;;  %v1055_v4 = vpop.f32.mrb[14].mxu1 }
 0x165   : > { %v1705_v5 = vpop.f32.mrb[15].mxu1 }
 0x181   : > { %v1176_v6 = vpop.f32.mrb[16].mxu0 }
 0x182   : > { %v1182_v8 = vadd.f32 %v1176_v6, %v1058_v2  ;;  %v1724_v9 = vpop.f32.mrb[17].mxu0 }
 0x183   : > { %v1179_v10 = vpop.f32.mrb[18].mxu0 }
 0x184   : > { %v1184_v11 = vadd.f32 %v1183_v7, %v1182_v8  ;;  %v1725_v12 = vpop.f32.mrb[19].mxu0 }
 0x186   : > { %v1186_v13 = vmul.f32 0.01, %v1184_v11  ;;  %vm1185_vm1 = vcmp.ge.f32.partialorder %v1184_v11, 0.0 }
 0x188   : > { %v1187_v14 = vsel %vm1185_vm1, %v1184_v11, %v1186_v13 }
 0x189   : > { %1188 = vst [vmem:[%s160_s7] sm:$0x1] %v1187_v14 }
 0x18a   : > { %1853 = shalt.err (!%p1850_p3)
}
 0x18b   : > { %s1854_s26 = scalar_lea.hbm %s2321_s17, 16  ;;  %s1858_s29 = scalar_lea.hbm %s2366_s3, 32 }
 0x18c   : > { %p1855_p4 = scmp.ne.s32.totalorder %s2321_s17, %s1854_s26  ;;  %p1859_p9 = scmp.lt.u32.totalorder %s2321_s17, %s2366_s3 }
 0x18d   : > { %p1860_p10 = scmp.lt.u32.totalorder %s1858_s29, %s1854_s26  ;;  %p1862_p12 = scmp.lt.u32.totalorder %s1854_s26, %s2321_s17 }
 0x18e   : > { %p1856_p7 = pnand %p1855_p4, %p1966_p5 }
 0x18f   : > { %p1861_p11 = por %p1860_p10, %p1859_p9 }
 0x190   : > { %p1857_p8 = pneg %p1856_p7 }
 0x191   : > { %p1863_p13 = por %p1862_p12, %p1861_p11 }
 0x193   : > { %p1864_p0 = pnand %p1863_p13, %p1857_p8 }
 0x195   : > { %1867 = shalt.err (!%p1864_p0)
}
 0x196   : > { %1726 = dma.vmem_to_hbm [thread:$0]  (%p1966_p5), %s2323_s8, 16, %s2321_s17, %s1190_s19  }
 0x197 PF: > { %p1732_p1 = scmp.ge.s32.totalorder %s1902_s15, 2  ;;  %s1214_s4 = sand.u32 1, %s1890_s12  }
 0x198   : > { %s1215_s5 = scalar_lea.sflag [#allocation3], %s1214_s4 }
 0x199   : > { %p1729_p2 = pnand %p1732_p1, %p1970_p6 }
 0x19b   : > { %1885 = dma.done.wait (!%p1729_p2), %s1215_s5, 16  }
 0x19c   : > { %1887 = vsyncadd (!%p1729_p2), %s1215_s5, 4294967280  ;;  %p13_p3 = scmp.ge.s32.totalorder %s1953_s18, 4   ;;  %s2369_s12 = smov %s1894_s13 }
 0x19d   : > { %s2370_s13 = smov %s1898_s14  ;;  %s2371_s14 = smov %s1964_s21 }
 0x19e   : > { %s2372_s15 = smov %s1953_s18  ;;  %15 = sbr.rel (!%p13_p3) target bundleno = 3 (0x3), region = 75 }
 0x1a5   :  { %1219 = vsyncpa [#allocation3], 1 }
 0x1a6   :  { %1221 = vsyncpa [#allocation3 + $0x1], 1 }

</bundles_post_ra>
